<compile_context>
chip_gen: v7x
topology: tpu7x:2x2x1
jax: 0.10.0
libtpu: 0.0.40
codegen_flags: <defaults>
</compile_context>

<pallas_src>
import functools

import jax
import jax.numpy as jnp
from jax import lax
from jax.experimental import pallas as pl
from jax.experimental.pallas import tpu as pltpu


def _sigmoid(x):
    # Numerically-stable sigmoid that lowers onto the EUP tanh unit.
    return 0.5 * (jnp.tanh(0.5 * x) + 1.0)


def _lstm_gates(g, c_prev, H):
    # PyTorch gate order (i, f, g, o). H is a multiple of 128 -> lane-aligned slices.
    i = _sigmoid(g[:, 0 * H:1 * H])
    f = _sigmoid(g[:, 1 * H:2 * H])
    gg = jnp.tanh(g[:, 2 * H:3 * H])
    o = _sigmoid(g[:, 3 * H:4 * H])
    c = f * c_prev + i * gg
    h = o * jnp.tanh(c)
    return h, c


def _discriminator_kernel(x2d_ref, wih1_ref, b1_ref, whh1_ref,
                          w2_ref, b2_ref, wlin_ref, blin_ref,
                          out_ref, g1_all,
                          *, T, B_pad, H):
    # ---- hoisted layer-1 input projection for ALL timesteps (one big matmul) ----
    # x2d: (T*B_pad, D), wih1: (D, 4H)  ->  g1_all: (T*B_pad, 4H)
    g1_all[...] = (jnp.dot(x2d_ref[...], wih1_ref[...],
                           preferred_element_type=jnp.float32)
                   + b1_ref[...])

    whh1 = whh1_ref[...]     # (H, 4H)
    w2 = w2_ref[...]         # (2H, 4H)  = [Wih_l1 ; Whh_l1] stacked
    b2 = b2_ref[...]         # (1, 4H)

    def step(t, carry):
        h1, c1, h2, c2 = carry

        # --- layer 1: only the recurrent matmul lives in the serial loop ---
        row = pl.multiple_of(t * B_pad, B_pad)
        g1 = (g1_all[pl.ds(row, B_pad), :]
              + jnp.dot(h1, whh1, preferred_element_type=jnp.float32))
        h1, c1 = _lstm_gates(g1, c1, H)

        # --- layer 2: input+recurrent matmuls fused into one MXU push ---
        hcat = jnp.concatenate([h1, h2], axis=1)          # (B_pad, 2H)
        g2 = jnp.dot(hcat, w2, preferred_element_type=jnp.float32) + b2
        h2, c2 = _lstm_gates(g2, c2, H)

        return (h1, c1, h2, c2)

    zeros = jnp.zeros((B_pad, H), jnp.float32)
    _, _, h2, _ = lax.fori_loop(0, T, step, (zeros, zeros, zeros, zeros),
                                unroll=(T <= 32))

    # ---- final Linear + Sigmoid on last timestep's layer-2 hidden state ----
    logits = (jnp.dot(h2, wlin_ref[...], preferred_element_type=jnp.float32)
              + blin_ref[...])
    out_ref[...] = _sigmoid(logits)


def discriminator_forward(x, params):
    """x: (B, T, D) float32, batch-first like nn.LSTM(batch_first=True)."""
    B, T, D = x.shape
    H = params["whh_l0"].shape[1]            # whh_l0: (4H, H)
    B_pad = max(8, ((B + 7) // 8) * 8)       # sublane-align the batch

    x_tm = jnp.transpose(x, (1, 0, 2))       # (T, B, D) time-major
    if B_pad != B:
        x_tm = jnp.pad(x_tm, ((0, 0), (0, B_pad - B), (0, 0)))
    x2d = x_tm.reshape(T * B_pad, D)         # rows [t*B_pad:(t+1)*B_pad] = step t

    # Pre-transpose weights to (in_features, 4H); stack layer-2 input/hidden
    # weights so the in-loop layer-2 projection is a single matmul.
    wih1 = params["wih_l0"].T                               # (D, 4H)
    whh1 = params["whh_l0"].T                               # (H, 4H)
    b1 = (params["bih_l0"] + params["bhh_l0"]).reshape(1, 4 * H)
    w2 = jnp.concatenate([params["wih_l1"].T,
                          params["whh_l1"].T], axis=0)      # (2H, 4H)
    b2 = (params["bih_l1"] + params["bhh_l1"]).reshape(1, 4 * H)
    wlin = params["w_lin"].T                                # (H, 1)
    blin = params["b_lin"].reshape(1, 1)                    # (1, 1)

    kernel = functools.partial(_discriminator_kernel, T=T, B_pad=B_pad, H=H)

    out = pl.pallas_call(
        kernel,
        out_shape=jax.ShapeDtypeStruct((B_pad, 1), jnp.float32),
        # No grid: single invocation; all inputs are small enough to sit whole
        # in VMEM (weights < 1 MiB, sequence a few KiB).
        scratch_shapes=[pltpu.VMEM((T * B_pad, 4 * H), jnp.float32)],
    )(x2d, wih1, b1, whh1, w2, b2, wlin, blin)

    return out[:B]


def discriminator_reference(x, params):
    """Pure-JAX reference (same math as nn.LSTM(num_layers=2) + Linear + Sigmoid)."""
    B, T, _ = x.shape
    H = params["whh_l0"].shape[1]
    hp = jax.lax.Precision.HIGHEST

    def cell(inp, h, c, wih, whh, bih, bhh):
        g = (jnp.dot(inp, wih.T, precision=hp)
             + jnp.dot(h, whh.T, precision=hp) + bih + bhh)
        i = jax.nn.sigmoid(g[:, 0 * H:1 * H])
        f = jax.nn.sigmoid(g[:, 1 * H:2 * H])
        gg = jnp.tanh(g[:, 2 * H:3 * H])
        o = jax.nn.sigmoid(g[:, 3 * H:4 * H])
        c = f * c + i * gg
        h = o * jnp.tanh(c)
        return h, c

    h1 = c1 = h2 = c2 = jnp.zeros((B, H), jnp.float32)
    for t in range(T):
        h1, c1 = cell(x[:, t], h1, c1, params["wih_l0"], params["whh_l0"],
                      params["bih_l0"], params["bhh_l0"])
        h2, c2 = cell(h1, h2, c2, params["wih_l1"], params["whh_l1"],
                      params["bih_l1"], params["bhh_l1"])
    logits = jnp.dot(h2, params["w_lin"].T, precision=hp) + params["b_lin"]
    return jax.nn.sigmoid(logits)


def init_params(key, input_dim, hidden_dim):
    """Deterministic init matching PyTorch LSTM/Linear shapes (uniform(-k, k))."""
    k_lstm = 1.0 / jnp.sqrt(hidden_dim)
    keys = jax.random.split(key, 10)

    def u(k, shape, bound):
        return jax.random.uniform(k, shape, jnp.float32, -bound, bound)

    return {
        "wih_l0": u(keys[0], (4 * hidden_dim, input_dim), k_lstm),
        "whh_l0": u(keys[1], (4 * hidden_dim, hidden_dim), k_lstm),
        "bih_l0": u(keys[2], (4 * hidden_dim,), k_lstm),
        "bhh_l0": u(keys[3], (4 * hidden_dim,), k_lstm),
        "wih_l1": u(keys[4], (4 * hidden_dim, hidden_dim), k_lstm),
        "whh_l1": u(keys[5], (4 * hidden_dim, hidden_dim), k_lstm),
        "bih_l1": u(keys[6], (4 * hidden_dim,), k_lstm),
        "bhh_l1": u(keys[7], (4 * hidden_dim,), k_lstm),
        "w_lin": u(keys[8], (1, hidden_dim), k_lstm),   # Linear(hidden, 1)
        "b_lin": u(keys[9], (1,), k_lstm),
    }


if __name__ == "__main__":
    # batch=2, seq=8, input_dim=16, hidden_dim=128 (hidden_dim from the module spec)
    B, T, D, H = 2, 8, 16, 128

    key = jax.random.PRNGKey(0)
    k_x, k_p = jax.random.split(key)
    x = jax.random.normal(k_x, (B, T, D), jnp.float32)
    params = init_params(k_p, D, H)

    out = jax.block_until_ready(discriminator_forward(x, params))
    ref = jax.block_until_ready(discriminator_reference(x, params))

    assert out.shape == (B, 1)
    assert bool(jnp.all(jnp.isfinite(out)))
    assert bool(jnp.all((out > 0.0) & (out < 1.0)))          # sigmoid range
    assert bool(jnp.allclose(out, ref, atol=2e-3, rtol=2e-3))  # matches pure-JAX LSTM
    print("KERNEL_OK")
</pallas_src>

<mosaic_0001>
module attributes {stable_mosaic.version = 11 : i64} {
  func.func @_discriminator_kernel(%arg0: memref<64x16xf32, #tpu.memory_space<vmem>>, %arg1: memref<16x512xf32, #tpu.memory_space<vmem>>, %arg2: memref<1x512xf32, #tpu.memory_space<vmem>>, %arg3: memref<128x512xf32, #tpu.memory_space<vmem>>, %arg4: memref<256x512xf32, #tpu.memory_space<vmem>>, %arg5: memref<1x512xf32, #tpu.memory_space<vmem>>, %arg6: memref<128x1xf32, #tpu.memory_space<vmem>>, %arg7: memref<1x1xf32, #tpu.memory_space<vmem>>, %arg8: memref<8x1xf32, #tpu.memory_space<vmem>>, %arg9: memref<64x512xf32, #tpu.memory_space<vmem>>) attributes {dimension_semantics = [], scalar_prefetch = 0 : i64, scratch_operands = 1 : i64, tpu.core_type = #tpu.core_type<tc>} {
    %c0 = arith.constant 0 : index
    %c0_0 = arith.constant 0 : index
    %0 = vector.load %arg0[%c0, %c0_0] : memref<64x16xf32, #tpu.memory_space<vmem>>, vector<64x16xf32>
    %c0_1 = arith.constant 0 : index
    %c0_2 = arith.constant 0 : index
    %1 = vector.load %arg1[%c0_1, %c0_2] : memref<16x512xf32, #tpu.memory_space<vmem>>, vector<16x512xf32>
    %cst = arith.constant dense<0.000000e+00> : vector<64x512xf32>
    %2 = tpu.matmul %0, %1, %cst {dimension_numbers = #tpu.dot_dimension_numbers<[1], [0], [0], [1], [0, 0, 1, 1], [], []>} : vector<64x16xf32>, vector<16x512xf32>, vector<64x512xf32> -> vector<64x512xf32>
    %c0_3 = arith.constant 0 : index
    %c0_4 = arith.constant 0 : index
    %3 = vector.load %arg2[%c0_3, %c0_4] : memref<1x512xf32, #tpu.memory_space<vmem>>, vector<1x512xf32>
    %4 = vector.broadcast %3 : vector<1x512xf32> to vector<64x512xf32>
    %5 = arith.addf %2, %4 : vector<64x512xf32>
    %c0_5 = arith.constant 0 : index
    %c0_6 = arith.constant 0 : index
    %6 = vector.load %arg9[%c0_5, %c0_6] : memref<64x512xf32, #tpu.memory_space<vmem>>, vector<64x512xf32>
    tpu.vector_store %arg9[%c0_5, %c0_6], %5 {strides = array<i32>} : memref<64x512xf32, #tpu.memory_space<vmem>>, vector<64x512xf32>,
    %c0_7 = arith.constant 0 : index
    %c0_8 = arith.constant 0 : index
    %7 = vector.load %arg3[%c0_7, %c0_8] : memref<128x512xf32, #tpu.memory_space<vmem>>, vector<128x512xf32>
    %c0_9 = arith.constant 0 : index
    %c0_10 = arith.constant 0 : index
    %8 = vector.load %arg4[%c0_9, %c0_10] : memref<256x512xf32, #tpu.memory_space<vmem>>, vector<256x512xf32>
    %c0_11 = arith.constant 0 : index
    %c0_12 = arith.constant 0 : index
    %9 = vector.load %arg5[%c0_11, %c0_12] : memref<1x512xf32, #tpu.memory_space<vmem>>, vector<1x512xf32>
    %cst_13 = arith.constant 0.000000e+00 : f32
    %10 = vector.broadcast %cst_13 : f32 to vector<8x128xf32>
    %c0_i32 = arith.constant 0 : i32
    %c8_i32 = arith.constant 8 : i32
    %11 = arith.muli %c0_i32, %c8_i32 : i32
    %12 = tpu.assume_multiple %11, 8 : i32
    %13 = arith.index_cast %12 : i32 to index
    %c0_14 = arith.constant 0 : index
    %14 = vector.load %arg9[%13, %c0_14] : memref<64x512xf32, #tpu.memory_space<vmem>>, vector<8x512xf32>
    %cst_15 = arith.constant dense<0.000000e+00> : vector<8x512xf32>
    %15 = tpu.matmul %10, %7, %cst_15 {dimension_numbers = #tpu.dot_dimension_numbers<[1], [0], [0], [1], [0, 0, 1, 1], [], []>} : vector<8x128xf32>, vector<128x512xf32>, vector<8x512xf32> -> vector<8x512xf32>
    %16 = arith.addf %14, %15 : vector<8x512xf32>
    %17 = vector.extract_strided_slice %16 {offsets = [0, 0], sizes = [8, 128], strides = [1, 1]} : vector<8x512xf32> to vector<8x128xf32>
    %cst_16 = arith.constant 5.000000e-01 : f32
    %18 = vector.broadcast %cst_16 : f32 to vector<8x128xf32>
    %19 = arith.mulf %18, %17 : vector<8x128xf32>
    %20 = math.tanh %19 : vector<8x128xf32>
    %cst_17 = arith.constant 1.000000e+00 : f32
    %21 = vector.broadcast %cst_17 : f32 to vector<8x128xf32>
    %22 = arith.addf %20, %21 : vector<8x128xf32>
    %cst_18 = arith.constant 5.000000e-01 : f32
    %23 = vector.broadcast %cst_18 : f32 to vector<8x128xf32>
    %24 = arith.mulf %23, %22 : vector<8x128xf32>
    %25 = vector.extract_strided_slice %16 {offsets = [0, 128], sizes = [8, 128], strides = [1, 1]} : vector<8x512xf32> to vector<8x128xf32>
    %cst_19 = arith.constant 5.000000e-01 : f32
    %26 = vector.broadcast %cst_19 : f32 to vector<8x128xf32>
    %27 = arith.mulf %26, %25 : vector<8x128xf32>
    %28 = math.tanh %27 : vector<8x128xf32>
    %cst_20 = arith.constant 1.000000e+00 : f32
    %29 = vector.broadcast %cst_20 : f32 to vector<8x128xf32>
    %30 = arith.addf %28, %29 : vector<8x128xf32>
    %cst_21 = arith.constant 5.000000e-01 : f32
    %31 = vector.broadcast %cst_21 : f32 to vector<8x128xf32>
    %32 = arith.mulf %31, %30 : vector<8x128xf32>
    %33 = vector.extract_strided_slice %16 {offsets = [0, 256], sizes = [8, 128], strides = [1, 1]} : vector<8x512xf32> to vector<8x128xf32>
    %34 = math.tanh %33 : vector<8x128xf32>
    %35 = vector.extract_strided_slice %16 {offsets = [0, 384], sizes = [8, 128], strides = [1, 1]} : vector<8x512xf32> to vector<8x128xf32>
    %cst_22 = arith.constant 5.000000e-01 : f32
    %36 = vector.broadcast %cst_22 : f32 to vector<8x128xf32>
    %37 = arith.mulf %36, %35 : vector<8x128xf32>
    %38 = math.tanh %37 : vector<8x128xf32>
    %cst_23 = arith.constant 1.000000e+00 : f32
    %39 = vector.broadcast %cst_23 : f32 to vector<8x128xf32>
    %40 = arith.addf %38, %39 : vector<8x128xf32>
    %cst_24 = arith.constant 5.000000e-01 : f32
    %41 = vector.broadcast %cst_24 : f32 to vector<8x128xf32>
    %42 = arith.mulf %41, %40 : vector<8x128xf32>
    %43 = arith.mulf %32, %10 : vector<8x128xf32>
    %44 = arith.mulf %24, %34 : vector<8x128xf32>
    %45 = arith.addf %43, %44 : vector<8x128xf32>
    %46 = math.tanh %45 : vector<8x128xf32>
    %47 = arith.mulf %42, %46 : vector<8x128xf32>
    %48 = tpu.concatenate %47, %10 in 1 : vector<8x128xf32>, vector<8x128xf32> -> vector<8x256xf32>
    %cst_25 = arith.constant dense<0.000000e+00> : vector<8x512xf32>
    %49 = tpu.matmul %48, %8, %cst_25 {dimension_numbers = #tpu.dot_dimension_numbers<[1], [0], [0], [1], [0, 0, 1, 1], [], []>} : vector<8x256xf32>, vector<256x512xf32>, vector<8x512xf32> -> vector<8x512xf32>
    %50 = vector.broadcast %9 : vector<1x512xf32> to vector<8x512xf32>
    %51 = arith.addf %49, %50 : vector<8x512xf32>
    %52 = vector.extract_strided_slice %51 {offsets = [0, 0], sizes = [8, 128], strides = [1, 1]} : vector<8x512xf32> to vector<8x128xf32>
    %cst_26 = arith.constant 5.000000e-01 : f32
    %53 = vector.broadcast %cst_26 : f32 to vector<8x128xf32>
    %54 = arith.mulf %53, %52 : vector<8x128xf32>
    %55 = math.tanh %54 : vector<8x128xf32>
    %cst_27 = arith.constant 1.000000e+00 : f32
    %56 = vector.broadcast %cst_27 : f32 to vector<8x128xf32>
    %57 = arith.addf %55, %56 : vector<8x128xf32>
    %cst_28 = arith.constant 5.000000e-01 : f32
    %58 = vector.broadcast %cst_28 : f32 to vector<8x128xf32>
    %59 = arith.mulf %58, %57 : vector<8x128xf32>
    %60 = vector.extract_strided_slice %51 {offsets = [0, 128], sizes = [8, 128], strides = [1, 1]} : vector<8x512xf32> to vector<8x128xf32>
    %cst_29 = arith.constant 5.000000e-01 : f32
    %61 = vector.broadcast %cst_29 : f32 to vector<8x128xf32>
    %62 = arith.mulf %61, %60 : vector<8x128xf32>
    %63 = math.tanh %62 : vector<8x128xf32>
    %cst_30 = arith.constant 1.000000e+00 : f32
    %64 = vector.broadcast %cst_30 : f32 to vector<8x128xf32>
    %65 = arith.addf %63, %64 : vector<8x128xf32>
    %cst_31 = arith.constant 5.000000e-01 : f32
    %66 = vector.broadcast %cst_31 : f32 to vector<8x128xf32>
    %67 = arith.mulf %66, %65 : vector<8x128xf32>
    %68 = vector.extract_strided_slice %51 {offsets = [0, 256], sizes = [8, 128], strides = [1, 1]} : vector<8x512xf32> to vector<8x128xf32>
    %69 = math.tanh %68 : vector<8x128xf32>
    %70 = vector.extract_strided_slice %51 {offsets = [0, 384], sizes = [8, 128], strides = [1, 1]} : vector<8x512xf32> to vector<8x128xf32>
    %cst_32 = arith.constant 5.000000e-01 : f32
    %71 = vector.broadcast %cst_32 : f32 to vector<8x128xf32>
    %72 = arith.mulf %71, %70 : vector<8x128xf32>
    %73 = math.tanh %72 : vector<8x128xf32>
    %cst_33 = arith.constant 1.000000e+00 : f32
    %74 = vector.broadcast %cst_33 : f32 to vector<8x128xf32>
    %75 = arith.addf %73, %74 : vector<8x128xf32>
    %cst_34 = arith.constant 5.000000e-01 : f32
    %76 = vector.broadcast %cst_34 : f32 to vector<8x128xf32>
    %77 = arith.mulf %76, %75 : vector<8x128xf32>
    %78 = arith.mulf %67, %10 : vector<8x128xf32>
    %79 = arith.mulf %59, %69 : vector<8x128xf32>
    %80 = arith.addf %78, %79 : vector<8x128xf32>
    %81 = math.tanh %80 : vector<8x128xf32>
    %82 = arith.mulf %77, %81 : vector<8x128xf32>
    %c1_i32 = arith.constant 1 : i32
    %c8_i32_35 = arith.constant 8 : i32
    %83 = arith.muli %c1_i32, %c8_i32_35 : i32
    %84 = tpu.assume_multiple %83, 8 : i32
    %85 = arith.index_cast %84 : i32 to index
    %c0_36 = arith.constant 0 : index
    %86 = vector.load %arg9[%85, %c0_36] : memref<64x512xf32, #tpu.memory_space<vmem>>, vector<8x512xf32>
    %cst_37 = arith.constant dense<0.000000e+00> : vector<8x512xf32>
    %87 = tpu.matmul %47, %7, %cst_37 {dimension_numbers = #tpu.dot_dimension_numbers<[1], [0], [0], [1], [0, 0, 1, 1], [], []>} : vector<8x128xf32>, vector<128x512xf32>, vector<8x512xf32> -> vector<8x512xf32>
    %88 = arith.addf %86, %87 : vector<8x512xf32>
    %89 = vector.extract_strided_slice %88 {offsets = [0, 0], sizes = [8, 128], strides = [1, 1]} : vector<8x512xf32> to vector<8x128xf32>
    %cst_38 = arith.constant 5.000000e-01 : f32
    %90 = vector.broadcast %cst_38 : f32 to vector<8x128xf32>
    %91 = arith.mulf %90, %89 : vector<8x128xf32>
    %92 = math.tanh %91 : vector<8x128xf32>
    %cst_39 = arith.constant 1.000000e+00 : f32
    %93 = vector.broadcast %cst_39 : f32 to vector<8x128xf32>
    %94 = arith.addf %92, %93 : vector<8x128xf32>
    %cst_40 = arith.constant 5.000000e-01 : f32
    %95 = vector.broadcast %cst_40 : f32 to vector<8x128xf32>
    %96 = arith.mulf %95, %94 : vector<8x128xf32>
    %97 = vector.extract_strided_slice %88 {offsets = [0, 128], sizes = [8, 128], strides = [1, 1]} : vector<8x512xf32> to vector<8x128xf32>
    %cst_41 = arith.constant 5.000000e-01 : f32
    %98 = vector.broadcast %cst_41 : f32 to vector<8x128xf32>
    %99 = arith.mulf %98, %97 : vector<8x128xf32>
    %100 = math.tanh %99 : vector<8x128xf32>
    %cst_42 = arith.constant 1.000000e+00 : f32
    %101 = vector.broadcast %cst_42 : f32 to vector<8x128xf32>
    %102 = arith.addf %100, %101 : vector<8x128xf32>
    %cst_43 = arith.constant 5.000000e-01 : f32
    %103 = vector.broadcast %cst_43 : f32 to vector<8x128xf32>
    %104 = arith.mulf %103, %102 : vector<8x128xf32>
    %105 = vector.extract_strided_slice %88 {offsets = [0, 256], sizes = [8, 128], strides = [1, 1]} : vector<8x512xf32> to vector<8x128xf32>
    %106 = math.tanh %105 : vector<8x128xf32>
    %107 = vector.extract_strided_slice %88 {offsets = [0, 384], sizes = [8, 128], strides = [1, 1]} : vector<8x512xf32> to vector<8x128xf32>
    %cst_44 = arith.constant 5.000000e-01 : f32
    %108 = vector.broadcast %cst_44 : f32 to vector<8x128xf32>
    %109 = arith.mulf %108, %107 : vector<8x128xf32>
    %110 = math.tanh %109 : vector<8x128xf32>
    %cst_45 = arith.constant 1.000000e+00 : f32
    %111 = vector.broadcast %cst_45 : f32 to vector<8x128xf32>
    %112 = arith.addf %110, %111 : vector<8x128xf32>
    %cst_46 = arith.constant 5.000000e-01 : f32
    %113 = vector.broadcast %cst_46 : f32 to vector<8x128xf32>
    %114 = arith.mulf %113, %112 : vector<8x128xf32>
    %115 = arith.mulf %104, %45 : vector<8x128xf32>
    %116 = arith.mulf %96, %106 : vector<8x128xf32>
    %117 = arith.addf %115, %116 : vector<8x128xf32>
    %118 = math.tanh %117 : vector<8x128xf32>
    %119 = arith.mulf %114, %118 : vector<8x128xf32>
    %120 = tpu.concatenate %119, %82 in 1 : vector<8x128xf32>, vector<8x128xf32> -> vector<8x256xf32>
    %cst_47 = arith.constant dense<0.000000e+00> : vector<8x512xf32>
    %121 = tpu.matmul %120, %8, %cst_47 {dimension_numbers = #tpu.dot_dimension_numbers<[1], [0], [0], [1], [0, 0, 1, 1], [], []>} : vector<8x256xf32>, vector<256x512xf32>, vector<8x512xf32> -> vector<8x512xf32>
    %122 = vector.broadcast %9 : vector<1x512xf32> to vector<8x512xf32>
    %123 = arith.addf %121, %122 : vector<8x512xf32>
    %124 = vector.extract_strided_slice %123 {offsets = [0, 0], sizes = [8, 128], strides = [1, 1]} : vector<8x512xf32> to vector<8x128xf32>
    %cst_48 = arith.constant 5.000000e-01 : f32
    %125 = vector.broadcast %cst_48 : f32 to vector<8x128xf32>
    %126 = arith.mulf %125, %124 : vector<8x128xf32>
    %127 = math.tanh %126 : vector<8x128xf32>
    %cst_49 = arith.constant 1.000000e+00 : f32
    %128 = vector.broadcast %cst_49 : f32 to vector<8x128xf32>
    %129 = arith.addf %127, %128 : vector<8x128xf32>
    %cst_50 = arith.constant 5.000000e-01 : f32
    %130 = vector.broadcast %cst_50 : f32 to vector<8x128xf32>
    %131 = arith.mulf %130, %129 : vector<8x128xf32>
    %132 = vector.extract_strided_slice %123 {offsets = [0, 128], sizes = [8, 128], strides = [1, 1]} : vector<8x512xf32> to vector<8x128xf32>
    %cst_51 = arith.constant 5.000000e-01 : f32
    %133 = vector.broadcast %cst_51 : f32 to vector<8x128xf32>
    %134 = arith.mulf %133, %132 : vector<8x128xf32>
    %135 = math.tanh %134 : vector<8x128xf32>
    %cst_52 = arith.constant 1.000000e+00 : f32
    %136 = vector.broadcast %cst_52 : f32 to vector<8x128xf32>
    %137 = arith.addf %135, %136 : vector<8x128xf32>
    %cst_53 = arith.constant 5.000000e-01 : f32
    %138 = vector.broadcast %cst_53 : f32 to vector<8x128xf32>
    %139 = arith.mulf %138, %137 : vector<8x128xf32>
    %140 = vector.extract_strided_slice %123 {offsets = [0, 256], sizes = [8, 128], strides = [1, 1]} : vector<8x512xf32> to vector<8x128xf32>
    %141 = math.tanh %140 : vector<8x128xf32>
    %142 = vector.extract_strided_slice %123 {offsets = [0, 384], sizes = [8, 128], strides = [1, 1]} : vector<8x512xf32> to vector<8x128xf32>
    %cst_54 = arith.constant 5.000000e-01 : f32
    %143 = vector.broadcast %cst_54 : f32 to vector<8x128xf32>
    %144 = arith.mulf %143, %142 : vector<8x128xf32>
    %145 = math.tanh %144 : vector<8x128xf32>
    %cst_55 = arith.constant 1.000000e+00 : f32
    %146 = vector.broadcast %cst_55 : f32 to vector<8x128xf32>
    %147 = arith.addf %145, %146 : vector<8x128xf32>
    %cst_56 = arith.constant 5.000000e-01 : f32
    %148 = vector.broadcast %cst_56 : f32 to vector<8x128xf32>
    %149 = arith.mulf %148, %147 : vector<8x128xf32>
    %150 = arith.mulf %139, %80 : vector<8x128xf32>
    %151 = arith.mulf %131, %141 : vector<8x128xf32>
    %152 = arith.addf %150, %151 : vector<8x128xf32>
    %153 = math.tanh %152 : vector<8x128xf32>
    %154 = arith.mulf %149, %153 : vector<8x128xf32>
    %c2_i32 = arith.constant 2 : i32
    %c8_i32_57 = arith.constant 8 : i32
    %155 = arith.muli %c2_i32, %c8_i32_57 : i32
    %156 = tpu.assume_multiple %155, 8 : i32
    %157 = arith.index_cast %156 : i32 to index
    %c0_58 = arith.constant 0 : index
    %158 = vector.load %arg9[%157, %c0_58] : memref<64x512xf32, #tpu.memory_space<vmem>>, vector<8x512xf32>
    %cst_59 = arith.constant dense<0.000000e+00> : vector<8x512xf32>
    %159 = tpu.matmul %119, %7, %cst_59 {dimension_numbers = #tpu.dot_dimension_numbers<[1], [0], [0], [1], [0, 0, 1, 1], [], []>} : vector<8x128xf32>, vector<128x512xf32>, vector<8x512xf32> -> vector<8x512xf32>
    %160 = arith.addf %158, %159 : vector<8x512xf32>
    %161 = vector.extract_strided_slice %160 {offsets = [0, 0], sizes = [8, 128], strides = [1, 1]} : vector<8x512xf32> to vector<8x128xf32>
    %cst_60 = arith.constant 5.000000e-01 : f32
    %162 = vector.broadcast %cst_60 : f32 to vector<8x128xf32>
    %163 = arith.mulf %162, %161 : vector<8x128xf32>
    %164 = math.tanh %163 : vector<8x128xf32>
    %cst_61 = arith.constant 1.000000e+00 : f32
    %165 = vector.broadcast %cst_61 : f32 to vector<8x128xf32>
    %166 = arith.addf %164, %165 : vector<8x128xf32>
    %cst_62 = arith.constant 5.000000e-01 : f32
    %167 = vector.broadcast %cst_62 : f32 to vector<8x128xf32>
    %168 = arith.mulf %167, %166 : vector<8x128xf32>
    %169 = vector.extract_strided_slice %160 {offsets = [0, 128], sizes = [8, 128], strides = [1, 1]} : vector<8x512xf32> to vector<8x128xf32>
    %cst_63 = arith.constant 5.000000e-01 : f32
    %170 = vector.broadcast %cst_63 : f32 to vector<8x128xf32>
    %171 = arith.mulf %170, %169 : vector<8x128xf32>
    %172 = math.tanh %171 : vector<8x128xf32>
    %cst_64 = arith.constant 1.000000e+00 : f32
    %173 = vector.broadcast %cst_64 : f32 to vector<8x128xf32>
    %174 = arith.addf %172, %173 : vector<8x128xf32>
    %cst_65 = arith.constant 5.000000e-01 : f32
    %175 = vector.broadcast %cst_65 : f32 to vector<8x128xf32>
    %176 = arith.mulf %175, %174 : vector<8x128xf32>
    %177 = vector.extract_strided_slice %160 {offsets = [0, 256], sizes = [8, 128], strides = [1, 1]} : vector<8x512xf32> to vector<8x128xf32>
    %178 = math.tanh %177 : vector<8x128xf32>
    %179 = vector.extract_strided_slice %160 {offsets = [0, 384], sizes = [8, 128], strides = [1, 1]} : vector<8x512xf32> to vector<8x128xf32>
    %cst_66 = arith.constant 5.000000e-01 : f32
    %180 = vector.broadcast %cst_66 : f32 to vector<8x128xf32>
    %181 = arith.mulf %180, %179 : vector<8x128xf32>
    %182 = math.tanh %181 : vector<8x128xf32>
    %cst_67 = arith.constant 1.000000e+00 : f32
    %183 = vector.broadcast %cst_67 : f32 to vector<8x128xf32>
    %184 = arith.addf %182, %183 : vector<8x128xf32>
    %cst_68 = arith.constant 5.000000e-01 : f32
    %185 = vector.broadcast %cst_68 : f32 to vector<8x128xf32>
    %186 = arith.mulf %185, %184 : vector<8x128xf32>
    %187 = arith.mulf %176, %117 : vector<8x128xf32>
    %188 = arith.mulf %168, %178 : vector<8x128xf32>
    %189 = arith.addf %187, %188 : vector<8x128xf32>
    %190 = math.tanh %189 : vector<8x128xf32>
    %191 = arith.mulf %186, %190 : vector<8x128xf32>
    %192 = tpu.concatenate %191, %154 in 1 : vector<8x128xf32>, vector<8x128xf32> -> vector<8x256xf32>
    %cst_69 = arith.constant dense<0.000000e+00> : vector<8x512xf32>
    %193 = tpu.matmul %192, %8, %cst_69 {dimension_numbers = #tpu.dot_dimension_numbers<[1], [0], [0], [1], [0, 0, 1, 1], [], []>} : vector<8x256xf32>, vector<256x512xf32>, vector<8x512xf32> -> vector<8x512xf32>
    %194 = vector.broadcast %9 : vector<1x512xf32> to vector<8x512xf32>
    %195 = arith.addf %193, %194 : vector<8x512xf32>
    %196 = vector.extract_strided_slice %195 {offsets = [0, 0], sizes = [8, 128], strides = [1, 1]} : vector<8x512xf32> to vector<8x128xf32>
    %cst_70 = arith.constant 5.000000e-01 : f32
    %197 = vector.broadcast %cst_70 : f32 to vector<8x128xf32>
    %198 = arith.mulf %197, %196 : vector<8x128xf32>
    %199 = math.tanh %198 : vector<8x128xf32>
    %cst_71 = arith.constant 1.000000e+00 : f32
    %200 = vector.broadcast %cst_71 : f32 to vector<8x128xf32>
    %201 = arith.addf %199, %200 : vector<8x128xf32>
    %cst_72 = arith.constant 5.000000e-01 : f32
    %202 = vector.broadcast %cst_72 : f32 to vector<8x128xf32>
    %203 = arith.mulf %202, %201 : vector<8x128xf32>
    %204 = vector.extract_strided_slice %195 {offsets = [0, 128], sizes = [8, 128], strides = [1, 1]} : vector<8x512xf32> to vector<8x128xf32>
    %cst_73 = arith.constant 5.000000e-01 : f32
    %205 = vector.broadcast %cst_73 : f32 to vector<8x128xf32>
    %206 = arith.mulf %205, %204 : vector<8x128xf32>
    %207 = math.tanh %206 : vector<8x128xf32>
    %cst_74 = arith.constant 1.000000e+00 : f32
    %208 = vector.broadcast %cst_74 : f32 to vector<8x128xf32>
    %209 = arith.addf %207, %208 : vector<8x128xf32>
    %cst_75 = arith.constant 5.000000e-01 : f32
    %210 = vector.broadcast %cst_75 : f32 to vector<8x128xf32>
    %211 = arith.mulf %210, %209 : vector<8x128xf32>
    %212 = vector.extract_strided_slice %195 {offsets = [0, 256], sizes = [8, 128], strides = [1, 1]} : vector<8x512xf32> to vector<8x128xf32>
    %213 = math.tanh %212 : vector<8x128xf32>
    %214 = vector.extract_strided_slice %195 {offsets = [0, 384], sizes = [8, 128], strides = [1, 1]} : vector<8x512xf32> to vector<8x128xf32>
    %cst_76 = arith.constant 5.000000e-01 : f32
    %215 = vector.broadcast %cst_76 : f32 to vector<8x128xf32>
    %216 = arith.mulf %215, %214 : vector<8x128xf32>
    %217 = math.tanh %216 : vector<8x128xf32>
    %cst_77 = arith.constant 1.000000e+00 : f32
    %218 = vector.broadcast %cst_77 : f32 to vector<8x128xf32>
    %219 = arith.addf %217, %218 : vector<8x128xf32>
    %cst_78 = arith.constant 5.000000e-01 : f32
    %220 = vector.broadcast %cst_78 : f32 to vector<8x128xf32>
    %221 = arith.mulf %220, %219 : vector<8x128xf32>
    %222 = arith.mulf %211, %152 : vector<8x128xf32>
    %223 = arith.mulf %203, %213 : vector<8x128xf32>
    %224 = arith.addf %222, %223 : vector<8x128xf32>
    %225 = math.tanh %224 : vector<8x128xf32>
    %226 = arith.mulf %221, %225 : vector<8x128xf32>
    %c3_i32 = arith.constant 3 : i32
    %c8_i32_79 = arith.constant 8 : i32
    %227 = arith.muli %c3_i32, %c8_i32_79 : i32
    %228 = tpu.assume_multiple %227, 8 : i32
    %229 = arith.index_cast %228 : i32 to index
    %c0_80 = arith.constant 0 : index
    %230 = vector.load %arg9[%229, %c0_80] : memref<64x512xf32, #tpu.memory_space<vmem>>, vector<8x512xf32>
    %cst_81 = arith.constant dense<0.000000e+00> : vector<8x512xf32>
    %231 = tpu.matmul %191, %7, %cst_81 {dimension_numbers = #tpu.dot_dimension_numbers<[1], [0], [0], [1], [0, 0, 1, 1], [], []>} : vector<8x128xf32>, vector<128x512xf32>, vector<8x512xf32> -> vector<8x512xf32>
    %232 = arith.addf %230, %231 : vector<8x512xf32>
    %233 = vector.extract_strided_slice %232 {offsets = [0, 0], sizes = [8, 128], strides = [1, 1]} : vector<8x512xf32> to vector<8x128xf32>
    %cst_82 = arith.constant 5.000000e-01 : f32
    %234 = vector.broadcast %cst_82 : f32 to vector<8x128xf32>
    %235 = arith.mulf %234, %233 : vector<8x128xf32>
    %236 = math.tanh %235 : vector<8x128xf32>
    %cst_83 = arith.constant 1.000000e+00 : f32
    %237 = vector.broadcast %cst_83 : f32 to vector<8x128xf32>
    %238 = arith.addf %236, %237 : vector<8x128xf32>
    %cst_84 = arith.constant 5.000000e-01 : f32
    %239 = vector.broadcast %cst_84 : f32 to vector<8x128xf32>
    %240 = arith.mulf %239, %238 : vector<8x128xf32>
    %241 = vector.extract_strided_slice %232 {offsets = [0, 128], sizes = [8, 128], strides = [1, 1]} : vector<8x512xf32> to vector<8x128xf32>
    %cst_85 = arith.constant 5.000000e-01 : f32
    %242 = vector.broadcast %cst_85 : f32 to vector<8x128xf32>
    %243 = arith.mulf %242, %241 : vector<8x128xf32>
    %244 = math.tanh %243 : vector<8x128xf32>
    %cst_86 = arith.constant 1.000000e+00 : f32
    %245 = vector.broadcast %cst_86 : f32 to vector<8x128xf32>
    %246 = arith.addf %244, %245 : vector<8x128xf32>
    %cst_87 = arith.constant 5.000000e-01 : f32
    %247 = vector.broadcast %cst_87 : f32 to vector<8x128xf32>
    %248 = arith.mulf %247, %246 : vector<8x128xf32>
    %249 = vector.extract_strided_slice %232 {offsets = [0, 256], sizes = [8, 128], strides = [1, 1]} : vector<8x512xf32> to vector<8x128xf32>
    %250 = math.tanh %249 : vector<8x128xf32>
    %251 = vector.extract_strided_slice %232 {offsets = [0, 384], sizes = [8, 128], strides = [1, 1]} : vector<8x512xf32> to vector<8x128xf32>
    %cst_88 = arith.constant 5.000000e-01 : f32
    %252 = vector.broadcast %cst_88 : f32 to vector<8x128xf32>
    %253 = arith.mulf %252, %251 : vector<8x128xf32>
    %254 = math.tanh %253 : vector<8x128xf32>
    %cst_89 = arith.constant 1.000000e+00 : f32
    %255 = vector.broadcast %cst_89 : f32 to vector<8x128xf32>
    %256 = arith.addf %254, %255 : vector<8x128xf32>
    %cst_90 = arith.constant 5.000000e-01 : f32
    %257 = vector.broadcast %cst_90 : f32 to vector<8x128xf32>
    %258 = arith.mulf %257, %256 : vector<8x128xf32>
    %259 = arith.mulf %248, %189 : vector<8x128xf32>
    %260 = arith.mulf %240, %250 : vector<8x128xf32>
    %261 = arith.addf %259, %260 : vector<8x128xf32>
    %262 = math.tanh %261 : vector<8x128xf32>
    %263 = arith.mulf %258, %262 : vector<8x128xf32>
    %264 = tpu.concatenate %263, %226 in 1 : vector<8x128xf32>, vector<8x128xf32> -> vector<8x256xf32>
    %cst_91 = arith.constant dense<0.000000e+00> : vector<8x512xf32>
    %265 = tpu.matmul %264, %8, %cst_91 {dimension_numbers = #tpu.dot_dimension_numbers<[1], [0], [0], [1], [0, 0, 1, 1], [], []>} : vector<8x256xf32>, vector<256x512xf32>, vector<8x512xf32> -> vector<8x512xf32>
    %266 = vector.broadcast %9 : vector<1x512xf32> to vector<8x512xf32>
    %267 = arith.addf %265, %266 : vector<8x512xf32>
    %268 = vector.extract_strided_slice %267 {offsets = [0, 0], sizes = [8, 128], strides = [1, 1]} : vector<8x512xf32> to vector<8x128xf32>
    %cst_92 = arith.constant 5.000000e-01 : f32
    %269 = vector.broadcast %cst_92 : f32 to vector<8x128xf32>
    %270 = arith.mulf %269, %268 : vector<8x128xf32>
    %271 = math.tanh %270 : vector<8x128xf32>
    %cst_93 = arith.constant 1.000000e+00 : f32
    %272 = vector.broadcast %cst_93 : f32 to vector<8x128xf32>
    %273 = arith.addf %271, %272 : vector<8x128xf32>
    %cst_94 = arith.constant 5.000000e-01 : f32
    %274 = vector.broadcast %cst_94 : f32 to vector<8x128xf32>
    %275 = arith.mulf %274, %273 : vector<8x128xf32>
    %276 = vector.extract_strided_slice %267 {offsets = [0, 128], sizes = [8, 128], strides = [1, 1]} : vector<8x512xf32> to vector<8x128xf32>
    %cst_95 = arith.constant 5.000000e-01 : f32
    %277 = vector.broadcast %cst_95 : f32 to vector<8x128xf32>
    %278 = arith.mulf %277, %276 : vector<8x128xf32>
    %279 = math.tanh %278 : vector<8x128xf32>
    %cst_96 = arith.constant 1.000000e+00 : f32
    %280 = vector.broadcast %cst_96 : f32 to vector<8x128xf32>
    %281 = arith.addf %279, %280 : vector<8x128xf32>
    %cst_97 = arith.constant 5.000000e-01 : f32
    %282 = vector.broadcast %cst_97 : f32 to vector<8x128xf32>
    %283 = arith.mulf %282, %281 : vector<8x128xf32>
    %284 = vector.extract_strided_slice %267 {offsets = [0, 256], sizes = [8, 128], strides = [1, 1]} : vector<8x512xf32> to vector<8x128xf32>
    %285 = math.tanh %284 : vector<8x128xf32>
    %286 = vector.extract_strided_slice %267 {offsets = [0, 384], sizes = [8, 128], strides = [1, 1]} : vector<8x512xf32> to vector<8x128xf32>
    %cst_98 = arith.constant 5.000000e-01 : f32
    %287 = vector.broadcast %cst_98 : f32 to vector<8x128xf32>
    %288 = arith.mulf %287, %286 : vector<8x128xf32>
    %289 = math.tanh %288 : vector<8x128xf32>
    %cst_99 = arith.constant 1.000000e+00 : f32
    %290 = vector.broadcast %cst_99 : f32 to vector<8x128xf32>
    %291 = arith.addf %289, %290 : vector<8x128xf32>
    %cst_100 = arith.constant 5.000000e-01 : f32
    %292 = vector.broadcast %cst_100 : f32 to vector<8x128xf32>
    %293 = arith.mulf %292, %291 : vector<8x128xf32>
    %294 = arith.mulf %283, %224 : vector<8x128xf32>
    %295 = arith.mulf %275, %285 : vector<8x128xf32>
    %296 = arith.addf %294, %295 : vector<8x128xf32>
    %297 = math.tanh %296 : vector<8x128xf32>
    %298 = arith.mulf %293, %297 : vector<8x128xf32>
    %c4_i32 = arith.constant 4 : i32
    %c8_i32_101 = arith.constant 8 : i32
    %299 = arith.muli %c4_i32, %c8_i32_101 : i32
    %300 = tpu.assume_multiple %299, 8 : i32
    %301 = arith.index_cast %300 : i32 to index
    %c0_102 = arith.constant 0 : index
    %302 = vector.load %arg9[%301, %c0_102] : memref<64x512xf32, #tpu.memory_space<vmem>>, vector<8x512xf32>
    %cst_103 = arith.constant dense<0.000000e+00> : vector<8x512xf32>
    %303 = tpu.matmul %263, %7, %cst_103 {dimension_numbers = #tpu.dot_dimension_numbers<[1], [0], [0], [1], [0, 0, 1, 1], [], []>} : vector<8x128xf32>, vector<128x512xf32>, vector<8x512xf32> -> vector<8x512xf32>
    %304 = arith.addf %302, %303 : vector<8x512xf32>
    %305 = vector.extract_strided_slice %304 {offsets = [0, 0], sizes = [8, 128], strides = [1, 1]} : vector<8x512xf32> to vector<8x128xf32>
    %cst_104 = arith.constant 5.000000e-01 : f32
    %306 = vector.broadcast %cst_104 : f32 to vector<8x128xf32>
    %307 = arith.mulf %306, %305 : vector<8x128xf32>
    %308 = math.tanh %307 : vector<8x128xf32>
    %cst_105 = arith.constant 1.000000e+00 : f32
    %309 = vector.broadcast %cst_105 : f32 to vector<8x128xf32>
    %310 = arith.addf %308, %309 : vector<8x128xf32>
    %cst_106 = arith.constant 5.000000e-01 : f32
    %311 = vector.broadcast %cst_106 : f32 to vector<8x128xf32>
    %312 = arith.mulf %311, %310 : vector<8x128xf32>
    %313 = vector.extract_strided_slice %304 {offsets = [0, 128], sizes = [8, 128], strides = [1, 1]} : vector<8x512xf32> to vector<8x128xf32>
    %cst_107 = arith.constant 5.000000e-01 : f32
    %314 = vector.broadcast %cst_107 : f32 to vector<8x128xf32>
    %315 = arith.mulf %314, %313 : vector<8x128xf32>
    %316 = math.tanh %315 : vector<8x128xf32>
    %cst_108 = arith.constant 1.000000e+00 : f32
    %317 = vector.broadcast %cst_108 : f32 to vector<8x128xf32>
    %318 = arith.addf %316, %317 : vector<8x128xf32>
    %cst_109 = arith.constant 5.000000e-01 : f32
    %319 = vector.broadcast %cst_109 : f32 to vector<8x128xf32>
    %320 = arith.mulf %319, %318 : vector<8x128xf32>
    %321 = vector.extract_strided_slice %304 {offsets = [0, 256], sizes = [8, 128], strides = [1, 1]} : vector<8x512xf32> to vector<8x128xf32>
    %322 = math.tanh %321 : vector<8x128xf32>
    %323 = vector.extract_strided_slice %304 {offsets = [0, 384], sizes = [8, 128], strides = [1, 1]} : vector<8x512xf32> to vector<8x128xf32>
    %cst_110 = arith.constant 5.000000e-01 : f32
    %324 = vector.broadcast %cst_110 : f32 to vector<8x128xf32>
    %325 = arith.mulf %324, %323 : vector<8x128xf32>
    %326 = math.tanh %325 : vector<8x128xf32>
    %cst_111 = arith.constant 1.000000e+00 : f32
    %327 = vector.broadcast %cst_111 : f32 to vector<8x128xf32>
    %328 = arith.addf %326, %327 : vector<8x128xf32>
    %cst_112 = arith.constant 5.000000e-01 : f32
    %329 = vector.broadcast %cst_112 : f32 to vector<8x128xf32>
    %330 = arith.mulf %329, %328 : vector<8x128xf32>
    %331 = arith.mulf %320, %261 : vector<8x128xf32>
    %332 = arith.mulf %312, %322 : vector<8x128xf32>
    %333 = arith.addf %331, %332 : vector<8x128xf32>
    %334 = math.tanh %333 : vector<8x128xf32>
    %335 = arith.mulf %330, %334 : vector<8x128xf32>
    %336 = tpu.concatenate %335, %298 in 1 : vector<8x128xf32>, vector<8x128xf32> -> vector<8x256xf32>
    %cst_113 = arith.constant dense<0.000000e+00> : vector<8x512xf32>
    %337 = tpu.matmul %336, %8, %cst_113 {dimension_numbers = #tpu.dot_dimension_numbers<[1], [0], [0], [1], [0, 0, 1, 1], [], []>} : vector<8x256xf32>, vector<256x512xf32>, vector<8x512xf32> -> vector<8x512xf32>
    %338 = vector.broadcast %9 : vector<1x512xf32> to vector<8x512xf32>
    %339 = arith.addf %337, %338 : vector<8x512xf32>
    %340 = vector.extract_strided_slice %339 {offsets = [0, 0], sizes = [8, 128], strides = [1, 1]} : vector<8x512xf32> to vector<8x128xf32>
    %cst_114 = arith.constant 5.000000e-01 : f32
    %341 = vector.broadcast %cst_114 : f32 to vector<8x128xf32>
    %342 = arith.mulf %341, %340 : vector<8x128xf32>
    %343 = math.tanh %342 : vector<8x128xf32>
    %cst_115 = arith.constant 1.000000e+00 : f32
    %344 = vector.broadcast %cst_115 : f32 to vector<8x128xf32>
    %345 = arith.addf %343, %344 : vector<8x128xf32>
    %cst_116 = arith.constant 5.000000e-01 : f32
    %346 = vector.broadcast %cst_116 : f32 to vector<8x128xf32>
    %347 = arith.mulf %346, %345 : vector<8x128xf32>
    %348 = vector.extract_strided_slice %339 {offsets = [0, 128], sizes = [8, 128], strides = [1, 1]} : vector<8x512xf32> to vector<8x128xf32>
    %cst_117 = arith.constant 5.000000e-01 : f32
    %349 = vector.broadcast %cst_117 : f32 to vector<8x128xf32>
    %350 = arith.mulf %349, %348 : vector<8x128xf32>
    %351 = math.tanh %350 : vector<8x128xf32>
    %cst_118 = arith.constant 1.000000e+00 : f32
    %352 = vector.broadcast %cst_118 : f32 to vector<8x128xf32>
    %353 = arith.addf %351, %352 : vector<8x128xf32>
    %cst_119 = arith.constant 5.000000e-01 : f32
    %354 = vector.broadcast %cst_119 : f32 to vector<8x128xf32>
    %355 = arith.mulf %354, %353 : vector<8x128xf32>
    %356 = vector.extract_strided_slice %339 {offsets = [0, 256], sizes = [8, 128], strides = [1, 1]} : vector<8x512xf32> to vector<8x128xf32>
    %357 = math.tanh %356 : vector<8x128xf32>
    %358 = vector.extract_strided_slice %339 {offsets = [0, 384], sizes = [8, 128], strides = [1, 1]} : vector<8x512xf32> to vector<8x128xf32>
    %cst_120 = arith.constant 5.000000e-01 : f32
    %359 = vector.broadcast %cst_120 : f32 to vector<8x128xf32>
    %360 = arith.mulf %359, %358 : vector<8x128xf32>
    %361 = math.tanh %360 : vector<8x128xf32>
    %cst_121 = arith.constant 1.000000e+00 : f32
    %362 = vector.broadcast %cst_121 : f32 to vector<8x128xf32>
    %363 = arith.addf %361, %362 : vector<8x128xf32>
    %cst_122 = arith.constant 5.000000e-01 : f32
    %364 = vector.broadcast %cst_122 : f32 to vector<8x128xf32>
    %365 = arith.mulf %364, %363 : vector<8x128xf32>
    %366 = arith.mulf %355, %296 : vector<8x128xf32>
    %367 = arith.mulf %347, %357 : vector<8x128xf32>
    %368 = arith.addf %366, %367 : vector<8x128xf32>
    %369 = math.tanh %368 : vector<8x128xf32>
    %370 = arith.mulf %365, %369 : vector<8x128xf32>
    %c5_i32 = arith.constant 5 : i32
    %c8_i32_123 = arith.constant 8 : i32
    %371 = arith.muli %c5_i32, %c8_i32_123 : i32
    %372 = tpu.assume_multiple %371, 8 : i32
    %373 = arith.index_cast %372 : i32 to index
    %c0_124 = arith.constant 0 : index
    %374 = vector.load %arg9[%373, %c0_124] : memref<64x512xf32, #tpu.memory_space<vmem>>, vector<8x512xf32>
    %cst_125 = arith.constant dense<0.000000e+00> : vector<8x512xf32>
    %375 = tpu.matmul %335, %7, %cst_125 {dimension_numbers = #tpu.dot_dimension_numbers<[1], [0], [0], [1], [0, 0, 1, 1], [], []>} : vector<8x128xf32>, vector<128x512xf32>, vector<8x512xf32> -> vector<8x512xf32>
    %376 = arith.addf %374, %375 : vector<8x512xf32>
    %377 = vector.extract_strided_slice %376 {offsets = [0, 0], sizes = [8, 128], strides = [1, 1]} : vector<8x512xf32> to vector<8x128xf32>
    %cst_126 = arith.constant 5.000000e-01 : f32
    %378 = vector.broadcast %cst_126 : f32 to vector<8x128xf32>
    %379 = arith.mulf %378, %377 : vector<8x128xf32>
    %380 = math.tanh %379 : vector<8x128xf32>
    %cst_127 = arith.constant 1.000000e+00 : f32
    %381 = vector.broadcast %cst_127 : f32 to vector<8x128xf32>
    %382 = arith.addf %380, %381 : vector<8x128xf32>
    %cst_128 = arith.constant 5.000000e-01 : f32
    %383 = vector.broadcast %cst_128 : f32 to vector<8x128xf32>
    %384 = arith.mulf %383, %382 : vector<8x128xf32>
    %385 = vector.extract_strided_slice %376 {offsets = [0, 128], sizes = [8, 128], strides = [1, 1]} : vector<8x512xf32> to vector<8x128xf32>
    %cst_129 = arith.constant 5.000000e-01 : f32
    %386 = vector.broadcast %cst_129 : f32 to vector<8x128xf32>
    %387 = arith.mulf %386, %385 : vector<8x128xf32>
    %388 = math.tanh %387 : vector<8x128xf32>
    %cst_130 = arith.constant 1.000000e+00 : f32
    %389 = vector.broadcast %cst_130 : f32 to vector<8x128xf32>
    %390 = arith.addf %388, %389 : vector<8x128xf32>
    %cst_131 = arith.constant 5.000000e-01 : f32
    %391 = vector.broadcast %cst_131 : f32 to vector<8x128xf32>
    %392 = arith.mulf %391, %390 : vector<8x128xf32>
    %393 = vector.extract_strided_slice %376 {offsets = [0, 256], sizes = [8, 128], strides = [1, 1]} : vector<8x512xf32> to vector<8x128xf32>
    %394 = math.tanh %393 : vector<8x128xf32>
    %395 = vector.extract_strided_slice %376 {offsets = [0, 384], sizes = [8, 128], strides = [1, 1]} : vector<8x512xf32> to vector<8x128xf32>
    %cst_132 = arith.constant 5.000000e-01 : f32
    %396 = vector.broadcast %cst_132 : f32 to vector<8x128xf32>
    %397 = arith.mulf %396, %395 : vector<8x128xf32>
    %398 = math.tanh %397 : vector<8x128xf32>
    %cst_133 = arith.constant 1.000000e+00 : f32
    %399 = vector.broadcast %cst_133 : f32 to vector<8x128xf32>
    %400 = arith.addf %398, %399 : vector<8x128xf32>
    %cst_134 = arith.constant 5.000000e-01 : f32
    %401 = vector.broadcast %cst_134 : f32 to vector<8x128xf32>
    %402 = arith.mulf %401, %400 : vector<8x128xf32>
    %403 = arith.mulf %392, %333 : vector<8x128xf32>
    %404 = arith.mulf %384, %394 : vector<8x128xf32>
    %405 = arith.addf %403, %404 : vector<8x128xf32>
    %406 = math.tanh %405 : vector<8x128xf32>
    %407 = arith.mulf %402, %406 : vector<8x128xf32>
    %408 = tpu.concatenate %407, %370 in 1 : vector<8x128xf32>, vector<8x128xf32> -> vector<8x256xf32>
    %cst_135 = arith.constant dense<0.000000e+00> : vector<8x512xf32>
    %409 = tpu.matmul %408, %8, %cst_135 {dimension_numbers = #tpu.dot_dimension_numbers<[1], [0], [0], [1], [0, 0, 1, 1], [], []>} : vector<8x256xf32>, vector<256x512xf32>, vector<8x512xf32> -> vector<8x512xf32>
    %410 = vector.broadcast %9 : vector<1x512xf32> to vector<8x512xf32>
    %411 = arith.addf %409, %410 : vector<8x512xf32>
    %412 = vector.extract_strided_slice %411 {offsets = [0, 0], sizes = [8, 128], strides = [1, 1]} : vector<8x512xf32> to vector<8x128xf32>
    %cst_136 = arith.constant 5.000000e-01 : f32
    %413 = vector.broadcast %cst_136 : f32 to vector<8x128xf32>
    %414 = arith.mulf %413, %412 : vector<8x128xf32>
    %415 = math.tanh %414 : vector<8x128xf32>
    %cst_137 = arith.constant 1.000000e+00 : f32
    %416 = vector.broadcast %cst_137 : f32 to vector<8x128xf32>
    %417 = arith.addf %415, %416 : vector<8x128xf32>
    %cst_138 = arith.constant 5.000000e-01 : f32
    %418 = vector.broadcast %cst_138 : f32 to vector<8x128xf32>
    %419 = arith.mulf %418, %417 : vector<8x128xf32>
    %420 = vector.extract_strided_slice %411 {offsets = [0, 128], sizes = [8, 128], strides = [1, 1]} : vector<8x512xf32> to vector<8x128xf32>
    %cst_139 = arith.constant 5.000000e-01 : f32
    %421 = vector.broadcast %cst_139 : f32 to vector<8x128xf32>
    %422 = arith.mulf %421, %420 : vector<8x128xf32>
    %423 = math.tanh %422 : vector<8x128xf32>
    %cst_140 = arith.constant 1.000000e+00 : f32
    %424 = vector.broadcast %cst_140 : f32 to vector<8x128xf32>
    %425 = arith.addf %423, %424 : vector<8x128xf32>
    %cst_141 = arith.constant 5.000000e-01 : f32
    %426 = vector.broadcast %cst_141 : f32 to vector<8x128xf32>
    %427 = arith.mulf %426, %425 : vector<8x128xf32>
    %428 = vector.extract_strided_slice %411 {offsets = [0, 256], sizes = [8, 128], strides = [1, 1]} : vector<8x512xf32> to vector<8x128xf32>
    %429 = math.tanh %428 : vector<8x128xf32>
    %430 = vector.extract_strided_slice %411 {offsets = [0, 384], sizes = [8, 128], strides = [1, 1]} : vector<8x512xf32> to vector<8x128xf32>
    %cst_142 = arith.constant 5.000000e-01 : f32
    %431 = vector.broadcast %cst_142 : f32 to vector<8x128xf32>
    %432 = arith.mulf %431, %430 : vector<8x128xf32>
    %433 = math.tanh %432 : vector<8x128xf32>
    %cst_143 = arith.constant 1.000000e+00 : f32
    %434 = vector.broadcast %cst_143 : f32 to vector<8x128xf32>
    %435 = arith.addf %433, %434 : vector<8x128xf32>
    %cst_144 = arith.constant 5.000000e-01 : f32
    %436 = vector.broadcast %cst_144 : f32 to vector<8x128xf32>
    %437 = arith.mulf %436, %435 : vector<8x128xf32>
    %438 = arith.mulf %427, %368 : vector<8x128xf32>
    %439 = arith.mulf %419, %429 : vector<8x128xf32>
    %440 = arith.addf %438, %439 : vector<8x128xf32>
    %441 = math.tanh %440 : vector<8x128xf32>
    %442 = arith.mulf %437, %441 : vector<8x128xf32>
    %c6_i32 = arith.constant 6 : i32
    %c8_i32_145 = arith.constant 8 : i32
    %443 = arith.muli %c6_i32, %c8_i32_145 : i32
    %444 = tpu.assume_multiple %443, 8 : i32
    %445 = arith.index_cast %444 : i32 to index
    %c0_146 = arith.constant 0 : index
    %446 = vector.load %arg9[%445, %c0_146] : memref<64x512xf32, #tpu.memory_space<vmem>>, vector<8x512xf32>
    %cst_147 = arith.constant dense<0.000000e+00> : vector<8x512xf32>
    %447 = tpu.matmul %407, %7, %cst_147 {dimension_numbers = #tpu.dot_dimension_numbers<[1], [0], [0], [1], [0, 0, 1, 1], [], []>} : vector<8x128xf32>, vector<128x512xf32>, vector<8x512xf32> -> vector<8x512xf32>
    %448 = arith.addf %446, %447 : vector<8x512xf32>
    %449 = vector.extract_strided_slice %448 {offsets = [0, 0], sizes = [8, 128], strides = [1, 1]} : vector<8x512xf32> to vector<8x128xf32>
    %cst_148 = arith.constant 5.000000e-01 : f32
    %450 = vector.broadcast %cst_148 : f32 to vector<8x128xf32>
    %451 = arith.mulf %450, %449 : vector<8x128xf32>
    %452 = math.tanh %451 : vector<8x128xf32>
    %cst_149 = arith.constant 1.000000e+00 : f32
    %453 = vector.broadcast %cst_149 : f32 to vector<8x128xf32>
    %454 = arith.addf %452, %453 : vector<8x128xf32>
    %cst_150 = arith.constant 5.000000e-01 : f32
    %455 = vector.broadcast %cst_150 : f32 to vector<8x128xf32>
    %456 = arith.mulf %455, %454 : vector<8x128xf32>
    %457 = vector.extract_strided_slice %448 {offsets = [0, 128], sizes = [8, 128], strides = [1, 1]} : vector<8x512xf32> to vector<8x128xf32>
    %cst_151 = arith.constant 5.000000e-01 : f32
    %458 = vector.broadcast %cst_151 : f32 to vector<8x128xf32>
    %459 = arith.mulf %458, %457 : vector<8x128xf32>
    %460 = math.tanh %459 : vector<8x128xf32>
    %cst_152 = arith.constant 1.000000e+00 : f32
    %461 = vector.broadcast %cst_152 : f32 to vector<8x128xf32>
    %462 = arith.addf %460, %461 : vector<8x128xf32>
    %cst_153 = arith.constant 5.000000e-01 : f32
    %463 = vector.broadcast %cst_153 : f32 to vector<8x128xf32>
    %464 = arith.mulf %463, %462 : vector<8x128xf32>
    %465 = vector.extract_strided_slice %448 {offsets = [0, 256], sizes = [8, 128], strides = [1, 1]} : vector<8x512xf32> to vector<8x128xf32>
    %466 = math.tanh %465 : vector<8x128xf32>
    %467 = vector.extract_strided_slice %448 {offsets = [0, 384], sizes = [8, 128], strides = [1, 1]} : vector<8x512xf32> to vector<8x128xf32>
    %cst_154 = arith.constant 5.000000e-01 : f32
    %468 = vector.broadcast %cst_154 : f32 to vector<8x128xf32>
    %469 = arith.mulf %468, %467 : vector<8x128xf32>
    %470 = math.tanh %469 : vector<8x128xf32>
    %cst_155 = arith.constant 1.000000e+00 : f32
    %471 = vector.broadcast %cst_155 : f32 to vector<8x128xf32>
    %472 = arith.addf %470, %471 : vector<8x128xf32>
    %cst_156 = arith.constant 5.000000e-01 : f32
    %473 = vector.broadcast %cst_156 : f32 to vector<8x128xf32>
    %474 = arith.mulf %473, %472 : vector<8x128xf32>
    %475 = arith.mulf %464, %405 : vector<8x128xf32>
    %476 = arith.mulf %456, %466 : vector<8x128xf32>
    %477 = arith.addf %475, %476 : vector<8x128xf32>
    %478 = math.tanh %477 : vector<8x128xf32>
    %479 = arith.mulf %474, %478 : vector<8x128xf32>
    %480 = tpu.concatenate %479, %442 in 1 : vector<8x128xf32>, vector<8x128xf32> -> vector<8x256xf32>
    %cst_157 = arith.constant dense<0.000000e+00> : vector<8x512xf32>
    %481 = tpu.matmul %480, %8, %cst_157 {dimension_numbers = #tpu.dot_dimension_numbers<[1], [0], [0], [1], [0, 0, 1, 1], [], []>} : vector<8x256xf32>, vector<256x512xf32>, vector<8x512xf32> -> vector<8x512xf32>
    %482 = vector.broadcast %9 : vector<1x512xf32> to vector<8x512xf32>
    %483 = arith.addf %481, %482 : vector<8x512xf32>
    %484 = vector.extract_strided_slice %483 {offsets = [0, 0], sizes = [8, 128], strides = [1, 1]} : vector<8x512xf32> to vector<8x128xf32>
    %cst_158 = arith.constant 5.000000e-01 : f32
    %485 = vector.broadcast %cst_158 : f32 to vector<8x128xf32>
    %486 = arith.mulf %485, %484 : vector<8x128xf32>
    %487 = math.tanh %486 : vector<8x128xf32>
    %cst_159 = arith.constant 1.000000e+00 : f32
    %488 = vector.broadcast %cst_159 : f32 to vector<8x128xf32>
    %489 = arith.addf %487, %488 : vector<8x128xf32>
    %cst_160 = arith.constant 5.000000e-01 : f32
    %490 = vector.broadcast %cst_160 : f32 to vector<8x128xf32>
    %491 = arith.mulf %490, %489 : vector<8x128xf32>
    %492 = vector.extract_strided_slice %483 {offsets = [0, 128], sizes = [8, 128], strides = [1, 1]} : vector<8x512xf32> to vector<8x128xf32>
    %cst_161 = arith.constant 5.000000e-01 : f32
    %493 = vector.broadcast %cst_161 : f32 to vector<8x128xf32>
    %494 = arith.mulf %493, %492 : vector<8x128xf32>
    %495 = math.tanh %494 : vector<8x128xf32>
    %cst_162 = arith.constant 1.000000e+00 : f32
    %496 = vector.broadcast %cst_162 : f32 to vector<8x128xf32>
    %497 = arith.addf %495, %496 : vector<8x128xf32>
    %cst_163 = arith.constant 5.000000e-01 : f32
    %498 = vector.broadcast %cst_163 : f32 to vector<8x128xf32>
    %499 = arith.mulf %498, %497 : vector<8x128xf32>
    %500 = vector.extract_strided_slice %483 {offsets = [0, 256], sizes = [8, 128], strides = [1, 1]} : vector<8x512xf32> to vector<8x128xf32>
    %501 = math.tanh %500 : vector<8x128xf32>
    %502 = vector.extract_strided_slice %483 {offsets = [0, 384], sizes = [8, 128], strides = [1, 1]} : vector<8x512xf32> to vector<8x128xf32>
    %cst_164 = arith.constant 5.000000e-01 : f32
    %503 = vector.broadcast %cst_164 : f32 to vector<8x128xf32>
    %504 = arith.mulf %503, %502 : vector<8x128xf32>
    %505 = math.tanh %504 : vector<8x128xf32>
    %cst_165 = arith.constant 1.000000e+00 : f32
    %506 = vector.broadcast %cst_165 : f32 to vector<8x128xf32>
    %507 = arith.addf %505, %506 : vector<8x128xf32>
    %cst_166 = arith.constant 5.000000e-01 : f32
    %508 = vector.broadcast %cst_166 : f32 to vector<8x128xf32>
    %509 = arith.mulf %508, %507 : vector<8x128xf32>
    %510 = arith.mulf %499, %440 : vector<8x128xf32>
    %511 = arith.mulf %491, %501 : vector<8x128xf32>
    %512 = arith.addf %510, %511 : vector<8x128xf32>
    %513 = math.tanh %512 : vector<8x128xf32>
    %514 = arith.mulf %509, %513 : vector<8x128xf32>
    %c7_i32 = arith.constant 7 : i32
    %c8_i32_167 = arith.constant 8 : i32
    %515 = arith.muli %c7_i32, %c8_i32_167 : i32
    %516 = tpu.assume_multiple %515, 8 : i32
    %517 = arith.index_cast %516 : i32 to index
    %c0_168 = arith.constant 0 : index
    %518 = vector.load %arg9[%517, %c0_168] : memref<64x512xf32, #tpu.memory_space<vmem>>, vector<8x512xf32>
    %cst_169 = arith.constant dense<0.000000e+00> : vector<8x512xf32>
    %519 = tpu.matmul %479, %7, %cst_169 {dimension_numbers = #tpu.dot_dimension_numbers<[1], [0], [0], [1], [0, 0, 1, 1], [], []>} : vector<8x128xf32>, vector<128x512xf32>, vector<8x512xf32> -> vector<8x512xf32>
    %520 = arith.addf %518, %519 : vector<8x512xf32>
    %521 = vector.extract_strided_slice %520 {offsets = [0, 0], sizes = [8, 128], strides = [1, 1]} : vector<8x512xf32> to vector<8x128xf32>
    %cst_170 = arith.constant 5.000000e-01 : f32
    %522 = vector.broadcast %cst_170 : f32 to vector<8x128xf32>
    %523 = arith.mulf %522, %521 : vector<8x128xf32>
    %524 = math.tanh %523 : vector<8x128xf32>
    %cst_171 = arith.constant 1.000000e+00 : f32
    %525 = vector.broadcast %cst_171 : f32 to vector<8x128xf32>
    %526 = arith.addf %524, %525 : vector<8x128xf32>
    %cst_172 = arith.constant 5.000000e-01 : f32
    %527 = vector.broadcast %cst_172 : f32 to vector<8x128xf32>
    %528 = arith.mulf %527, %526 : vector<8x128xf32>
    %529 = vector.extract_strided_slice %520 {offsets = [0, 128], sizes = [8, 128], strides = [1, 1]} : vector<8x512xf32> to vector<8x128xf32>
    %cst_173 = arith.constant 5.000000e-01 : f32
    %530 = vector.broadcast %cst_173 : f32 to vector<8x128xf32>
    %531 = arith.mulf %530, %529 : vector<8x128xf32>
    %532 = math.tanh %531 : vector<8x128xf32>
    %cst_174 = arith.constant 1.000000e+00 : f32
    %533 = vector.broadcast %cst_174 : f32 to vector<8x128xf32>
    %534 = arith.addf %532, %533 : vector<8x128xf32>
    %cst_175 = arith.constant 5.000000e-01 : f32
    %535 = vector.broadcast %cst_175 : f32 to vector<8x128xf32>
    %536 = arith.mulf %535, %534 : vector<8x128xf32>
    %537 = vector.extract_strided_slice %520 {offsets = [0, 256], sizes = [8, 128], strides = [1, 1]} : vector<8x512xf32> to vector<8x128xf32>
    %538 = math.tanh %537 : vector<8x128xf32>
    %539 = vector.extract_strided_slice %520 {offsets = [0, 384], sizes = [8, 128], strides = [1, 1]} : vector<8x512xf32> to vector<8x128xf32>
    %cst_176 = arith.constant 5.000000e-01 : f32
    %540 = vector.broadcast %cst_176 : f32 to vector<8x128xf32>
    %541 = arith.mulf %540, %539 : vector<8x128xf32>
    %542 = math.tanh %541 : vector<8x128xf32>
    %cst_177 = arith.constant 1.000000e+00 : f32
    %543 = vector.broadcast %cst_177 : f32 to vector<8x128xf32>
    %544 = arith.addf %542, %543 : vector<8x128xf32>
    %cst_178 = arith.constant 5.000000e-01 : f32
    %545 = vector.broadcast %cst_178 : f32 to vector<8x128xf32>
    %546 = arith.mulf %545, %544 : vector<8x128xf32>
    %547 = arith.mulf %536, %477 : vector<8x128xf32>
    %548 = arith.mulf %528, %538 : vector<8x128xf32>
    %549 = arith.addf %547, %548 : vector<8x128xf32>
    %550 = math.tanh %549 : vector<8x128xf32>
    %551 = arith.mulf %546, %550 : vector<8x128xf32>
    %552 = tpu.concatenate %551, %514 in 1 : vector<8x128xf32>, vector<8x128xf32> -> vector<8x256xf32>
    %cst_179 = arith.constant dense<0.000000e+00> : vector<8x512xf32>
    %553 = tpu.matmul %552, %8, %cst_179 {dimension_numbers = #tpu.dot_dimension_numbers<[1], [0], [0], [1], [0, 0, 1, 1], [], []>} : vector<8x256xf32>, vector<256x512xf32>, vector<8x512xf32> -> vector<8x512xf32>
    %554 = vector.broadcast %9 : vector<1x512xf32> to vector<8x512xf32>
    %555 = arith.addf %553, %554 : vector<8x512xf32>
    %556 = vector.extract_strided_slice %555 {offsets = [0, 0], sizes = [8, 128], strides = [1, 1]} : vector<8x512xf32> to vector<8x128xf32>
    %cst_180 = arith.constant 5.000000e-01 : f32
    %557 = vector.broadcast %cst_180 : f32 to vector<8x128xf32>
    %558 = arith.mulf %557, %556 : vector<8x128xf32>
    %559 = math.tanh %558 : vector<8x128xf32>
    %cst_181 = arith.constant 1.000000e+00 : f32
    %560 = vector.broadcast %cst_181 : f32 to vector<8x128xf32>
    %561 = arith.addf %559, %560 : vector<8x128xf32>
    %cst_182 = arith.constant 5.000000e-01 : f32
    %562 = vector.broadcast %cst_182 : f32 to vector<8x128xf32>
    %563 = arith.mulf %562, %561 : vector<8x128xf32>
    %564 = vector.extract_strided_slice %555 {offsets = [0, 128], sizes = [8, 128], strides = [1, 1]} : vector<8x512xf32> to vector<8x128xf32>
    %cst_183 = arith.constant 5.000000e-01 : f32
    %565 = vector.broadcast %cst_183 : f32 to vector<8x128xf32>
    %566 = arith.mulf %565, %564 : vector<8x128xf32>
    %567 = math.tanh %566 : vector<8x128xf32>
    %cst_184 = arith.constant 1.000000e+00 : f32
    %568 = vector.broadcast %cst_184 : f32 to vector<8x128xf32>
    %569 = arith.addf %567, %568 : vector<8x128xf32>
    %cst_185 = arith.constant 5.000000e-01 : f32
    %570 = vector.broadcast %cst_185 : f32 to vector<8x128xf32>
    %571 = arith.mulf %570, %569 : vector<8x128xf32>
    %572 = vector.extract_strided_slice %555 {offsets = [0, 256], sizes = [8, 128], strides = [1, 1]} : vector<8x512xf32> to vector<8x128xf32>
    %573 = math.tanh %572 : vector<8x128xf32>
    %574 = vector.extract_strided_slice %555 {offsets = [0, 384], sizes = [8, 128], strides = [1, 1]} : vector<8x512xf32> to vector<8x128xf32>
    %cst_186 = arith.constant 5.000000e-01 : f32
    %575 = vector.broadcast %cst_186 : f32 to vector<8x128xf32>
    %576 = arith.mulf %575, %574 : vector<8x128xf32>
    %577 = math.tanh %576 : vector<8x128xf32>
    %cst_187 = arith.constant 1.000000e+00 : f32
    %578 = vector.broadcast %cst_187 : f32 to vector<8x128xf32>
    %579 = arith.addf %577, %578 : vector<8x128xf32>
    %cst_188 = arith.constant 5.000000e-01 : f32
    %580 = vector.broadcast %cst_188 : f32 to vector<8x128xf32>
    %581 = arith.mulf %580, %579 : vector<8x128xf32>
    %582 = arith.mulf %571, %512 : vector<8x128xf32>
    %583 = arith.mulf %563, %573 : vector<8x128xf32>
    %584 = arith.addf %582, %583 : vector<8x128xf32>
    %585 = math.tanh %584 : vector<8x128xf32>
    %586 = arith.mulf %581, %585 : vector<8x128xf32>
    %c8_i32_189 = arith.constant 8 : i32
    %c0_190 = arith.constant 0 : index
    %c0_191 = arith.constant 0 : index
    %587 = vector.load %arg6[%c0_190, %c0_191] : memref<128x1xf32, #tpu.memory_space<vmem>>, vector<128x1xf32>
    %cst_192 = arith.constant dense<0.000000e+00> : vector<8x1xf32>
    %588 = tpu.matmul %586, %587, %cst_192 {dimension_numbers = #tpu.dot_dimension_numbers<[1], [0], [0], [1], [0, 0, 1, 1], [], []>} : vector<8x128xf32>, vector<128x1xf32>, vector<8x1xf32> -> vector<8x1xf32>
    %c0_193 = arith.constant 0 : index
    %c0_194 = arith.constant 0 : index
    %589 = vector.load %arg7[%c0_193, %c0_194] : memref<1x1xf32, #tpu.memory_space<vmem>>, vector<1x1xf32>
    %590 = vector.broadcast %589 : vector<1x1xf32> to vector<8x1xf32>
    %591 = arith.addf %588, %590 : vector<8x1xf32>
    %cst_195 = arith.constant 5.000000e-01 : f32
    %592 = vector.broadcast %cst_195 : f32 to vector<8x1xf32>
    %593 = arith.mulf %592, %591 : vector<8x1xf32>
    %594 = math.tanh %593 : vector<8x1xf32>
    %cst_196 = arith.constant 1.000000e+00 : f32
    %595 = vector.broadcast %cst_196 : f32 to vector<8x1xf32>
    %596 = arith.addf %594, %595 : vector<8x1xf32>
    %cst_197 = arith.constant 5.000000e-01 : f32
    %597 = vector.broadcast %cst_197 : f32 to vector<8x1xf32>
    %598 = arith.mulf %597, %596 : vector<8x1xf32>
    %c0_198 = arith.constant 0 : index
    %c0_199 = arith.constant 0 : index
    %599 = vector.load %arg8[%c0_198, %c0_199] : memref<8x1xf32, #tpu.memory_space<vmem>>, vector<8x1xf32>
    tpu.vector_store %arg8[%c0_198, %c0_199], %598 {strides = array<i32>} : memref<8x1xf32, #tpu.memory_space<vmem>>, vector<8x1xf32>,
    return
  }
}

</mosaic_0001>

<bundles_post_ra>
// kernel: tpu_custom_call.1
= control target key start
LH: loop header
LB: loop body
LE: loop exit
PB: predicated region body
PF: predicated region fallthrough
CT: control target
= control target key end

     0   :  { %s6627_s0 = inlined_call_operand.vmem [shape: f32[64,16], index: 0, kind: input, shape index: {}]   ;;  %s6628_s1 = inlined_call_operand.vmem [shape: f32[16,512], index: 1, kind: input, shape index: {}]   ;;  %s6629_s2 = inlined_call_operand.vmem [shape: f32[1,512], index: 2, kind: input, shape index: {}]   ;;  %s6630_s3 = inlined_call_operand.hbm [shape: f32[128,512], index: 3, kind: input, shape index: {}]   ;;  %s6631_s4 = inlined_call_operand.hbm [shape: f32[256,512], index: 4, kind: input, shape index: {}]   ;;  %s6632_s5 = inlined_call_operand.vmem [shape: f32[1,512], index: 5, kind: input, shape index: {}]   ;;  %s6633_s6 = inlined_call_operand.vmem [shape: f32[128,1], index: 6, kind: input, shape index: {}]   ;;  %s6634_s7 = inlined_call_operand.<no memory space> [shape: f32[1,1], index: 7, kind: input, shape index: {}]   ;;  %s6635_s8 = inlined_call_operand.vmem [shape: f32[8,1], index: 8, kind: output, shape index: {}]  }
   0x1   :  { %v13_v0 = vstv %s6634_s7 }
   0x2   :  { %14 = vst [vmem:[#allocation3] sm:$0x1] %v13_v0 }
   0x3   :  { %15 = vsyncpa [#allocation5], 0 }
   0x4   :  { %16 = vsyncpa [#allocation7], 0  ;;  %s5272_s29 = smov [#allocation4]   ;;  %s5224_s11 = scalar_lea.hbm %s6630_s3, 8192 }
   0x5   :  { %s28_s30 = sshll.u32 %s5272_s29, 4  ;;  %p5225_p0 = scmp.ne.s32.totalorder %s6630_s3, %s5224_s11  ;;  %s29_s30 = int_to_ptr.vmem [resolvable:$true] %s28_s30 }
   0x6   :  { %p5228_p1 = scmp.lt.u32.totalorder %s5224_s11, %s6630_s3 }
   0x8   :  { %p5230_p2 = pnand %p5228_p1, %p5225_p0 }
   0xa   :  { %5233 = shalt.err (!%p5230_p2)
}
   0xb   :  { %s5234_s7 = scalar_lea.vmem %s29_s30, 8192  ;;  %p5239_p4 = scmp.lt.s32.totalorder %s29_s30, %s29_s30 }
   0xc   :  { %p5235_p3 = scmp.ne.s32.totalorder %s29_s30, %s5234_s7  ;;  %p5240_p5 = scmp.lt.s32.totalorder %s5234_s7, %s5234_s7 }
   0xe   :  { %p5241_p6 = por %p5240_p5, %p5239_p4 }
  0x10   :  { %p5242_p7 = pnand %p5241_p6, %p5235_p3 }
  0x12   :  { %5245 = shalt.err (!%p5242_p7)
}
  0x13   :  { %s5273_s16 = smov 512   ;;  %s5274_s17 = smov 32  }
  0x14   :  { %34 = dma.hbm_to_vmem [thread:$0]  %s6630_s3, 8192, %s29_s30, [#allocation5], %s5273_s16, %s5273_s16, %s5274_s17  }
  0x15   :  { %s5275_s20 = smov [#allocation6]   ;;  %s5246_s24 = scalar_lea.hbm %s6631_s4, 16384 }
  0x16   :  { %s40_s21 = sshll.u32 %s5275_s20, 4  ;;  %p5247_p8 = scmp.ne.s32.totalorder %s6631_s4, %s5246_s24  ;;  %s41_s21 = int_to_ptr.vmem [resolvable:$true] %s40_s21 }
  0x17   :  { %p5250_p9 = scmp.lt.u32.totalorder %s5246_s24, %s6631_s4 }
  0x19   :  { %p5252_p10 = pnand %p5250_p9, %p5247_p8 }
  0x1b   :  { %5255 = shalt.err (!%p5252_p10)
}
  0x1c   :  { %s5256_s29 = scalar_lea.vmem %s41_s21, 16384  ;;  %p5261_p12 = scmp.lt.s32.totalorder %s41_s21, %s41_s21 }
  0x1d   :  { %p5257_p11 = scmp.ne.s32.totalorder %s41_s21, %s5256_s29  ;;  %p5262_p13 = scmp.lt.s32.totalorder %s5256_s29, %s5256_s29 }
  0x1f   :  { %p5263_p0 = por %p5262_p13, %p5261_p12 }
  0x21   :  { %p5264_p1 = pnand %p5263_p0, %p5257_p11 }
  0x23   :  { %5267 = shalt.err (!%p5264_p1)
}
  0x24   :  { %46 = dma.hbm_to_vmem [thread:$0]  %s6631_s4, 16384, %s41_s21, [#allocation7], %s5273_s16, %s5273_s16, %s5274_s17  }
  0x25   :  { %5268 = dma.done.wait [#allocation5], 8192  }
  0x26   :  { %5269 = vsyncadd [#allocation5], 4294959104 }
  0x27   :  { %5270 = dma.done.wait [#allocation7], 16384  }
  0x28   :  { %5271 = vsyncadd [#allocation7], 4294950912  ;;  %v6636_v1 = vmov 0.0   ;;  %v68_v2 = vld [vmem:[%s6628_s1 + $0x8] sm:$0xff]  ;;  %v70_v4 = vld [vmem:[%s6628_s1 + $0x18] sm:$0xff]  ;;  %vm97_vm0 = vcmask 130048  }
  0x29   :  { %186 = vmatprep.mubr.f32.mxu0 %v6636_v1  ;;  %299 = vmatprep.mubr.f32.mxu1 %v6636_v1  ;;  %v72_v3 = vld [vmem:[%s6628_s1 + $0x28] sm:$0xff]  ;;  %v74_v6 = vld [vmem:[%s6628_s1 + $0x38] sm:$0xff]  ;;  %v67_v7 = vld [vmem:[%s6628_s1] sm:$0xff]  ;;  %vm5278_vm1 = vmmov 0   ;;  %vm3339_vm2 = vcmask 7168  }
  0x2a   :  { %v3423_v5 = vpack.c.bf16 %v72_v3, %v68_v2  ;;  %v71_v8 = vld [vmem:[%s6628_s1 + $0x20] sm:$0xff]  ;;  %v3427_v9 = vpack.c.bf16 %v74_v6, %v70_v4  ;;  %v69_v11 = vld [vmem:[%s6628_s1 + $0x10] sm:$0xff]  ;;  %v60_v34 = vld [vmem:[%s6627_s0 + $0x8] sm:$0xff] }
  0x2b   :  { %v3425_v10 = vpack.c.bf16 %v71_v8, %v67_v7  ;;  %v73_v12 = vld [vmem:[%s6628_s1 + $0x30] sm:$0xff]  ;;  %v59_v13 = vld [vmem:[%s6627_s0] sm:$0xff]  ;;  %v62_v2 = vld [vmem:[%s6627_s0 + $0x18] sm:$0xff] }
  0x2c   :  { %3424 = vmatprep.subr.bf16.mxu0 %v3423_v5  ;;  %v3429_v14 = vpack.c.bf16 %v73_v12, %v69_v11  ;;  %v381_v15 = vld [vmem:[#allocation4 + $0x8] sm:$0xff]  ;;  %v383_v17 = vld [vmem:[#allocation4 + $0x18] sm:$0xff]  ;;  %3428 = vmatprep.subr.bf16.mxu1 %v3427_v9  ;;  %v380_v20 = vld [vmem:[#allocation4] sm:$0xff] }
  0x2d   :  { %v385_v16 = vld [vmem:[#allocation4 + $0x28] sm:$0xff]  ;;  %3426 = vmatpush1.bf16.msra.mxu0 %v3425_v10  ;;  %v387_v19 = vld [vmem:[#allocation4 + $0x38] sm:$0xff]  ;;  %v384_v21 = vld [vmem:[#allocation4 + $0x20] sm:$0xff] }
  0x2e   :  { %v5380_v18 = vpack.c.bf16 %v385_v16, %v381_v15  ;;  %3430 = vmatpush1.bf16.msra.mxu1 %v3429_v14  ;;  %v5382_v22 = vpack.c.bf16 %v387_v19, %v383_v17  ;;  %v5384_v23 = vpack.c.bf16 %v384_v21, %v380_v20  ;;  %v382_v24 = vld [vmem:[#allocation4 + $0x10] sm:$0xff]  ;;  %v389_v27 = vld [vmem:[#allocation4 + $0x48] sm:$0xff]  ;;  %v391_v29 = vld [vmem:[#allocation4 + $0x58] sm:$0xff] }
  0x2f   :  { %v386_v25 = vld [vmem:[#allocation4 + $0x30] sm:$0xff]  ;;  %v393_v28 = vld [vmem:[#allocation4 + $0x68] sm:$0xff]  ;;  %v395_v31 = vld [vmem:[#allocation4 + $0x78] sm:$0xff] }
  0x30   :  { %6772 = vst [vmem:[#allocation10_spill] sm:$0xff] %v5380_v18  ;;  %6773 = vst [vmem:[#allocation11_spill] sm:$0xff] %v5382_v22  ;;  %3432 = vmatprep.subr.bf16.mxu0 %v5380_v18  ;;  %v5387_v26 = vpack.c.bf16 %v386_v25, %v382_v24  ;;  %3354 = vmatmul.mubr.msk.f32.vlgmr.msra.gmra.mrb[0].mxu0 %vm97_vm0, %v59_v13  ;;  %v5391_v30 = vpack.c.bf16 %v393_v28, %v389_v27  ;;  %v388_v32 = vld [vmem:[#allocation4 + $0x40] sm:$0xff]  ;;  %v390_v37 = vld [vmem:[#allocation4 + $0x50] sm:$0xff] }
  0x31   :  { %3464 = vmatprep.subr.bf16.mxu1 %v5382_v22  ;;  %v392_v33 = vld [vmem:[#allocation4 + $0x60] sm:$0xff]  ;;  %3362 = vmatmul.mubr.msk.f32.vlgmr.msra.gmra.mrb[0].mxu1 %vm97_vm0, %v59_v13  ;;  %v5398_v35 = vpack.c.bf16 %v395_v31, %v391_v29  ;;  %v394_v38 = vld [vmem:[#allocation4 + $0x70] sm:$0xff]  ;;  %v397_v40 = vld [vmem:[#allocation4 + $0x88] sm:$0xff] }
  0x32   :  { %3434 = vmatpush1.bf16.msra.mxu0 %v5384_v23  ;;  %v5400_v36 = vpack.c.bf16 %v392_v33, %v388_v32  ;;  %3466 = vmatpush1.bf16.msra.mxu1 %v5387_v26  ;;  %v5404_v39 = vpack.c.bf16 %v394_v38, %v390_v37  ;;  %v401_v41 = vld [vmem:[#allocation4 + $0xa8] sm:$0xff]  ;;  %v399_v42 = vld [vmem:[#allocation4 + $0x98] sm:$0xff]  ;;  %v396_v45 = vld [vmem:[#allocation4 + $0x80] sm:$0xff] }
  0x33   :  { %192 = vmatprep.mubr.f32.mxu0 %v6636_v1  ;;  %305 = vmatprep.mubr.f32.mxu1 %v6636_v1  ;;  %v5408_v43 = vpack.c.bf16 %v401_v41, %v397_v40  ;;  %v403_v44 = vld [vmem:[#allocation4 + $0xb8] sm:$0xff]  ;;  %v400_v46 = vld [vmem:[#allocation4 + $0xa0] sm:$0xff]  ;;  %v61_v47 = vld [vmem:[%s6627_s0 + $0x10] sm:$0xff] }
  0x34   :  { %3436 = vmatprep.subr.bf16.mxu0 %v5391_v30  ;;  %3355 = vmatmul.mubr.msk.f32.gmra.mrb[2].mxu0 %vm97_vm0, %v60_v34  ;;  %v5415_v48 = vpack.c.bf16 %v403_v44, %v399_v42  ;;  %v398_v49 = vld [vmem:[#allocation4 + $0x90] sm:$0xff]  ;;  %v5419_v51 = vpack.c.bf16 %v400_v46, %v396_v45  ;;  %v405_v52 = vld [vmem:[#allocation4 + $0xc8] sm:$0xff]  ;;  %v407_v54 = vld [vmem:[#allocation4 + $0xd8] sm:$0xff] }
  0x35   :  { %3468 = vmatprep.subr.bf16.mxu1 %v5398_v35  ;;  %v402_v50 = vld [vmem:[#allocation4 + $0xb0] sm:$0xff]  ;;  %3363 = vmatmul.mubr.msk.f32.gmra.mrb[2].mxu1 %vm97_vm0, %v60_v34  ;;  %v409_v53 = vld [vmem:[#allocation4 + $0xe8] sm:$0xff]  ;;  %v411_v56 = vld [vmem:[#allocation4 + $0xf8] sm:$0xff] }
  0x36   :  { %3438 = vmatpush1.bf16.msra.mxu0 %v5400_v36  ;;  %3470 = vmatpush1.bf16.msra.mxu1 %v5404_v39  ;;  %v5423_v55 = vpack.c.bf16 %v402_v50, %v398_v49  ;;  %v404_v57 = vld [vmem:[#allocation4 + $0xc0] sm:$0xff]  ;;  %v5427_v59 = vpack.c.bf16 %v409_v53, %v405_v52  ;;  %v406_v60 = vld [vmem:[#allocation4 + $0xd0] sm:$0xff]  ;;  %v5431_v62 = vpack.c.bf16 %v411_v56, %v407_v54  ;;  %v413_v63 = vld [vmem:[#allocation4 + $0x108] sm:$0xff] }
  0x37   :  { %198 = vmatprep.mubr.f32.mxu0 %v6636_v1  ;;  %v408_v58 = vld [vmem:[#allocation4 + $0xe0] sm:$0xff]  ;;  %311 = vmatprep.mubr.f32.mxu1 %v6636_v1  ;;  %v410_v61 = vld [vmem:[#allocation4 + $0xf0] sm:$0xff]  ;;  %v417_v0 = vld [vmem:[#allocation4 + $0x128] sm:$0xff] }
  0x38   :  { %3440 = vmatprep.subr.bf16.mxu0 %v5408_v43  ;;  %3356 = vmatmul.mubr.msk.f32.gmra.mrb[4].mxu0 %vm97_vm0, %v61_v47  ;;  %v5438_v3 = vpack.c.bf16 %v408_v58, %v404_v57  ;;  %v415_v4 = vld [vmem:[#allocation4 + $0x118] sm:$0xff]  ;;  %v5442_v6 = vpack.c.bf16 %v410_v61, %v406_v60  ;;  %v412_v7 = vld [vmem:[#allocation4 + $0x100] sm:$0xff]  ;;  %v5446_v9 = vpack.c.bf16 %v417_v0, %v413_v63  ;;  %v414_v10 = vld [vmem:[#allocation4 + $0x110] sm:$0xff] }
  0x39   :  { %3472 = vmatprep.subr.bf16.mxu1 %v5415_v48  ;;  %3364 = vmatmul.mubr.msk.f32.gmra.mrb[4].mxu1 %vm97_vm0, %v61_v47  ;;  %v419_v5 = vld [vmem:[#allocation4 + $0x138] sm:$0xff]  ;;  %v416_v8 = vld [vmem:[#allocation4 + $0x120] sm:$0xff]  ;;  %v418_v11 = vld [vmem:[#allocation4 + $0x130] sm:$0xff] }
  0x3a   :  { %3442 = vmatpush1.bf16.msra.mxu0 %v5419_v51  ;;  %3474 = vmatpush1.bf16.msra.mxu1 %v5423_v55  ;;  %v5450_v12 = vpack.c.bf16 %v419_v5, %v415_v4  ;;  %v421_v13 = vld [vmem:[#allocation4 + $0x148] sm:$0xff]  ;;  %v63_v15 = vld [vmem:[%s6627_s0 + $0x20] sm:$0xff]  ;;  %v5457_v16 = vpack.c.bf16 %v416_v8, %v412_v7  ;;  %v5461_v20 = vpack.c.bf16 %v418_v11, %v414_v10  ;;  %v422_v27 = vld [vmem:[#allocation4 + $0x150] sm:$0xff] }
  0x3b   :  { %204 = vmatprep.mubr.f32.mxu0 %v6636_v1  ;;  %317 = vmatprep.mubr.f32.mxu1 %v6636_v1  ;;  %v425_v14 = vld [vmem:[#allocation4 + $0x168] sm:$0xff]  ;;  %v423_v17 = vld [vmem:[#allocation4 + $0x158] sm:$0xff]  ;;  %v420_v21 = vld [vmem:[#allocation4 + $0x140] sm:$0xff] }
  0x3c   :  { %3444 = vmatprep.subr.bf16.mxu0 %v5427_v59  ;;  %3357 = vmatmul.mubr.msk.f32.gmra.mrb[6].mxu0 %vm97_vm0, %v62_v2  ;;  %v427_v19 = vld [vmem:[#allocation4 + $0x178] sm:$0xff]  ;;  %v424_v24 = vld [vmem:[#allocation4 + $0x160] sm:$0xff]  ;;  %v5465_v25 = vpack.c.bf16 %v425_v14, %v421_v13  ;;  %v426_v28 = vld [vmem:[#allocation4 + $0x170] sm:$0xff] }
  0x3d   :  { %3476 = vmatprep.subr.bf16.mxu1 %v5431_v62  ;;  %3365 = vmatmul.mubr.msk.f32.gmra.mrb[6].mxu1 %vm97_vm0, %v62_v2  ;;  %v5469_v29 = vpack.c.bf16 %v427_v19, %v423_v17  ;;  %v429_v31 = vld [vmem:[#allocation4 + $0x188] sm:$0xff]  ;;  %v5476_v34 = vpack.c.bf16 %v424_v24, %v420_v21  ;;  %v431_v37 = vld [vmem:[#allocation4 + $0x198] sm:$0xff]  ;;  %v5480_v40 = vpack.c.bf16 %v426_v28, %v422_v27  ;;  %v428_v41 = vld [vmem:[#allocation4 + $0x180] sm:$0xff] }
  0x3e   :  { %3446 = vmatpush1.bf16.msra.mxu0 %v5438_v3  ;;  %3478 = vmatpush1.bf16.msra.mxu1 %v5442_v6  ;;  %v433_v32 = vld [vmem:[#allocation4 + $0x1a8] sm:$0xff]  ;;  %v435_v38 = vld [vmem:[#allocation4 + $0x1b8] sm:$0xff]  ;;  %v432_v42 = vld [vmem:[#allocation4 + $0x1a0] sm:$0xff] }
  0x3f   :  { %210 = vmatprep.mubr.f32.mxu0 %v6636_v1  ;;  %323 = vmatprep.mubr.f32.mxu1 %v6636_v1  ;;  %v64_v33 = vld [vmem:[%s6627_s0 + $0x28] sm:$0xff]  ;;  %v5484_v44 = vpack.c.bf16 %v433_v32, %v429_v31  ;;  %v430_v45 = vld [vmem:[#allocation4 + $0x190] sm:$0xff]  ;;  %v5488_v47 = vpack.c.bf16 %v435_v38, %v431_v37  ;;  %v5495_v53 = vpack.c.bf16 %v432_v42, %v428_v41  ;;  %v439_v54 = vld [vmem:[#allocation4 + $0x1d8] sm:$0xff] }
  0x40   :  { %3448 = vmatprep.subr.bf16.mxu0 %v5446_v9  ;;  %3358 = vmatmul.mubr.msk.f32.gmra.mrb[8].mxu0 %vm97_vm0, %v63_v15  ;;  %v434_v46 = vld [vmem:[#allocation4 + $0x1b0] sm:$0xff]  ;;  %v437_v49 = vld [vmem:[#allocation4 + $0x1c8] sm:$0xff]  ;;  %v443_v56 = vld [vmem:[#allocation4 + $0x1f8] sm:$0xff] }
  0x41   :  { %3480 = vmatprep.subr.bf16.mxu1 %v5450_v12  ;;  %3366 = vmatmul.mubr.msk.f32.gmra.mrb[8].mxu1 %vm97_vm0, %v63_v15  ;;  %v441_v50 = vld [vmem:[#allocation4 + $0x1e8] sm:$0xff]  ;;  %v5499_v57 = vpack.c.bf16 %v434_v46, %v430_v45  ;;  %v436_v58 = vld [vmem:[#allocation4 + $0x1c0] sm:$0xff]  ;;  %v438_v63 = vld [vmem:[#allocation4 + $0x1d0] sm:$0xff]  ;;  %v5507_v2 = vpack.c.bf16 %v443_v56, %v439_v54 }
  0x42   :  { %3450 = vmatpush1.bf16.msra.mxu0 %v5457_v16  ;;  %3482 = vmatpush1.bf16.msra.mxu1 %v5461_v20  ;;  %v65_v52 = vld [vmem:[%s6627_s0 + $0x30] sm:$0xff]  ;;  %v440_v60 = vld [vmem:[#allocation4 + $0x1e0] sm:$0xff]  ;;  %v5503_v61 = vpack.c.bf16 %v441_v50, %v437_v49  ;;  %v66_v7 = vld [vmem:[%s6627_s0 + $0x38] sm:$0xff] }
  0x43   :  { %216 = vmatprep.mubr.f32.mxu0 %v6636_v1  ;;  %329 = vmatprep.mubr.f32.mxu1 %v6636_v1  ;;  %v442_v0 = vld [vmem:[#allocation4 + $0x1f0] sm:$0xff]  ;;  %v445_v4 = vld [vmem:[#allocation6 + $0x8] sm:$0xff]  ;;  %v5514_v8 = vpack.c.bf16 %v440_v60, %v436_v58  ;;  %v447_v10 = vld [vmem:[#allocation6 + $0x18] sm:$0xff] }
  0x44   :  { %3452 = vmatprep.subr.bf16.mxu0 %v5465_v25  ;;  %3359 = vmatmul.mubr.msk.f32.gmra.mrb[10].mxu0 %vm97_vm0, %v64_v33  ;;  %v449_v5 = vld [vmem:[#allocation6 + $0x28] sm:$0xff]  ;;  %v451_v11 = vld [vmem:[#allocation6 + $0x38] sm:$0xff]  ;;  %v5518_v13 = vpack.c.bf16 %v442_v0, %v438_v63  ;;  %v444_v14 = vld [vmem:[#allocation6] sm:$0xff] }
  0x45   :  { %3484 = vmatprep.subr.bf16.mxu1 %v5469_v29  ;;  %3367 = vmatmul.mubr.msk.f32.gmra.mrb[10].mxu1 %vm97_vm0, %v64_v33  ;;  %v448_v15 = vld [vmem:[#allocation6 + $0x20] sm:$0xff]  ;;  %v446_v17 = vld [vmem:[#allocation6 + $0x10] sm:$0xff]  ;;  %v5522_v19 = vpack.c.bf16 %v449_v5, %v445_v4  ;;  %v453_v24 = vld [vmem:[#allocation6 + $0x48] sm:$0xff]  ;;  %v5526_v28 = vpack.c.bf16 %v451_v11, %v447_v10 }
  0x46   :  { %3454 = vmatpush1.bf16.msra.mxu0 %v5476_v34  ;;  %3486 = vmatpush1.bf16.msra.mxu1 %v5480_v40  ;;  %v450_v21 = vld [vmem:[#allocation6 + $0x30] sm:$0xff]  ;;  %v457_v27 = vld [vmem:[#allocation6 + $0x68] sm:$0xff]  ;;  %v455_v31 = vld [vmem:[#allocation6 + $0x58] sm:$0xff]  ;;  %v5530_v33 = vpack.c.bf16 %v448_v15, %v444_v14 }
  0x47   :  { %222 = vmatprep.mubr.f32.mxu0 %v6636_v1  ;;  %335 = vmatprep.mubr.f32.mxu1 %v6636_v1  ;;  %v459_v32 = vld [vmem:[#allocation6 + $0x78] sm:$0xff]  ;;  %v5534_v37 = vpack.c.bf16 %v450_v21, %v446_v17  ;;  %v5536_v38 = vpack.c.bf16 %v457_v27, %v453_v24  ;;  %v452_v41 = vld [vmem:[#allocation6 + $0x40] sm:$0xff]  ;;  %v454_v45 = vld [vmem:[#allocation6 + $0x50] sm:$0xff] }
  0x48   :  { %3456 = vmatprep.subr.bf16.mxu0 %v5484_v44  ;;  %3360 = vmatmul.mubr.msk.f32.gmra.mrb[12].mxu0 %vm97_vm0, %v65_v52  ;;  %v456_v42 = vld [vmem:[#allocation6 + $0x60] sm:$0xff]  ;;  %v5540_v46 = vpack.c.bf16 %v459_v32, %v455_v31  ;;  %v458_v49 = vld [vmem:[#allocation6 + $0x70] sm:$0xff]  ;;  %v461_v50 = vld [vmem:[#allocation6 + $0x88] sm:$0xff] }
  0x49   :  { %3488 = vmatprep.subr.bf16.mxu1 %v5488_v47  ;;  %3368 = vmatmul.mubr.msk.f32.gmra.mrb[12].mxu1 %vm97_vm0, %v65_v52  ;;  %v465_v52 = vld [vmem:[#allocation6 + $0xa8] sm:$0xff]  ;;  %v463_v54 = vld [vmem:[#allocation6 + $0x98] sm:$0xff]  ;;  %v5546_v58 = vpack.c.bf16 %v456_v42, %v452_v41  ;;  %v5550_v60 = vpack.c.bf16 %v458_v49, %v454_v45  ;;  %v460_v0 = vld [vmem:[#allocation6 + $0x80] sm:$0xff] }
  0x4a   :  { %3458 = vmatpush1.bf16.msra.mxu0 %v5495_v53  ;;  %3490 = vmatpush1.bf16.msra.mxu1 %v5499_v57  ;;  %v467_v56 = vld [vmem:[#allocation6 + $0xb8] sm:$0xff]  ;;  %v5552_v63 = vpack.c.bf16 %v465_v52, %v461_v50  ;;  %v464_v4 = vld [vmem:[#allocation6 + $0xa0] sm:$0xff]  ;;  %v462_v5 = vld [vmem:[#allocation6 + $0x90] sm:$0xff] }
  0x4b   :  { %228 = vmatprep.mubr.f32.mxu0 %v6636_v1  ;;  %341 = vmatprep.mubr.f32.mxu1 %v6636_v1  ;;  %6774 = vst [vmem:[#allocation12_spill] sm:$0xff] %v5550_v60  ;;  %v466_v10 = vld [vmem:[#allocation6 + $0xb0] sm:$0xff]  ;;  %v469_v11 = vld [vmem:[#allocation6 + $0xc8] sm:$0xff]  ;;  %v471_v15 = vld [vmem:[#allocation6 + $0xd8] sm:$0xff]  ;;  %v5560_v21 = vpack.c.bf16 %v464_v4, %v460_v0 }
  0x4c   :  { %3460 = vmatprep.subr.bf16.mxu0 %v5503_v61  ;;  %3361 = vmatmul.mubr.msk.f32.gmra.mrb[14].mxu0 %vm97_vm0, %v66_v7  ;;  %6775 = vst [vmem:[#allocation13_spill] sm:$0xff] %v5552_v63  ;;  %v473_v14 = vld [vmem:[#allocation6 + $0xe8] sm:$0xff]  ;;  %v475_v17 = vld [vmem:[#allocation6 + $0xf8] sm:$0xff]  ;;  %v5564_v24 = vpack.c.bf16 %v466_v10, %v462_v5  ;;  %v468_v31 = vld [vmem:[#allocation6 + $0xc0] sm:$0xff] }
  0x4d   :  { %3492 = vmatprep.subr.bf16.mxu1 %v5507_v2  ;;  %3369 = vmatmul.mubr.msk.f32.gmra.mrb[14].mxu1 %vm97_vm0, %v66_v7  ;;  %v5555_v7 = vpack.c.bf16 %v467_v56, %v463_v54  ;;  %6777 = vst [vmem:[#allocation15_spill] sm:$0xff] %v5560_v21  ;;  %v5566_v27 = vpack.c.bf16 %v473_v14, %v469_v11  ;;  %v472_v32 = vld [vmem:[#allocation6 + $0xe0] sm:$0xff]  ;;  %v470_v41 = vld [vmem:[#allocation6 + $0xd0] sm:$0xff]  ;;  %v477_v49 = vld [vmem:[#allocation6 + $0x108] sm:$0xff] }
  0x4e   :  { %3462 = vmatpush1.bf16.msra.mxu0 %v5514_v8  ;;  %3494 = vmatpush1.bf16.msra.mxu1 %v5518_v13  ;;  %6778 = vst [vmem:[#allocation16_spill] sm:$0xff] %v5564_v24  ;;  %v5569_v42 = vpack.c.bf16 %v475_v17, %v471_v15  ;;  %v474_v45 = vld [vmem:[#allocation6 + $0xf0] sm:$0xff]  ;;  %v481_v50 = vld [vmem:[#allocation6 + $0x128] sm:$0xff]  ;;  %v479_v52 = vld [vmem:[#allocation6 + $0x118] sm:$0xff]  ;;  %v5572_v56 = vpack.c.bf16 %v472_v32, %v468_v31 }
  0x4f   :  { %644 = vmatprep.mubr.f32.mxu0 %v6636_v1  ;;  %715 = vmatprep.mubr.f32.mxu1 %v6636_v1  ;;  %6776 = vst [vmem:[#allocation14_spill] sm:$0xff] %v5555_v7  ;;  %6779 = vst [vmem:[#allocation17_spill] sm:$0xff] %v5566_v27  ;;  %v483_v54 = vld [vmem:[#allocation6 + $0x138] sm:$0xff]  ;;  %v5576_v0 = vpack.c.bf16 %v474_v45, %v470_v41  ;;  %v5578_v4 = vpack.c.bf16 %v481_v50, %v477_v49  ;;  %v476_v5 = vld [vmem:[#allocation6 + $0x100] sm:$0xff] }
  0x50   :  { %3496 = vmatprep.subr.bf16.mxu0 %v5522_v19  ;;  %3560 = vmatprep.subr.bf16.mxu1 %v5526_v28  ;;  %6780 = vst [vmem:[#allocation18_spill] sm:$0xff] %v5569_v42  ;;  %6781 = vst [vmem:[#allocation19_spill] sm:$0xff] %v5572_v56  ;;  %v480_v10 = vld [vmem:[#allocation6 + $0x120] sm:$0xff]  ;;  %v478_v11 = vld [vmem:[#allocation6 + $0x110] sm:$0xff]  ;;  %v5581_v14 = vpack.c.bf16 %v483_v54, %v479_v52 }
  0x51   :  { %645 = vmatmul.mubr.f32.vlgmr.msra.gmra.mrb[0].mxu0 %v6636_v1  ;;  %716 = vmatmul.mubr.f32.vlgmr.msra.gmra.mrb[0].mxu1 %v6636_v1  ;;  %6782 = vst [vmem:[#allocation20_spill] sm:$0xff] %v5576_v0  ;;  %6783 = vst [vmem:[#allocation21_spill] sm:$0xff] %v5578_v4  ;;  %v482_v15 = vld [vmem:[#allocation6 + $0x130] sm:$0xff]  ;;  %v485_v17 = vld [vmem:[#allocation6 + $0x148] sm:$0xff] }
  0x52   :  { %3498 = vmatpush1.bf16.msra.mxu0 %v5530_v33  ;;  %3562 = vmatpush1.bf16.msra.mxu1 %v5534_v37  ;;  %6784 = vst [vmem:[#allocation22_spill] sm:$0xff] %v5581_v14  ;;  %v487_v31 = vld [vmem:[#allocation6 + $0x158] sm:$0xff]  ;;  %v5588_v41 = vpack.c.bf16 %v482_v15, %v478_v11  ;;  %v484_v49 = vld [vmem:[#allocation6 + $0x140] sm:$0xff]  ;;  %v486_v52 = vld [vmem:[#allocation6 + $0x150] sm:$0xff] }
  0x53   :  { %3500 = vmatprep.subr.bf16.mxu0 %v5536_v38  ;;  %3564 = vmatprep.subr.bf16.mxu1 %v5540_v46  ;;  %v491_v32 = vld [vmem:[#allocation6 + $0x178] sm:$0xff]  ;;  %v488_v50 = vld [vmem:[#allocation6 + $0x160] sm:$0xff] }
  0x54   :  { %829 = vmatprep.mubr.f32.mxu0 %v6636_v1  ;;  %900 = vmatprep.mubr.f32.mxu1 %v6636_v1  ;;  %v489_v1 = vld [vmem:[#allocation6 + $0x168] sm:$0xff]  ;;  %6786 = vst [vmem:[#allocation24_spill] sm:$0xff] %v5588_v41  ;;  %v5593_v54 = vpack.c.bf16 %v491_v32, %v487_v31  ;;  %v492_v15 = vld [vmem:[#allocation6 + $0x180] sm:$0xff]  ;;  %v494_v32 = vld [vmem:[#allocation6 + $0x190] sm:$0xff] }
  0x55   :  { %v5590_v45 = vpack.c.bf16 %v489_v1, %v485_v17  ;;  %v496_v17 = vld [vmem:[#allocation6 + $0x1a0] sm:$0xff] }
  0x56   :  { %3502 = vmatpush1.bf16.msra.mxu0 %v5546_v58  ;;  %3566 = vmatpush1.bf16.msra.mxu1 %v5550_v60  ;;  %6788 = vst [vmem:[#allocation26_spill] sm:$0xff] %v5593_v54 }
  0x57   :  { %3504 = vmatprep.subr.bf16.mxu0 %v5552_v63  ;;  %3568 = vmatprep.subr.bf16.mxu1 %v5555_v7  ;;  %6787 = vst [vmem:[#allocation25_spill] sm:$0xff] %v5590_v45 }
  0x5a   :  { %3506 = vmatpush1.bf16.msra.mxu0 %v5560_v21  ;;  %3570 = vmatpush1.bf16.msra.mxu1 %v5564_v24  ;;  %v5584_v24 = vpack.c.bf16 %v480_v10, %v476_v5  ;;  %v495_v5 = vld [vmem:[#allocation6 + $0x198] sm:$0xff] }
  0x5b   :  { %3508 = vmatprep.subr.bf16.mxu0 %v5566_v27  ;;  %3572 = vmatprep.subr.bf16.mxu1 %v5569_v42  ;;  %v490_v42 = vld [vmem:[#allocation6 + $0x170] sm:$0xff]  ;;  %v493_v27 = vld [vmem:[#allocation6 + $0x188] sm:$0xff]  ;;  %v499_v10 = vld [vmem:[#allocation6 + $0x1b8] sm:$0xff] }
  0x5c   :  { %6785 = vst [vmem:[#allocation23_spill] sm:$0xff] %v5584_v24  ;;  %v5600_v1 = vpack.c.bf16 %v490_v42, %v486_v52  ;;  %v5605_v31 = vpack.c.bf16 %v499_v10, %v495_v5  ;;  %v507_v5 = vld [vmem:[#allocation6 + $0x1f8] sm:$0xff]  ;;  %v500_v10 = vld [vmem:[#allocation6 + $0x1c0] sm:$0xff] }
  0x5e   :  { %3510 = vmatpush1.bf16.msra.mxu0 %v5572_v56  ;;  %3574 = vmatpush1.bf16.msra.mxu1 %v5576_v0  ;;  %v497_v56 = vld [vmem:[#allocation6 + $0x1a8] sm:$0xff]  ;;  %v5596_v0 = vpack.c.bf16 %v488_v50, %v484_v49  ;;  %6790 = vst [vmem:[#allocation28_spill] sm:$0xff] %v5600_v1  ;;  %6792 = vst [vmem:[#allocation30_spill] sm:$0xff] %v5605_v31  ;;  %v5608_v49 = vpack.c.bf16 %v496_v17, %v492_v15  ;;  %v503_v50 = vld [vmem:[#allocation6 + $0x1d8] sm:$0xff] }
  0x5f   :  { %3512 = vmatprep.subr.bf16.mxu0 %v5578_v4  ;;  %3576 = vmatprep.subr.bf16.mxu1 %v5581_v14  ;;  %v5602_v11 = vpack.c.bf16 %v497_v56, %v493_v27  ;;  %v498_v14 = vld [vmem:[#allocation6 + $0x1b0] sm:$0xff]  ;;  %v501_v27 = vld [vmem:[#allocation6 + $0x1c8] sm:$0xff]  ;;  %v504_v15 = vld [vmem:[#allocation6 + $0x1e0] sm:$0xff]  ;;  %v5619_v17 = vpack.c.bf16 %v507_v5, %v503_v50 }
  0x60   :  { %6789 = vst [vmem:[#allocation27_spill] sm:$0xff] %v5596_v0  ;;  %6793 = vst [vmem:[#allocation31_spill] sm:$0xff] %v5608_v49  ;;  %v5612_v42 = vpack.c.bf16 %v498_v14, %v494_v32  ;;  %v505_v56 = vld [vmem:[#allocation6 + $0x1e8] sm:$0xff]  ;;  %v502_v14 = vld [vmem:[#allocation6 + $0x1d0] sm:$0xff] }
  0x61   :  { %6791 = vst [vmem:[#allocation29_spill] sm:$0xff] %v5602_v11  ;;  %v5617_v52 = vpack.c.bf16 %v505_v56, %v501_v27  ;;  %6796 = vst [vmem:[#allocation34_spill] sm:$0xff] %v5619_v17  ;;  %v506_v32 = vld [vmem:[#allocation6 + $0x1f0] sm:$0xff]  ;;  %v513_v27 = vld [vmem:[#allocation6 + $0x228] sm:$0xff] }
  0x62   :  { %3514 = vmatpush1.bf16.msra.mxu0 %v5584_v24  ;;  %3578 = vmatpush1.bf16.msra.mxu1 %v5588_v41  ;;  %6794 = vst [vmem:[#allocation32_spill] sm:$0xff] %v5612_v42  ;;  %v511_v56 = vld [vmem:[#allocation6 + $0x218] sm:$0xff]  ;;  %v508_v5 = vld [vmem:[#allocation6 + $0x200] sm:$0xff] }
  0x63   :  { %3516 = vmatprep.subr.bf16.mxu0 %v5590_v45  ;;  %3580 = vmatprep.subr.bf16.mxu1 %v5593_v54  ;;  %6795 = vst [vmem:[#allocation33_spill] sm:$0xff] %v5617_v52  ;;  %v515_v50 = vld [vmem:[#allocation6 + $0x238] sm:$0xff] }
  0x66   :  { %3518 = vmatpush1.bf16.msra.mxu0 %v5596_v0  ;;  %3582 = vmatpush1.bf16.msra.mxu1 %v5600_v1  ;;  %v5621_v1 = vpack.c.bf16 %v504_v15, %v500_v10  ;;  %v512_v10 = vld [vmem:[#allocation6 + $0x220] sm:$0xff]  ;;  %v5631_v15 = vpack.c.bf16 %v515_v50, %v511_v56  ;;  %v523_v56 = vld [vmem:[#allocation6 + $0x278] sm:$0xff] }
  0x67   :  { %3520 = vmatprep.subr.bf16.mxu0 %v5602_v11  ;;  %3584 = vmatprep.subr.bf16.mxu1 %v5605_v31  ;;  %v5624_v31 = vpack.c.bf16 %v506_v32, %v502_v14  ;;  %v5633_v11 = vpack.c.bf16 %v512_v10, %v508_v5  ;;  %v510_v14 = vld [vmem:[#allocation6 + $0x210] sm:$0xff]  ;;  %v516_v50 = vld [vmem:[#allocation6 + $0x240] sm:$0xff] }
  0x68   :  { %6797 = vst [vmem:[#allocation35_spill] sm:$0xff] %v5621_v1  ;;  %6800 = vst [vmem:[#allocation38_spill] sm:$0xff] %v5631_v15  ;;  %v514_v32 = vld [vmem:[#allocation6 + $0x230] sm:$0xff]  ;;  %v520_v5 = vld [vmem:[#allocation6 + $0x260] sm:$0xff] }
  0x69   :  { %6798 = vst [vmem:[#allocation36_spill] sm:$0xff] %v5624_v31  ;;  %6801 = vst [vmem:[#allocation39_spill] sm:$0xff] %v5633_v11 }
  0x6a   :  { %3522 = vmatpush1.bf16.msra.mxu0 %v5608_v49  ;;  %3586 = vmatpush1.bf16.msra.mxu1 %v5612_v42  ;;  %v509_v42 = vld [vmem:[#allocation6 + $0x208] sm:$0xff] }
  0x6b   :  { %3524 = vmatprep.subr.bf16.mxu0 %v5617_v52  ;;  %3588 = vmatprep.subr.bf16.mxu1 %v5619_v17  ;;  %v5629_v49 = vpack.c.bf16 %v513_v27, %v509_v42  ;;  %v5636_v17 = vpack.c.bf16 %v514_v32, %v510_v14  ;;  %v521_v42 = vld [vmem:[#allocation6 + $0x268] sm:$0xff]  ;;  %v519_v27 = vld [vmem:[#allocation6 + $0x258] sm:$0xff]  ;;  %v5645_v52 = vpack.c.bf16 %v520_v5, %v516_v50  ;;  %v518_v14 = vld [vmem:[#allocation6 + $0x250] sm:$0xff] }
  0x6c   :  { %v5643_v10 = vpack.c.bf16 %v523_v56, %v519_v27  ;;  %v522_v32 = vld [vmem:[#allocation6 + $0x270] sm:$0xff]  ;;  %v531_v27 = vld [vmem:[#allocation6 + $0x2b8] sm:$0xff]  ;;  %v524_v56 = vld [vmem:[#allocation6 + $0x280] sm:$0xff] }
  0x6d   :  { %6799 = vst [vmem:[#allocation37_spill] sm:$0xff] %v5629_v49  ;;  %6802 = vst [vmem:[#allocation40_spill] sm:$0xff] %v5636_v17  ;;  %v528_v50 = vld [vmem:[#allocation6 + $0x2a0] sm:$0xff] }
  0x6e   :  { %3526 = vmatpush1.bf16.msra.mxu0 %v5621_v1  ;;  %3590 = vmatpush1.bf16.msra.mxu1 %v5624_v31  ;;  %v517_v31 = vld [vmem:[#allocation6 + $0x248] sm:$0xff]  ;;  %6804 = vst [vmem:[#allocation42_spill] sm:$0xff] %v5643_v10  ;;  %6805 = vst [vmem:[#allocation43_spill] sm:$0xff] %v5645_v52 }
  0x6f   :  { %3528 = vmatprep.subr.bf16.mxu0 %v5629_v49  ;;  %3592 = vmatprep.subr.bf16.mxu1 %v5631_v15  ;;  %v5641_v1 = vpack.c.bf16 %v521_v42, %v517_v31  ;;  %v5648_v15 = vpack.c.bf16 %v522_v32, %v518_v14  ;;  %v529_v31 = vld [vmem:[#allocation6 + $0x2a8] sm:$0xff]  ;;  %v527_v42 = vld [vmem:[#allocation6 + $0x298] sm:$0xff]  ;;  %v5657_v49 = vpack.c.bf16 %v528_v50, %v524_v56  ;;  %v526_v14 = vld [vmem:[#allocation6 + $0x290] sm:$0xff] }
  0x70   :  { %v5655_v5 = vpack.c.bf16 %v531_v27, %v527_v42  ;;  %v530_v32 = vld [vmem:[#allocation6 + $0x2b0] sm:$0xff]  ;;  %v539_v42 = vld [vmem:[#allocation6 + $0x2f8] sm:$0xff]  ;;  %v532_v27 = vld [vmem:[#allocation6 + $0x2c0] sm:$0xff] }
  0x71   :  { %6803 = vst [vmem:[#allocation41_spill] sm:$0xff] %v5641_v1  ;;  %6806 = vst [vmem:[#allocation44_spill] sm:$0xff] %v5648_v15  ;;  %v536_v56 = vld [vmem:[#allocation6 + $0x2e0] sm:$0xff] }
  0x72   :  { %3530 = vmatpush1.bf16.msra.mxu0 %v5633_v11  ;;  %3594 = vmatpush1.bf16.msra.mxu1 %v5636_v17  ;;  %v525_v17 = vld [vmem:[#allocation6 + $0x288] sm:$0xff]  ;;  %6808 = vst [vmem:[#allocation46_spill] sm:$0xff] %v5655_v5  ;;  %6809 = vst [vmem:[#allocation47_spill] sm:$0xff] %v5657_v49 }
  0x73   :  { %3532 = vmatprep.subr.bf16.mxu0 %v5641_v1  ;;  %3596 = vmatprep.subr.bf16.mxu1 %v5643_v10  ;;  %v5653_v11 = vpack.c.bf16 %v529_v31, %v525_v17  ;;  %v5660_v10 = vpack.c.bf16 %v530_v32, %v526_v14  ;;  %v537_v17 = vld [vmem:[#allocation6 + $0x2e8] sm:$0xff]  ;;  %v535_v31 = vld [vmem:[#allocation6 + $0x2d8] sm:$0xff]  ;;  %v5669_v1 = vpack.c.bf16 %v536_v56, %v532_v27  ;;  %v534_v14 = vld [vmem:[#allocation6 + $0x2d0] sm:$0xff] }
  0x74   :  { %v5667_v50 = vpack.c.bf16 %v539_v42, %v535_v31  ;;  %v538_v32 = vld [vmem:[#allocation6 + $0x2f0] sm:$0xff]  ;;  %v547_v31 = vld [vmem:[#allocation6 + $0x338] sm:$0xff]  ;;  %v540_v42 = vld [vmem:[#allocation6 + $0x300] sm:$0xff] }
  0x75   :  { %6807 = vst [vmem:[#allocation45_spill] sm:$0xff] %v5653_v11  ;;  %6810 = vst [vmem:[#allocation48_spill] sm:$0xff] %v5660_v10  ;;  %v544_v27 = vld [vmem:[#allocation6 + $0x320] sm:$0xff] }
  0x76   :  { %3534 = vmatpush1.bf16.msra.mxu0 %v5645_v52  ;;  %3598 = vmatpush1.bf16.msra.mxu1 %v5648_v15  ;;  %v533_v15 = vld [vmem:[#allocation6 + $0x2c8] sm:$0xff]  ;;  %6812 = vst [vmem:[#allocation50_spill] sm:$0xff] %v5667_v50  ;;  %6813 = vst [vmem:[#allocation51_spill] sm:$0xff] %v5669_v1 }
  0x77   :  { %3536 = vmatprep.subr.bf16.mxu0 %v5653_v11  ;;  %3600 = vmatprep.subr.bf16.mxu1 %v5655_v5  ;;  %v5665_v52 = vpack.c.bf16 %v537_v17, %v533_v15  ;;  %v5672_v5 = vpack.c.bf16 %v538_v32, %v534_v14  ;;  %v545_v15 = vld [vmem:[#allocation6 + $0x328] sm:$0xff]  ;;  %v543_v17 = vld [vmem:[#allocation6 + $0x318] sm:$0xff]  ;;  %v5681_v11 = vpack.c.bf16 %v544_v27, %v540_v42  ;;  %v542_v14 = vld [vmem:[#allocation6 + $0x310] sm:$0xff] }
  0x78   :  { %v5679_v56 = vpack.c.bf16 %v547_v31, %v543_v17  ;;  %v546_v32 = vld [vmem:[#allocation6 + $0x330] sm:$0xff]  ;;  %v555_v17 = vld [vmem:[#allocation6 + $0x378] sm:$0xff]  ;;  %v548_v31 = vld [vmem:[#allocation6 + $0x340] sm:$0xff] }
  0x79   :  { %6811 = vst [vmem:[#allocation49_spill] sm:$0xff] %v5665_v52  ;;  %6814 = vst [vmem:[#allocation52_spill] sm:$0xff] %v5672_v5  ;;  %v552_v42 = vld [vmem:[#allocation6 + $0x360] sm:$0xff] }
  0x7a   :  { %3538 = vmatpush1.bf16.msra.mxu0 %v5657_v49  ;;  %3602 = vmatpush1.bf16.msra.mxu1 %v5660_v10  ;;  %v541_v10 = vld [vmem:[#allocation6 + $0x308] sm:$0xff]  ;;  %6816 = vst [vmem:[#allocation54_spill] sm:$0xff] %v5679_v56  ;;  %6817 = vst [vmem:[#allocation55_spill] sm:$0xff] %v5681_v11 }
  0x7b   :  { %3540 = vmatprep.subr.bf16.mxu0 %v5665_v52  ;;  %3604 = vmatprep.subr.bf16.mxu1 %v5667_v50  ;;  %v5677_v49 = vpack.c.bf16 %v545_v15, %v541_v10  ;;  %v5684_v50 = vpack.c.bf16 %v546_v32, %v542_v14  ;;  %v553_v10 = vld [vmem:[#allocation6 + $0x368] sm:$0xff]  ;;  %v551_v15 = vld [vmem:[#allocation6 + $0x358] sm:$0xff]  ;;  %v5693_v52 = vpack.c.bf16 %v552_v42, %v548_v31  ;;  %v550_v14 = vld [vmem:[#allocation6 + $0x350] sm:$0xff] }
  0x7c   :  { %v5691_v27 = vpack.c.bf16 %v555_v17, %v551_v15  ;;  %v554_v32 = vld [vmem:[#allocation6 + $0x370] sm:$0xff]  ;;  %v563_v15 = vld [vmem:[#allocation6 + $0x3b8] sm:$0xff]  ;;  %v556_v17 = vld [vmem:[#allocation6 + $0x380] sm:$0xff] }
  0x7d   :  { %6815 = vst [vmem:[#allocation53_spill] sm:$0xff] %v5677_v49  ;;  %6818 = vst [vmem:[#allocation56_spill] sm:$0xff] %v5684_v50  ;;  %v560_v31 = vld [vmem:[#allocation6 + $0x3a0] sm:$0xff] }
  0x7e   :  { %3542 = vmatpush1.bf16.msra.mxu0 %v5669_v1  ;;  %3606 = vmatpush1.bf16.msra.mxu1 %v5672_v5  ;;  %v549_v5 = vld [vmem:[#allocation6 + $0x348] sm:$0xff]  ;;  %6820 = vst [vmem:[#allocation58_spill] sm:$0xff] %v5691_v27  ;;  %6821 = vst [vmem:[#allocation59_spill] sm:$0xff] %v5693_v52 }
  0x7f   :  { %3544 = vmatprep.subr.bf16.mxu0 %v5677_v49  ;;  %3608 = vmatprep.subr.bf16.mxu1 %v5679_v56  ;;  %v5689_v1 = vpack.c.bf16 %v553_v10, %v549_v5  ;;  %v5696_v56 = vpack.c.bf16 %v554_v32, %v550_v14  ;;  %v561_v5 = vld [vmem:[#allocation6 + $0x3a8] sm:$0xff]  ;;  %v559_v10 = vld [vmem:[#allocation6 + $0x398] sm:$0xff]  ;;  %v5705_v49 = vpack.c.bf16 %v560_v31, %v556_v17  ;;  %v558_v14 = vld [vmem:[#allocation6 + $0x390] sm:$0xff] }
  0x80   :  { %v5703_v42 = vpack.c.bf16 %v563_v15, %v559_v10  ;;  %v562_v32 = vld [vmem:[#allocation6 + $0x3b0] sm:$0xff]  ;;  %v571_v10 = vld [vmem:[#allocation6 + $0x3f8] sm:$0xff]  ;;  %v564_v15 = vld [vmem:[#allocation6 + $0x3c0] sm:$0xff] }
  0x81   :  { %6819 = vst [vmem:[#allocation57_spill] sm:$0xff] %v5689_v1  ;;  %6822 = vst [vmem:[#allocation60_spill] sm:$0xff] %v5696_v56  ;;  %v568_v17 = vld [vmem:[#allocation6 + $0x3e0] sm:$0xff] }
  0x82   :  { %3546 = vmatpush1.bf16.msra.mxu0 %v5681_v11  ;;  %3610 = vmatpush1.bf16.msra.mxu1 %v5684_v50  ;;  %v557_v50 = vld [vmem:[#allocation6 + $0x388] sm:$0xff]  ;;  %6824 = vst [vmem:[#allocation62_spill] sm:$0xff] %v5703_v42  ;;  %6825 = vst [vmem:[#allocation63_spill] sm:$0xff] %v5705_v49 }
  0x83   :  { %3548 = vmatprep.subr.bf16.mxu0 %v5689_v1  ;;  %3612 = vmatprep.subr.bf16.mxu1 %v5691_v27  ;;  %v5701_v11 = vpack.c.bf16 %v561_v5, %v557_v50  ;;  %v5708_v27 = vpack.c.bf16 %v562_v32, %v558_v14  ;;  %v569_v50 = vld [vmem:[#allocation6 + $0x3e8] sm:$0xff]  ;;  %v567_v5 = vld [vmem:[#allocation6 + $0x3d8] sm:$0xff]  ;;  %v5717_v1 = vpack.c.bf16 %v568_v17, %v564_v15  ;;  %v566_v14 = vld [vmem:[#allocation6 + $0x3d0] sm:$0xff] }
  0x84   :  { %v5715_v31 = vpack.c.bf16 %v571_v10, %v567_v5  ;;  %v570_v32 = vld [vmem:[#allocation6 + $0x3f0] sm:$0xff]  ;;  %v75_v10 = vld [vmem:[%s6629_s2] sm:$0xf] }
  0x85   :  { %6823 = vst [vmem:[#allocation61_spill] sm:$0xff] %v5701_v11  ;;  %6826 = vst [vmem:[#allocation64_spill] sm:$0xff] %v5708_v27 }
  0x86   :  { %3550 = vmatpush1.bf16.msra.mxu0 %v5693_v52  ;;  %3614 = vmatpush1.bf16.msra.mxu1 %v5696_v56  ;;  %v565_v56 = vld [vmem:[#allocation6 + $0x3c8] sm:$0xff]  ;;  %6828 = vst [vmem:[#allocation66_spill] sm:$0xff] %v5715_v31  ;;  %6829 = vst [vmem:[#allocation67_spill] sm:$0xff] %v5717_v1 }
  0x87   :  { %3552 = vmatprep.subr.bf16.mxu0 %v5701_v11  ;;  %3616 = vmatprep.subr.bf16.mxu1 %v5703_v42  ;;  %v5713_v52 = vpack.c.bf16 %v569_v50, %v565_v56  ;;  %v5720_v42 = vpack.c.bf16 %v570_v32, %v566_v14  ;;  %v77_v56 = vlaneseq }
  0x89   :  { %6827 = vst [vmem:[#allocation65_spill] sm:$0xff] %v5713_v52  ;;  %6830 = vst [vmem:[#allocation68_spill] sm:$0xff] %v5720_v42  ;;  %v5727_v50 = vshrl.u32 %v77_v56, 7 }
  0x8a   :  { %3554 = vmatpush1.bf16.msra.mxu0 %v5705_v49  ;;  %3618 = vmatpush1.bf16.msra.mxu1 %v5708_v27 }
  0x8b   :  { %3556 = vmatprep.subr.bf16.mxu0 %v5713_v52  ;;  %3620 = vmatprep.subr.bf16.mxu1 %v5715_v31  ;;  %v6728_v5 = vsub.s32 0, %v5727_v50  ;;  %v6735_v15 = vsub.s32 1, %v5727_v50  ;;  %v6738_v14 = vsub.s32 2, %v5727_v50  ;;  %v6749_v31 = vsub.s32 3, %v5727_v50 }
  0x8d   :  { %v5736_v17 = vrot.slane %v75_v10, %v6728_v5  ;;  %v5741_v32 = vrot.slane %v75_v10, %v6735_v15  ;;  %v5753_v11 = vrot.slane %v75_v10, %v6749_v31 }
  0x8e   :  { %3558 = vmatpush1.bf16.msra.mxu0 %v5717_v1  ;;  %3622 = vmatpush1.bf16.msra.mxu1 %v5720_v42 }
  0x8f   :  { %3624 = vmatprep.subr.bf16.mxu0 %v5380_v18  ;;  %3656 = vmatprep.subr.bf16.mxu1 %v5382_v22  ;;  %6831 = vst [vmem:[#allocation69_spill] sm:$0xff] %v5736_v17  ;;  %6832 = vst [vmem:[#allocation70_spill] sm:$0xff] %v5741_v32  ;;  %v5746_v18 = vrot.slane %v75_v10, %v6738_v14 }
 0x124   :  { %v646_v56 = vpop.f32.mrb[0].mxu0  ;;  %v717_v42 = vpop.f32.mrb[0].mxu1 }
 0x125   :  { %v4991_v22 = vadd.f32 %v646_v56, %v5736_v17  ;;  %v648_v1 = vpop.f32.mrb[1].mxu0  ;;  %v719_v52 = vpop.f32.mrb[1].mxu1  ;;  %v5007_v15 = vadd.f32 %v717_v42, %v5746_v18 }
 0x126   :  { %v4992_v5 = vadd.f32 %v648_v1, %v5741_v32  ;;  %v5008_v56 = vadd.f32 %v719_v52, %v5753_v11 }
 0x127   :  { %v726_v27 = vmul.f32 0.5, %v4991_v22 }
 0x128   :  { %v730_v49 = vmul.f32 0.5, %v4992_v5  ;;  %v735_v14 = vmul.f32 0.5, %v5008_v56  ;;  %v6840_v56 = vld [vmem:[#allocation25_spill] sm:$0xff] }
 0x129   :  { %5062 = vtanh.f32 %v726_v27 }
 0x12a   :  { %5064 = vtanh.f32 %v730_v49 }
 0x12b   :  { %5066 = vtanh.f32 %v5007_v15 }
 0x12c   :  { %5068 = vtanh.f32 %v735_v14  ;;  %v6838_v14 = vld [vmem:[#allocation20_spill] sm:$0xff] }
 0x133   :  { %v5063_v17 = vpop.eup %5062 }
 0x134   :  { %v5065_v0 = vpop.eup %5064  ;;  %v728_v54 = vadd.f32 1.0, %v5063_v17  ;;  %v6837_v17 = vld [vmem:[#allocation19_spill] sm:$0xff] }
 0x135   :  { %v732_v45 = vadd.f32 1.0, %v5065_v0  ;;  %v5067_v22 = vpop.eup %5066  ;;  %v6833_v0 = vmov 0.0  }
 0x136   :  { %v729_v1 = vmul.f32 0.5, %v728_v54  ;;  %v5069_v10 = vpop.eup %5068  ;;  %v6835_v54 = vld [vmem:[#allocation17_spill] sm:$0xff] }
 0x137   :  { %v733_v5 = vmul.f32 0.5, %v732_v45  ;;  %v737_v49 = vadd.f32 1.0, %v5069_v10  ;;  %v6834_v45 = vld [vmem:[#allocation16_spill] sm:$0xff]  ;;  %v6845_v10 = vld [vmem:[#allocation30_spill] sm:$0xff] }
 0x138   :  { %v740_v27 = vmul.f32 %v5067_v22, %v729_v1  ;;  %v6841_v1 = vld [vmem:[#allocation26_spill] sm:$0xff]  ;;  %v6842_v22 = vld [vmem:[#allocation27_spill] sm:$0xff] }
 0x139   :  { %v739_v32 = vmul.f32 0.0, %v733_v5  ;;  %v738_v15 = vmul.f32 0.5, %v737_v49  ;;  %v6843_v5 = vld [vmem:[#allocation28_spill] sm:$0xff]  ;;  %v6846_v49 = vld [vmem:[#allocation31_spill] sm:$0xff] }
 0x13b   :  { %v5756_v42 = vadd.f32 %v740_v27, %v739_v32  ;;  %v6839_v32 = vld [vmem:[#allocation22_spill] sm:$0xff]  ;;  %v6844_v27 = vld [vmem:[#allocation29_spill] sm:$0xff] }
 0x13d   :  { %5070 = vtanh.f32 %v5756_v42 }
 0x147   :  { %v5071_v31 = vpop.eup %5070 }
 0x148   :  { %v743_v52 = vmul.f32 %v5071_v31, %v738_v15  ;;  %v6836_v31 = vld [vmem:[#allocation18_spill] sm:$0xff]  ;;  %v6847_v15 = vld [vmem:[#allocation32_spill] sm:$0xff] }
 0x14a   :  { %830 = vmatmul.mubr.f32.vlgmr.msra.gmra.mrb[16].mxu0 %v743_v52  ;;  %901 = vmatmul.mubr.f32.vlgmr.msra.gmra.mrb[16].mxu1 %v743_v52 }
 0x14b   :  { %3626 = vmatpush1.bf16.msra.mxu0 %v5384_v23  ;;  %3658 = vmatpush1.bf16.msra.mxu1 %v5387_v26 }
 0x14c   :  { %3628 = vmatprep.subr.bf16.mxu0 %v5391_v30  ;;  %3660 = vmatprep.subr.bf16.mxu1 %v5398_v35 }
 0x14d   :  { %996 = vmatprep.mubr.f32.mxu0 %v6833_v0  ;;  %1067 = vmatprep.mubr.f32.mxu1 %v6833_v0 }
 0x14f   :  { %3630 = vmatpush1.bf16.msra.mxu0 %v5400_v36  ;;  %3662 = vmatpush1.bf16.msra.mxu1 %v5404_v39 }
 0x150   :  { %3632 = vmatprep.subr.bf16.mxu0 %v5408_v43  ;;  %3664 = vmatprep.subr.bf16.mxu1 %v5415_v48 }
 0x153   :  { %3634 = vmatpush1.bf16.msra.mxu0 %v5419_v51  ;;  %3666 = vmatpush1.bf16.msra.mxu1 %v5423_v55 }
 0x154   :  { %3636 = vmatprep.subr.bf16.mxu0 %v5427_v59  ;;  %3668 = vmatprep.subr.bf16.mxu1 %v5431_v62 }
 0x157   :  { %3638 = vmatpush1.bf16.msra.mxu0 %v5438_v3  ;;  %3670 = vmatpush1.bf16.msra.mxu1 %v5442_v6 }
 0x158   :  { %3640 = vmatprep.subr.bf16.mxu0 %v5446_v9  ;;  %3672 = vmatprep.subr.bf16.mxu1 %v5450_v12 }
 0x15b   :  { %3642 = vmatpush1.bf16.msra.mxu0 %v5457_v16  ;;  %3674 = vmatpush1.bf16.msra.mxu1 %v5461_v20 }
 0x15c   :  { %3644 = vmatprep.subr.bf16.mxu0 %v5465_v25  ;;  %3676 = vmatprep.subr.bf16.mxu1 %v5469_v29 }
 0x15f   :  { %3646 = vmatpush1.bf16.msra.mxu0 %v5476_v34  ;;  %3678 = vmatpush1.bf16.msra.mxu1 %v5480_v40 }
 0x160   :  { %3648 = vmatprep.subr.bf16.mxu0 %v5484_v44  ;;  %3680 = vmatprep.subr.bf16.mxu1 %v5488_v47 }
 0x163   :  { %3650 = vmatpush1.bf16.msra.mxu0 %v5495_v53  ;;  %3682 = vmatpush1.bf16.msra.mxu1 %v5499_v57 }
 0x164   :  { %3652 = vmatprep.subr.bf16.mxu0 %v5503_v61  ;;  %3684 = vmatprep.subr.bf16.mxu1 %v5507_v2 }
 0x167   :  { %3654 = vmatpush1.bf16.msra.mxu0 %v5514_v8  ;;  %3686 = vmatpush1.bf16.msra.mxu1 %v5518_v13 }
 0x168   :  { %3688 = vmatprep.subr.bf16.mxu0 %v5522_v19  ;;  %3752 = vmatprep.subr.bf16.mxu1 %v5526_v28 }
 0x16a   :  { %997 = vmatmul.mubr.f32.vlgmr.msra.gmra.mrb[2].mxu0 %v743_v52  ;;  %1068 = vmatmul.mubr.f32.vlgmr.msra.gmra.mrb[2].mxu1 %v743_v52  ;;  %v6848_v52 = vld [vmem:[#allocation33_spill] sm:$0xff] }
 0x16b   :  { %3690 = vmatpush1.bf16.msra.mxu0 %v5530_v33  ;;  %3754 = vmatpush1.bf16.msra.mxu1 %v5534_v37 }
 0x16c   :  { %3692 = vmatprep.subr.bf16.mxu0 %v5536_v38  ;;  %3756 = vmatprep.subr.bf16.mxu1 %v5540_v46 }
 0x16f   :  { %3694 = vmatpush1.bf16.msra.mxu0 %v5546_v58  ;;  %3758 = vmatpush1.bf16.msra.mxu1 %v5550_v60 }
 0x170   :  { %3696 = vmatprep.subr.bf16.mxu0 %v5552_v63  ;;  %3760 = vmatprep.subr.bf16.mxu1 %v5555_v7 }
 0x173   :  { %3698 = vmatpush1.bf16.msra.mxu0 %v5560_v21  ;;  %3762 = vmatpush1.bf16.msra.mxu1 %v6834_v45 }
 0x174   :  { %3700 = vmatprep.subr.bf16.mxu0 %v6835_v54  ;;  %3764 = vmatprep.subr.bf16.mxu1 %v6836_v31 }
 0x177   :  { %3702 = vmatpush1.bf16.msra.mxu0 %v6837_v17  ;;  %3766 = vmatpush1.bf16.msra.mxu1 %v6838_v14 }
 0x178   :  { %3704 = vmatprep.subr.bf16.mxu0 %v5578_v4  ;;  %3768 = vmatprep.subr.bf16.mxu1 %v6839_v32 }
 0x17b   :  { %3706 = vmatpush1.bf16.msra.mxu0 %v5584_v24  ;;  %3770 = vmatpush1.bf16.msra.mxu1 %v5588_v41  ;;  %v6849_v24 = vld [vmem:[#allocation34_spill] sm:$0xff]  ;;  %v6850_v41 = vld [vmem:[#allocation35_spill] sm:$0xff] }
 0x17c   :  { %3708 = vmatprep.subr.bf16.mxu0 %v6840_v56  ;;  %3772 = vmatprep.subr.bf16.mxu1 %v6841_v1  ;;  %v6851_v56 = vld [vmem:[#allocation36_spill] sm:$0xff]  ;;  %v6852_v1 = vld [vmem:[#allocation37_spill] sm:$0xff] }
 0x17f   :  { %3710 = vmatpush1.bf16.msra.mxu0 %v6842_v22  ;;  %3774 = vmatpush1.bf16.msra.mxu1 %v6843_v5  ;;  %v6853_v22 = vld [vmem:[#allocation38_spill] sm:$0xff]  ;;  %v6854_v5 = vld [vmem:[#allocation39_spill] sm:$0xff] }
 0x180   :  { %3712 = vmatprep.subr.bf16.mxu0 %v6844_v27  ;;  %3776 = vmatprep.subr.bf16.mxu1 %v6845_v10  ;;  %v6855_v27 = vld [vmem:[#allocation40_spill] sm:$0xff]  ;;  %v6856_v10 = vld [vmem:[#allocation41_spill] sm:$0xff] }
 0x183   :  { %3714 = vmatpush1.bf16.msra.mxu0 %v6846_v49  ;;  %3778 = vmatpush1.bf16.msra.mxu1 %v6847_v15  ;;  %v6857_v49 = vld [vmem:[#allocation42_spill] sm:$0xff]  ;;  %v6858_v15 = vld [vmem:[#allocation43_spill] sm:$0xff] }
 0x184   :  { %3716 = vmatprep.subr.bf16.mxu0 %v6848_v52  ;;  %3780 = vmatprep.subr.bf16.mxu1 %v6849_v24  ;;  %v6859_v52 = vld [vmem:[#allocation44_spill] sm:$0xff]  ;;  %v6860_v24 = vld [vmem:[#allocation45_spill] sm:$0xff] }
 0x187   :  { %3718 = vmatpush1.bf16.msra.mxu0 %v6850_v41  ;;  %3782 = vmatpush1.bf16.msra.mxu1 %v6851_v56  ;;  %v6861_v41 = vld [vmem:[#allocation46_spill] sm:$0xff]  ;;  %v6862_v56 = vld [vmem:[#allocation47_spill] sm:$0xff] }
 0x188   :  { %3720 = vmatprep.subr.bf16.mxu0 %v6852_v1  ;;  %3784 = vmatprep.subr.bf16.mxu1 %v6853_v22  ;;  %v6863_v1 = vld [vmem:[#allocation48_spill] sm:$0xff]  ;;  %v6864_v22 = vld [vmem:[#allocation49_spill] sm:$0xff] }
 0x18b   :  { %3722 = vmatpush1.bf16.msra.mxu0 %v6854_v5  ;;  %3786 = vmatpush1.bf16.msra.mxu1 %v6855_v27  ;;  %v6865_v5 = vld [vmem:[#allocation50_spill] sm:$0xff]  ;;  %v6866_v27 = vld [vmem:[#allocation51_spill] sm:$0xff] }
 0x18c   :  { %3724 = vmatprep.subr.bf16.mxu0 %v6856_v10  ;;  %3788 = vmatprep.subr.bf16.mxu1 %v6857_v49  ;;  %v6867_v10 = vld [vmem:[#allocation52_spill] sm:$0xff]  ;;  %v6868_v49 = vld [vmem:[#allocation53_spill] sm:$0xff] }
 0x18f   :  { %3726 = vmatpush1.bf16.msra.mxu0 %v6858_v15  ;;  %3790 = vmatpush1.bf16.msra.mxu1 %v6859_v52  ;;  %v6869_v15 = vld [vmem:[#allocation54_spill] sm:$0xff]  ;;  %v6870_v52 = vld [vmem:[#allocation55_spill] sm:$0xff] }
 0x190   :  { %3728 = vmatprep.subr.bf16.mxu0 %v6860_v24  ;;  %3792 = vmatprep.subr.bf16.mxu1 %v6861_v41  ;;  %v6871_v24 = vld [vmem:[#allocation56_spill] sm:$0xff]  ;;  %v6872_v41 = vld [vmem:[#allocation57_spill] sm:$0xff] }
 0x193   :  { %3730 = vmatpush1.bf16.msra.mxu0 %v6862_v56  ;;  %3794 = vmatpush1.bf16.msra.mxu1 %v6863_v1  ;;  %v6873_v56 = vld [vmem:[#allocation58_spill] sm:$0xff]  ;;  %v6874_v1 = vld [vmem:[#allocation59_spill] sm:$0xff] }
 0x194   :  { %3732 = vmatprep.subr.bf16.mxu0 %v6864_v22  ;;  %3796 = vmatprep.subr.bf16.mxu1 %v6865_v5  ;;  %v6875_v22 = vld [vmem:[#allocation60_spill] sm:$0xff]  ;;  %v6876_v5 = vld [vmem:[#allocation61_spill] sm:$0xff] }
 0x197   :  { %3734 = vmatpush1.bf16.msra.mxu0 %v6866_v27  ;;  %3798 = vmatpush1.bf16.msra.mxu1 %v6867_v10  ;;  %v6877_v27 = vld [vmem:[#allocation62_spill] sm:$0xff]  ;;  %v6878_v10 = vld [vmem:[#allocation63_spill] sm:$0xff] }
 0x198   :  { %3736 = vmatprep.subr.bf16.mxu0 %v6868_v49  ;;  %3800 = vmatprep.subr.bf16.mxu1 %v6869_v15  ;;  %v6879_v49 = vld [vmem:[#allocation64_spill] sm:$0xff]  ;;  %v6880_v15 = vld [vmem:[#allocation65_spill] sm:$0xff] }
 0x19b   :  { %3738 = vmatpush1.bf16.msra.mxu0 %v6870_v52  ;;  %3802 = vmatpush1.bf16.msra.mxu1 %v6871_v24  ;;  %v6881_v52 = vld [vmem:[#allocation66_spill] sm:$0xff]  ;;  %v6882_v24 = vld [vmem:[#allocation67_spill] sm:$0xff] }
 0x19c   :  { %3740 = vmatprep.subr.bf16.mxu0 %v6872_v41  ;;  %3804 = vmatprep.subr.bf16.mxu1 %v6873_v56  ;;  %v6883_v41 = vld [vmem:[#allocation68_spill] sm:$0xff]  ;;  %v6884_v56 = vld [vmem:[#allocation10_spill] sm:$0xff] }
 0x19f   :  { %3742 = vmatpush1.bf16.msra.mxu0 %v6874_v1  ;;  %3806 = vmatpush1.bf16.msra.mxu1 %v6875_v22  ;;  %v6885_v1 = vld [vmem:[#allocation11_spill] sm:$0xff] }
 0x1a0   :  { %3744 = vmatprep.subr.bf16.mxu0 %v6876_v5  ;;  %3808 = vmatprep.subr.bf16.mxu1 %v6877_v27  ;;  %v572_v27 = vld [vmem:[%s6632_s5] sm:$0xf] }
 0x1a3   :  { %3746 = vmatpush1.bf16.msra.mxu0 %v6878_v10  ;;  %3810 = vmatpush1.bf16.msra.mxu1 %v6879_v49  ;;  %v6886_v10 = vsub.s32 0, %v5727_v50 }
 0x1a4   :  { %3748 = vmatprep.subr.bf16.mxu0 %v6880_v15  ;;  %3812 = vmatprep.subr.bf16.mxu1 %v6881_v52  ;;  %v6888_v15 = vsub.s32 1, %v5727_v50 }
 0x1a5   :  { %v5862_v5 = vrot.slane %v572_v27, %v6886_v10 }
 0x1a6   :  { %v5866_v49 = vrot.slane %v572_v27, %v6888_v15  ;;  %v6892_v15 = vsub.s32 3, %v5727_v50 }
 0x1a7   :  { %3750 = vmatpush1.bf16.msra.mxu0 %v6882_v24  ;;  %3814 = vmatpush1.bf16.msra.mxu1 %v6883_v41  ;;  %6887 = vst [vmem:[#allocation71_spill] sm:$0xff] %v5862_v5 }
 0x1a8   :  { %3816 = vmatprep.subr.bf16.mxu0 %v6884_v56  ;;  %3848 = vmatprep.subr.bf16.mxu1 %v6885_v1  ;;  %6889 = vst [vmem:[#allocation72_spill] sm:$0xff] %v5866_v49  ;;  %v6890_v56 = vsub.s32 2, %v5727_v50  ;;  %v5877_v31 = vrot.slane %v572_v27, %v6892_v15 }
 0x1aa   :  { %v5871_v22 = vrot.slane %v572_v27, %v6890_v56  ;;  %6893 = vst [vmem:[#allocation74_spill] sm:$0xff] %v5877_v31 }
 0x1ac   :  { %6891 = vst [vmem:[#allocation73_spill] sm:$0xff] %v5871_v22 }
 0x21d   :  { %v831_v52 = vpop.f32.mrb[16].mxu0  ;;  %v902_v24 = vpop.f32.mrb[16].mxu1 }
 0x21e   :  { %v832_v41 = vadd.f32 %v831_v52, %v5862_v5  ;;  %v833_v1 = vpop.f32.mrb[17].mxu0  ;;  %v904_v32 = vpop.f32.mrb[17].mxu1  ;;  %v903_v10 = vadd.f32 %v902_v24, %v5871_v22 }
 0x21f   :  { %v834_v4 = vadd.f32 %v833_v1, %v5866_v49  ;;  %v905_v52 = vadd.f32 %v904_v32, %v5877_v31  ;;  %v6894_v32 = vld [vmem:[#allocation69_spill] sm:$0xff] }
 0x220   :  { %v907_v14 = vmul.f32 0.5, %v832_v41 }
 0x221   :  { %v911_v17 = vmul.f32 0.5, %v834_v4  ;;  %v916_v5 = vmul.f32 0.5, %v905_v52 }
 0x222   :  { %5072 = vtanh.f32 %v907_v14 }
 0x223   :  { %5074 = vtanh.f32 %v911_v17 }
 0x224   :  { %5076 = vtanh.f32 %v903_v10 }
 0x225   :  { %5078 = vtanh.f32 %v916_v5 }
 0x22c   :  { %v5073_v56 = vpop.eup %5072 }
 0x22d   :  { %v5075_v54 = vpop.eup %5074  ;;  %v909_v45 = vadd.f32 1.0, %v5073_v56 }
 0x22e   :  { %v913_v21 = vadd.f32 1.0, %v5075_v54  ;;  %v5077_v41 = vpop.eup %5076  ;;  %v6895_v54 = vld [vmem:[#allocation70_spill] sm:$0xff] }
 0x22f   :  { %v910_v1 = vmul.f32 0.5, %v909_v45  ;;  %v5079_v50 = vpop.eup %5078 }
 0x230   :  { %v914_v4 = vmul.f32 0.5, %v913_v21  ;;  %v918_v17 = vadd.f32 1.0, %v5079_v50 }
 0x231   :  { %v921_v14 = vmul.f32 %v5077_v41, %v910_v1 }
 0x232   :  { %v920_v49 = vmul.f32 0.0, %v914_v4  ;;  %v919_v56 = vmul.f32 0.5, %v918_v17 }
 0x234   :  { %v5880_v24 = vadd.f32 %v921_v14, %v920_v49 }
 0x236   :  { %5080 = vtanh.f32 %v5880_v24 }
 0x23d   :  { %v998_v27 = vpop.f32.mrb[2].mxu0  ;;  %v1069_v10 = vpop.f32.mrb[2].mxu1 }
 0x23e   :  { %v4993_v15 = vadd.f32 %v998_v27, %v6894_v32  ;;  %v1000_v52 = vpop.f32.mrb[3].mxu0  ;;  %v1071_v31 = vpop.f32.mrb[3].mxu1  ;;  %v5009_v49 = vadd.f32 %v1069_v10, %v5746_v18 }
 0x23f   :  { %v4994_v5 = vadd.f32 %v1000_v52, %v6895_v54  ;;  %v5010_v41 = vadd.f32 %v1071_v31, %v5753_v11 }
 0x240   :  { %v5081_v45 = vpop.eup %5080  ;;  %v1078_v22 = vmul.f32 0.5, %v4993_v15 }
 0x241   :  { %v1082_v21 = vmul.f32 0.5, %v4994_v5  ;;  %v924_v1 = vmul.f32 %v5081_v45, %v919_v56  ;;  %v1087_v4 = vmul.f32 0.5, %v5010_v41  ;;  %v6899_v41 = vld [vmem:[#allocation18_spill] sm:$0xff] }
 0x242   :  { %5082 = vtanh.f32 %v1078_v22 }
 0x243   :  { %5084 = vtanh.f32 %v1082_v21  ;;  %1160 = vmatprep.mubr.f32.mxu0 %v924_v1  ;;  %1231 = vmatprep.mubr.f32.mxu1 %v924_v1 }
 0x244   :  { %5086 = vtanh.f32 %v5009_v49  ;;  %v6898_v49 = vld [vmem:[#allocation17_spill] sm:$0xff] }
 0x245   :  { %5088 = vtanh.f32 %v1087_v4  ;;  %v6900_v4 = vld [vmem:[#allocation19_spill] sm:$0xff] }
 0x24c   :  { %v5083_v14 = vpop.eup %5082 }
 0x24d   :  { %v5085_v50 = vpop.eup %5084  ;;  %v1080_v27 = vadd.f32 1.0, %v5083_v14  ;;  %v6901_v14 = vld [vmem:[#allocation20_spill] sm:$0xff] }
 0x24e   :  { %v1084_v17 = vadd.f32 1.0, %v5085_v50  ;;  %v5087_v54 = vpop.eup %5086  ;;  %v6902_v50 = vld [vmem:[#allocation21_spill] sm:$0xff] }
 0x24f   :  { %v1081_v52 = vmul.f32 0.5, %v1080_v27  ;;  %v5089_v10 = vpop.eup %5088  ;;  %v6903_v27 = vld [vmem:[#allocation22_spill] sm:$0xff] }
 0x250   :  { %v1085_v15 = vmul.f32 0.5, %v1084_v17  ;;  %v1089_v45 = vadd.f32 1.0, %v5089_v10  ;;  %v6904_v17 = vld [vmem:[#allocation23_spill] sm:$0xff]  ;;  %v6909_v10 = vld [vmem:[#allocation28_spill] sm:$0xff] }
 0x251   :  { %v1092_v5 = vmul.f32 %v5087_v54, %v1081_v52  ;;  %v6897_v54 = vld [vmem:[#allocation16_spill] sm:$0xff] }
 0x252   :  { %v1091_v22 = vmul.f32 %v1085_v15, %v5756_v42  ;;  %v1090_v21 = vmul.f32 0.5, %v1089_v45  ;;  %v6896_v42 = vld [vmem:[#allocation15_spill] sm:$0xff]  ;;  %v6905_v52 = vld [vmem:[#allocation24_spill] sm:$0xff]  ;;  %v6906_v15 = vld [vmem:[#allocation25_spill] sm:$0xff] }
 0x253   :  { %v6910_v45 = vld [vmem:[#allocation29_spill] sm:$0xff] }
 0x254   :  { %v5888_v56 = vadd.f32 %v1092_v5, %v1091_v22  ;;  %v6907_v5 = vld [vmem:[#allocation26_spill] sm:$0xff]  ;;  %v6908_v22 = vld [vmem:[#allocation27_spill] sm:$0xff] }
 0x256   :  { %5090 = vtanh.f32 %v5888_v56 }
 0x260   :  { %v5091_v31 = vpop.eup %5090 }
 0x261   :  { %v1095_v1 = vmul.f32 %v5091_v31, %v1090_v21  ;;  %v6911_v21 = vld [vmem:[#allocation30_spill] sm:$0xff]  ;;  %v6912_v31 = vld [vmem:[#allocation31_spill] sm:$0xff] }
 0x263   :  { %1161 = vmatmul.mubr.f32.vlgmr.msra.gmra.mrb[18].mxu0 %v1095_v1  ;;  %1232 = vmatmul.mubr.f32.vlgmr.msra.gmra.mrb[18].mxu1 %v1095_v1 }
 0x264   :  { %3818 = vmatpush1.bf16.msra.mxu0 %v5384_v23  ;;  %3850 = vmatpush1.bf16.msra.mxu1 %v5387_v26 }
 0x265   :  { %3820 = vmatprep.subr.bf16.mxu0 %v5391_v30  ;;  %3852 = vmatprep.subr.bf16.mxu1 %v5398_v35 }
 0x266   :  { %1327 = vmatprep.mubr.f32.mxu0 %v6833_v0  ;;  %1398 = vmatprep.mubr.f32.mxu1 %v6833_v0 }
 0x268   :  { %3822 = vmatpush1.bf16.msra.mxu0 %v5400_v36  ;;  %3854 = vmatpush1.bf16.msra.mxu1 %v5404_v39 }
 0x269   :  { %3824 = vmatprep.subr.bf16.mxu0 %v5408_v43  ;;  %3856 = vmatprep.subr.bf16.mxu1 %v5415_v48 }
 0x26c   :  { %3826 = vmatpush1.bf16.msra.mxu0 %v5419_v51  ;;  %3858 = vmatpush1.bf16.msra.mxu1 %v5423_v55 }
 0x26d   :  { %3828 = vmatprep.subr.bf16.mxu0 %v5427_v59  ;;  %3860 = vmatprep.subr.bf16.mxu1 %v5431_v62 }
 0x270   :  { %3830 = vmatpush1.bf16.msra.mxu0 %v5438_v3  ;;  %3862 = vmatpush1.bf16.msra.mxu1 %v5442_v6 }
 0x271   :  { %3832 = vmatprep.subr.bf16.mxu0 %v5446_v9  ;;  %3864 = vmatprep.subr.bf16.mxu1 %v5450_v12 }
 0x274   :  { %3834 = vmatpush1.bf16.msra.mxu0 %v5457_v16  ;;  %3866 = vmatpush1.bf16.msra.mxu1 %v5461_v20 }
 0x275   :  { %3836 = vmatprep.subr.bf16.mxu0 %v5465_v25  ;;  %3868 = vmatprep.subr.bf16.mxu1 %v5469_v29 }
 0x278   :  { %3838 = vmatpush1.bf16.msra.mxu0 %v5476_v34  ;;  %3870 = vmatpush1.bf16.msra.mxu1 %v5480_v40 }
 0x279   :  { %3840 = vmatprep.subr.bf16.mxu0 %v5484_v44  ;;  %3872 = vmatprep.subr.bf16.mxu1 %v5488_v47 }
 0x27c   :  { %3842 = vmatpush1.bf16.msra.mxu0 %v5495_v53  ;;  %3874 = vmatpush1.bf16.msra.mxu1 %v5499_v57 }
 0x27d   :  { %3844 = vmatprep.subr.bf16.mxu0 %v5503_v61  ;;  %3876 = vmatprep.subr.bf16.mxu1 %v5507_v2 }
 0x280   :  { %3846 = vmatpush1.bf16.msra.mxu0 %v5514_v8  ;;  %3878 = vmatpush1.bf16.msra.mxu1 %v5518_v13 }
 0x281   :  { %3880 = vmatprep.subr.bf16.mxu0 %v5522_v19  ;;  %3944 = vmatprep.subr.bf16.mxu1 %v5526_v28 }
 0x283   :  { %1328 = vmatmul.mubr.f32.vlgmr.msra.gmra.mrb[4].mxu0 %v1095_v1  ;;  %1399 = vmatmul.mubr.f32.vlgmr.msra.gmra.mrb[4].mxu1 %v1095_v1  ;;  %v6913_v1 = vld [vmem:[#allocation32_spill] sm:$0xff] }
 0x284   :  { %3882 = vmatpush1.bf16.msra.mxu0 %v5530_v33  ;;  %3946 = vmatpush1.bf16.msra.mxu1 %v5534_v37 }
 0x285   :  { %3884 = vmatprep.subr.bf16.mxu0 %v5536_v38  ;;  %3948 = vmatprep.subr.bf16.mxu1 %v5540_v46 }
 0x288   :  { %3886 = vmatpush1.bf16.msra.mxu0 %v5546_v58  ;;  %3950 = vmatpush1.bf16.msra.mxu1 %v5550_v60 }
 0x289   :  { %3888 = vmatprep.subr.bf16.mxu0 %v5552_v63  ;;  %3952 = vmatprep.subr.bf16.mxu1 %v5555_v7 }
 0x28c   :  { %3890 = vmatpush1.bf16.msra.mxu0 %v6896_v42  ;;  %3954 = vmatpush1.bf16.msra.mxu1 %v6897_v54 }
 0x28d   :  { %3892 = vmatprep.subr.bf16.mxu0 %v6898_v49  ;;  %3956 = vmatprep.subr.bf16.mxu1 %v6899_v41 }
 0x290   :  { %3894 = vmatpush1.bf16.msra.mxu0 %v6900_v4  ;;  %3958 = vmatpush1.bf16.msra.mxu1 %v6901_v14  ;;  %v6953_v4 = vld [vmem:[#allocation72_spill] sm:$0xff] }
 0x291   :  { %3896 = vmatprep.subr.bf16.mxu0 %v6902_v50  ;;  %3960 = vmatprep.subr.bf16.mxu1 %v6903_v27  ;;  %v6914_v27 = vld [vmem:[#allocation33_spill] sm:$0xff]  ;;  %v6952_v50 = vld [vmem:[#allocation71_spill] sm:$0xff] }
 0x294   :  { %3898 = vmatpush1.bf16.msra.mxu0 %v6904_v17  ;;  %3962 = vmatpush1.bf16.msra.mxu1 %v6905_v52  ;;  %v6915_v17 = vld [vmem:[#allocation34_spill] sm:$0xff]  ;;  %v6916_v52 = vld [vmem:[#allocation35_spill] sm:$0xff] }
 0x295   :  { %3900 = vmatprep.subr.bf16.mxu0 %v6906_v15  ;;  %3964 = vmatprep.subr.bf16.mxu1 %v6907_v5  ;;  %v6917_v15 = vld [vmem:[#allocation36_spill] sm:$0xff]  ;;  %v6918_v5 = vld [vmem:[#allocation37_spill] sm:$0xff] }
 0x298   :  { %3902 = vmatpush1.bf16.msra.mxu0 %v6908_v22  ;;  %3966 = vmatpush1.bf16.msra.mxu1 %v6909_v10  ;;  %v6919_v22 = vld [vmem:[#allocation38_spill] sm:$0xff]  ;;  %v6920_v10 = vld [vmem:[#allocation39_spill] sm:$0xff] }
 0x299   :  { %3904 = vmatprep.subr.bf16.mxu0 %v6910_v45  ;;  %3968 = vmatprep.subr.bf16.mxu1 %v6911_v21  ;;  %v6921_v45 = vld [vmem:[#allocation40_spill] sm:$0xff]  ;;  %v6922_v21 = vld [vmem:[#allocation41_spill] sm:$0xff] }
 0x29c   :  { %3906 = vmatpush1.bf16.msra.mxu0 %v6912_v31  ;;  %3970 = vmatpush1.bf16.msra.mxu1 %v6913_v1  ;;  %v6923_v31 = vld [vmem:[#allocation42_spill] sm:$0xff]  ;;  %v6924_v1 = vld [vmem:[#allocation43_spill] sm:$0xff] }
 0x29d   :  { %3908 = vmatprep.subr.bf16.mxu0 %v6914_v27  ;;  %3972 = vmatprep.subr.bf16.mxu1 %v6915_v17  ;;  %v6925_v27 = vld [vmem:[#allocation44_spill] sm:$0xff]  ;;  %v6926_v17 = vld [vmem:[#allocation45_spill] sm:$0xff] }
 0x2a0   :  { %3910 = vmatpush1.bf16.msra.mxu0 %v6916_v52  ;;  %3974 = vmatpush1.bf16.msra.mxu1 %v6917_v15  ;;  %v6927_v52 = vld [vmem:[#allocation46_spill] sm:$0xff]  ;;  %v6928_v15 = vld [vmem:[#allocation47_spill] sm:$0xff] }
 0x2a1   :  { %3912 = vmatprep.subr.bf16.mxu0 %v6918_v5  ;;  %3976 = vmatprep.subr.bf16.mxu1 %v6919_v22  ;;  %v6929_v5 = vld [vmem:[#allocation48_spill] sm:$0xff]  ;;  %v6930_v22 = vld [vmem:[#allocation49_spill] sm:$0xff] }
 0x2a4   :  { %3914 = vmatpush1.bf16.msra.mxu0 %v6920_v10  ;;  %3978 = vmatpush1.bf16.msra.mxu1 %v6921_v45  ;;  %v6931_v10 = vld [vmem:[#allocation50_spill] sm:$0xff]  ;;  %v6932_v45 = vld [vmem:[#allocation51_spill] sm:$0xff] }
 0x2a5   :  { %3916 = vmatprep.subr.bf16.mxu0 %v6922_v21  ;;  %3980 = vmatprep.subr.bf16.mxu1 %v6923_v31  ;;  %v6933_v21 = vld [vmem:[#allocation52_spill] sm:$0xff]  ;;  %v6934_v31 = vld [vmem:[#allocation53_spill] sm:$0xff] }
 0x2a8   :  { %3918 = vmatpush1.bf16.msra.mxu0 %v6924_v1  ;;  %3982 = vmatpush1.bf16.msra.mxu1 %v6925_v27  ;;  %v6935_v1 = vld [vmem:[#allocation54_spill] sm:$0xff]  ;;  %v6936_v27 = vld [vmem:[#allocation55_spill] sm:$0xff] }
 0x2a9   :  { %3920 = vmatprep.subr.bf16.mxu0 %v6926_v17  ;;  %3984 = vmatprep.subr.bf16.mxu1 %v6927_v52  ;;  %v6937_v17 = vld [vmem:[#allocation56_spill] sm:$0xff]  ;;  %v6938_v52 = vld [vmem:[#allocation57_spill] sm:$0xff] }
 0x2ac   :  { %3922 = vmatpush1.bf16.msra.mxu0 %v6928_v15  ;;  %3986 = vmatpush1.bf16.msra.mxu1 %v6929_v5  ;;  %v6939_v15 = vld [vmem:[#allocation58_spill] sm:$0xff]  ;;  %v6940_v5 = vld [vmem:[#allocation59_spill] sm:$0xff] }
 0x2ad   :  { %3924 = vmatprep.subr.bf16.mxu0 %v6930_v22  ;;  %3988 = vmatprep.subr.bf16.mxu1 %v6931_v10  ;;  %v6941_v22 = vld [vmem:[#allocation60_spill] sm:$0xff]  ;;  %v6942_v10 = vld [vmem:[#allocation61_spill] sm:$0xff] }
 0x2b0   :  { %3926 = vmatpush1.bf16.msra.mxu0 %v6932_v45  ;;  %3990 = vmatpush1.bf16.msra.mxu1 %v6933_v21  ;;  %v6943_v45 = vld [vmem:[#allocation62_spill] sm:$0xff]  ;;  %v6944_v21 = vld [vmem:[#allocation63_spill] sm:$0xff] }
 0x2b1   :  { %3928 = vmatprep.subr.bf16.mxu0 %v6934_v31  ;;  %3992 = vmatprep.subr.bf16.mxu1 %v6935_v1  ;;  %v6945_v31 = vld [vmem:[#allocation64_spill] sm:$0xff]  ;;  %v6946_v1 = vld [vmem:[#allocation65_spill] sm:$0xff] }
 0x2b4   :  { %3930 = vmatpush1.bf16.msra.mxu0 %v6936_v27  ;;  %3994 = vmatpush1.bf16.msra.mxu1 %v6937_v17  ;;  %v6947_v27 = vld [vmem:[#allocation66_spill] sm:$0xff]  ;;  %v6948_v17 = vld [vmem:[#allocation67_spill] sm:$0xff] }
 0x2b5   :  { %3932 = vmatprep.subr.bf16.mxu0 %v6938_v52  ;;  %3996 = vmatprep.subr.bf16.mxu1 %v6939_v15  ;;  %v6949_v52 = vld [vmem:[#allocation68_spill] sm:$0xff]  ;;  %v6950_v15 = vld [vmem:[#allocation10_spill] sm:$0xff] }
 0x2b8   :  { %3934 = vmatpush1.bf16.msra.mxu0 %v6940_v5  ;;  %3998 = vmatpush1.bf16.msra.mxu1 %v6941_v22  ;;  %v6951_v5 = vld [vmem:[#allocation11_spill] sm:$0xff] }
 0x2b9   :  { %3936 = vmatprep.subr.bf16.mxu0 %v6942_v10  ;;  %4000 = vmatprep.subr.bf16.mxu1 %v6943_v45 }
 0x2bc   :  { %3938 = vmatpush1.bf16.msra.mxu0 %v6944_v21  ;;  %4002 = vmatpush1.bf16.msra.mxu1 %v6945_v31 }
 0x2bd   :  { %3940 = vmatprep.subr.bf16.mxu0 %v6946_v1  ;;  %4004 = vmatprep.subr.bf16.mxu1 %v6947_v27  ;;  %v6954_v27 = vld [vmem:[#allocation73_spill] sm:$0xff] }
 0x2c0   :  { %3942 = vmatpush1.bf16.msra.mxu0 %v6948_v17  ;;  %4006 = vmatpush1.bf16.msra.mxu1 %v6949_v52  ;;  %v6955_v52 = vld [vmem:[#allocation74_spill] sm:$0xff] }
 0x2c1   :  { %4008 = vmatprep.subr.bf16.mxu0 %v6950_v15  ;;  %4040 = vmatprep.subr.bf16.mxu1 %v6951_v5 }
 0x336   :  { %v1162_v22 = vpop.f32.mrb[18].mxu0  ;;  %v1233_v10 = vpop.f32.mrb[18].mxu1 }
 0x337   :  { %v1163_v45 = vadd.f32 %v1162_v22, %v6952_v50  ;;  %v1164_v14 = vpop.f32.mrb[19].mxu0  ;;  %v1235_v21 = vpop.f32.mrb[19].mxu1  ;;  %v1234_v49 = vadd.f32 %v1233_v10, %v6954_v27 }
 0x338   :  { %v1165_v31 = vadd.f32 %v1164_v14, %v6953_v4  ;;  %v1236_v17 = vadd.f32 %v1235_v21, %v6955_v52 }
 0x339   :  { %v1238_v41 = vmul.f32 0.5, %v1163_v45 }
 0x33a   :  { %v1242_v1 = vmul.f32 0.5, %v1165_v31  ;;  %v1247_v15 = vmul.f32 0.5, %v1236_v17 }
 0x33b   :  { %5092 = vtanh.f32 %v1238_v41 }
 0x33c   :  { %5094 = vtanh.f32 %v1242_v1 }
 0x33d   :  { %5096 = vtanh.f32 %v1234_v49 }
 0x33e   :  { %5098 = vtanh.f32 %v1247_v15  ;;  %v6956_v15 = vld [vmem:[#allocation70_spill] sm:$0xff] }
 0x345   :  { %v5093_v54 = vpop.eup %5092 }
 0x346   :  { %v5095_v5 = vpop.eup %5094  ;;  %v1240_v42 = vadd.f32 1.0, %v5093_v54 }
 0x347   :  { %v1244_v7 = vadd.f32 1.0, %v5095_v5  ;;  %v5097_v50 = vpop.eup %5096 }
 0x348   :  { %v1241_v22 = vmul.f32 0.5, %v1240_v42  ;;  %v5099_v41 = vpop.eup %5098 }
 0x349   :  { %v1245_v63 = vmul.f32 0.5, %v1244_v7  ;;  %v1249_v49 = vadd.f32 1.0, %v5099_v41 }
 0x34a   :  { %v1252_v60 = vmul.f32 %v5097_v50, %v1241_v22 }
 0x34b   :  { %v1251_v14 = vmul.f32 %v1245_v63, %v5880_v24  ;;  %v1250_v5 = vmul.f32 0.5, %v1249_v49 }
 0x34d   :  { %v5994_v45 = vadd.f32 %v1252_v60, %v1251_v14 }
 0x34f   :  { %5100 = vtanh.f32 %v5994_v45 }
 0x356   :  { %v1329_v10 = vpop.f32.mrb[4].mxu0  ;;  %v1400_v21 = vpop.f32.mrb[4].mxu1 }
 0x357   :  { %v4995_v17 = vadd.f32 %v1329_v10, %v6894_v32  ;;  %v1331_v31 = vpop.f32.mrb[5].mxu0  ;;  %v1402_v54 = vpop.f32.mrb[5].mxu1  ;;  %v5011_v60 = vadd.f32 %v1400_v21, %v5746_v18 }
 0x358   :  { %v4996_v42 = vadd.f32 %v1331_v31, %v6956_v15  ;;  %v5012_v63 = vadd.f32 %v1402_v54, %v5753_v11 }
 0x359   :  { %v5101_v1 = vpop.eup %5100  ;;  %v1409_v7 = vmul.f32 0.5, %v4995_v17 }
 0x35a   :  { %v1413_v50 = vmul.f32 0.5, %v4996_v42  ;;  %v1255_v22 = vmul.f32 %v5101_v1, %v1250_v5  ;;  %v1418_v24 = vmul.f32 0.5, %v5012_v63  ;;  %v6960_v63 = vld [vmem:[#allocation15_spill] sm:$0xff] }
 0x35b   :  { %5102 = vtanh.f32 %v1409_v7 }
 0x35c   :  { %5104 = vtanh.f32 %v1413_v50  ;;  %1491 = vmatprep.mubr.f32.mxu0 %v1255_v22  ;;  %1562 = vmatprep.mubr.f32.mxu1 %v1255_v22 }
 0x35d   :  { %5106 = vtanh.f32 %v5011_v60  ;;  %v6959_v60 = vld [vmem:[#allocation14_spill] sm:$0xff] }
 0x35e   :  { %5108 = vtanh.f32 %v1418_v24  ;;  %v6961_v24 = vld [vmem:[#allocation16_spill] sm:$0xff] }
 0x365   :  { %v5103_v14 = vpop.eup %5102 }
 0x366   :  { %v5105_v41 = vpop.eup %5104  ;;  %v1411_v10 = vadd.f32 1.0, %v5103_v14  ;;  %v6962_v14 = vld [vmem:[#allocation17_spill] sm:$0xff] }
 0x367   :  { %v1415_v49 = vadd.f32 1.0, %v5105_v41  ;;  %v5107_v15 = vpop.eup %5106  ;;  %v6963_v41 = vld [vmem:[#allocation18_spill] sm:$0xff] }
 0x368   :  { %v1412_v31 = vmul.f32 0.5, %v1411_v10  ;;  %v5109_v21 = vpop.eup %5108  ;;  %v6964_v10 = vld [vmem:[#allocation19_spill] sm:$0xff] }
 0x369   :  { %v1416_v17 = vmul.f32 0.5, %v1415_v49  ;;  %v1420_v7 = vadd.f32 1.0, %v5109_v21  ;;  %v6965_v49 = vld [vmem:[#allocation20_spill] sm:$0xff]  ;;  %v6970_v21 = vld [vmem:[#allocation25_spill] sm:$0xff] }
 0x36a   :  { %v1423_v42 = vmul.f32 %v5107_v15, %v1412_v31  ;;  %v6958_v15 = vld [vmem:[#allocation13_spill] sm:$0xff] }
 0x36b   :  { %v1422_v5 = vmul.f32 %v1416_v17, %v5888_v56  ;;  %v1421_v50 = vmul.f32 0.5, %v1420_v7  ;;  %v6957_v56 = vld [vmem:[#allocation12_spill] sm:$0xff]  ;;  %v6966_v31 = vld [vmem:[#allocation21_spill] sm:$0xff]  ;;  %v6967_v17 = vld [vmem:[#allocation22_spill] sm:$0xff] }
 0x36c   :  { %v6971_v7 = vld [vmem:[#allocation26_spill] sm:$0xff] }
 0x36d   :  { %v6002_v1 = vadd.f32 %v1423_v42, %v1422_v5  ;;  %v6968_v42 = vld [vmem:[#allocation23_spill] sm:$0xff]  ;;  %v6969_v5 = vld [vmem:[#allocation24_spill] sm:$0xff] }
 0x36f   :  { %5110 = vtanh.f32 %v6002_v1 }
 0x379   :  { %v5111_v54 = vpop.eup %5110 }
 0x37a   :  { %v1426_v22 = vmul.f32 %v5111_v54, %v1421_v50  ;;  %v6972_v50 = vld [vmem:[#allocation27_spill] sm:$0xff]  ;;  %v6973_v54 = vld [vmem:[#allocation28_spill] sm:$0xff] }
 0x37c   :  { %1492 = vmatmul.mubr.f32.vlgmr.msra.gmra.mrb[20].mxu0 %v1426_v22  ;;  %1563 = vmatmul.mubr.f32.vlgmr.msra.gmra.mrb[20].mxu1 %v1426_v22 }
 0x37d   :  { %4010 = vmatpush1.bf16.msra.mxu0 %v5384_v23  ;;  %4042 = vmatpush1.bf16.msra.mxu1 %v5387_v26 }
 0x37e   :  { %4012 = vmatprep.subr.bf16.mxu0 %v5391_v30  ;;  %4044 = vmatprep.subr.bf16.mxu1 %v5398_v35 }
 0x37f   :  { %1658 = vmatprep.mubr.f32.mxu0 %v6833_v0  ;;  %1729 = vmatprep.mubr.f32.mxu1 %v6833_v0 }
 0x381   :  { %4014 = vmatpush1.bf16.msra.mxu0 %v5400_v36  ;;  %4046 = vmatpush1.bf16.msra.mxu1 %v5404_v39 }
 0x382   :  { %4016 = vmatprep.subr.bf16.mxu0 %v5408_v43  ;;  %4048 = vmatprep.subr.bf16.mxu1 %v5415_v48 }
 0x385   :  { %4018 = vmatpush1.bf16.msra.mxu0 %v5419_v51  ;;  %4050 = vmatpush1.bf16.msra.mxu1 %v5423_v55 }
 0x386   :  { %4020 = vmatprep.subr.bf16.mxu0 %v5427_v59  ;;  %4052 = vmatprep.subr.bf16.mxu1 %v5431_v62 }
 0x389   :  { %4022 = vmatpush1.bf16.msra.mxu0 %v5438_v3  ;;  %4054 = vmatpush1.bf16.msra.mxu1 %v5442_v6 }
 0x38a   :  { %4024 = vmatprep.subr.bf16.mxu0 %v5446_v9  ;;  %4056 = vmatprep.subr.bf16.mxu1 %v5450_v12 }
 0x38d   :  { %4026 = vmatpush1.bf16.msra.mxu0 %v5457_v16  ;;  %4058 = vmatpush1.bf16.msra.mxu1 %v5461_v20 }
 0x38e   :  { %4028 = vmatprep.subr.bf16.mxu0 %v5465_v25  ;;  %4060 = vmatprep.subr.bf16.mxu1 %v5469_v29 }
 0x391   :  { %4030 = vmatpush1.bf16.msra.mxu0 %v5476_v34  ;;  %4062 = vmatpush1.bf16.msra.mxu1 %v5480_v40 }
 0x392   :  { %4032 = vmatprep.subr.bf16.mxu0 %v5484_v44  ;;  %4064 = vmatprep.subr.bf16.mxu1 %v5488_v47 }
 0x395   :  { %4034 = vmatpush1.bf16.msra.mxu0 %v5495_v53  ;;  %4066 = vmatpush1.bf16.msra.mxu1 %v5499_v57 }
 0x396   :  { %4036 = vmatprep.subr.bf16.mxu0 %v5503_v61  ;;  %4068 = vmatprep.subr.bf16.mxu1 %v5507_v2 }
 0x399   :  { %4038 = vmatpush1.bf16.msra.mxu0 %v5514_v8  ;;  %4070 = vmatpush1.bf16.msra.mxu1 %v5518_v13 }
 0x39a   :  { %4072 = vmatprep.subr.bf16.mxu0 %v5522_v19  ;;  %4136 = vmatprep.subr.bf16.mxu1 %v5526_v28 }
 0x39c   :  { %1659 = vmatmul.mubr.f32.vlgmr.msra.gmra.mrb[6].mxu0 %v1426_v22  ;;  %1730 = vmatmul.mubr.f32.vlgmr.msra.gmra.mrb[6].mxu1 %v1426_v22  ;;  %v6974_v22 = vld [vmem:[#allocation29_spill] sm:$0xff] }
 0x39d   :  { %4074 = vmatpush1.bf16.msra.mxu0 %v5530_v33  ;;  %4138 = vmatpush1.bf16.msra.mxu1 %v5534_v37 }
 0x39e   :  { %4076 = vmatprep.subr.bf16.mxu0 %v5536_v38  ;;  %4140 = vmatprep.subr.bf16.mxu1 %v5540_v46 }
 0x3a1   :  { %4078 = vmatpush1.bf16.msra.mxu0 %v5546_v58  ;;  %4142 = vmatpush1.bf16.msra.mxu1 %v6957_v56 }
 0x3a2   :  { %4080 = vmatprep.subr.bf16.mxu0 %v6958_v15  ;;  %4144 = vmatprep.subr.bf16.mxu1 %v6959_v60 }
 0x3a5   :  { %4082 = vmatpush1.bf16.msra.mxu0 %v6960_v63  ;;  %4146 = vmatpush1.bf16.msra.mxu1 %v6961_v24 }
 0x3a6   :  { %4084 = vmatprep.subr.bf16.mxu0 %v6962_v14  ;;  %4148 = vmatprep.subr.bf16.mxu1 %v6963_v41  ;;  %v7016_v41 = vld [vmem:[#allocation71_spill] sm:$0xff] }
 0x3a9   :  { %4086 = vmatpush1.bf16.msra.mxu0 %v6964_v10  ;;  %4150 = vmatpush1.bf16.msra.mxu1 %v6965_v49  ;;  %v6975_v10 = vld [vmem:[#allocation30_spill] sm:$0xff]  ;;  %v6976_v49 = vld [vmem:[#allocation31_spill] sm:$0xff] }
 0x3aa   :  { %4088 = vmatprep.subr.bf16.mxu0 %v6966_v31  ;;  %4152 = vmatprep.subr.bf16.mxu1 %v6967_v17  ;;  %v6977_v31 = vld [vmem:[#allocation32_spill] sm:$0xff]  ;;  %v6978_v17 = vld [vmem:[#allocation33_spill] sm:$0xff] }
 0x3ad   :  { %4090 = vmatpush1.bf16.msra.mxu0 %v6968_v42  ;;  %4154 = vmatpush1.bf16.msra.mxu1 %v6969_v5  ;;  %v6979_v42 = vld [vmem:[#allocation34_spill] sm:$0xff]  ;;  %v6980_v5 = vld [vmem:[#allocation35_spill] sm:$0xff] }
 0x3ae   :  { %4092 = vmatprep.subr.bf16.mxu0 %v6970_v21  ;;  %4156 = vmatprep.subr.bf16.mxu1 %v6971_v7  ;;  %v6981_v21 = vld [vmem:[#allocation36_spill] sm:$0xff]  ;;  %v6982_v7 = vld [vmem:[#allocation37_spill] sm:$0xff] }
 0x3b1   :  { %4094 = vmatpush1.bf16.msra.mxu0 %v6972_v50  ;;  %4158 = vmatpush1.bf16.msra.mxu1 %v6973_v54  ;;  %v6983_v50 = vld [vmem:[#allocation38_spill] sm:$0xff]  ;;  %v6984_v54 = vld [vmem:[#allocation39_spill] sm:$0xff] }
 0x3b2   :  { %4096 = vmatprep.subr.bf16.mxu0 %v6974_v22  ;;  %4160 = vmatprep.subr.bf16.mxu1 %v6975_v10  ;;  %v6985_v22 = vld [vmem:[#allocation40_spill] sm:$0xff]  ;;  %v6986_v10 = vld [vmem:[#allocation41_spill] sm:$0xff] }
 0x3b5   :  { %4098 = vmatpush1.bf16.msra.mxu0 %v6976_v49  ;;  %4162 = vmatpush1.bf16.msra.mxu1 %v6977_v31  ;;  %v6987_v49 = vld [vmem:[#allocation42_spill] sm:$0xff]  ;;  %v6988_v31 = vld [vmem:[#allocation43_spill] sm:$0xff] }
 0x3b6   :  { %4100 = vmatprep.subr.bf16.mxu0 %v6978_v17  ;;  %4164 = vmatprep.subr.bf16.mxu1 %v6979_v42  ;;  %v6989_v17 = vld [vmem:[#allocation44_spill] sm:$0xff]  ;;  %v6990_v42 = vld [vmem:[#allocation45_spill] sm:$0xff] }
 0x3b9   :  { %4102 = vmatpush1.bf16.msra.mxu0 %v6980_v5  ;;  %4166 = vmatpush1.bf16.msra.mxu1 %v6981_v21  ;;  %v6991_v5 = vld [vmem:[#allocation46_spill] sm:$0xff]  ;;  %v6992_v21 = vld [vmem:[#allocation47_spill] sm:$0xff] }
 0x3ba   :  { %4104 = vmatprep.subr.bf16.mxu0 %v6982_v7  ;;  %4168 = vmatprep.subr.bf16.mxu1 %v6983_v50  ;;  %v6993_v7 = vld [vmem:[#allocation48_spill] sm:$0xff]  ;;  %v6994_v50 = vld [vmem:[#allocation49_spill] sm:$0xff] }
 0x3bd   :  { %4106 = vmatpush1.bf16.msra.mxu0 %v6984_v54  ;;  %4170 = vmatpush1.bf16.msra.mxu1 %v6985_v22  ;;  %v6995_v54 = vld [vmem:[#allocation50_spill] sm:$0xff]  ;;  %v6996_v22 = vld [vmem:[#allocation51_spill] sm:$0xff] }
 0x3be   :  { %4108 = vmatprep.subr.bf16.mxu0 %v6986_v10  ;;  %4172 = vmatprep.subr.bf16.mxu1 %v6987_v49  ;;  %v6997_v10 = vld [vmem:[#allocation52_spill] sm:$0xff]  ;;  %v6998_v49 = vld [vmem:[#allocation53_spill] sm:$0xff] }
 0x3c1   :  { %4110 = vmatpush1.bf16.msra.mxu0 %v6988_v31  ;;  %4174 = vmatpush1.bf16.msra.mxu1 %v6989_v17  ;;  %v6999_v31 = vld [vmem:[#allocation54_spill] sm:$0xff]  ;;  %v7000_v17 = vld [vmem:[#allocation55_spill] sm:$0xff] }
 0x3c2   :  { %4112 = vmatprep.subr.bf16.mxu0 %v6990_v42  ;;  %4176 = vmatprep.subr.bf16.mxu1 %v6991_v5  ;;  %v7001_v42 = vld [vmem:[#allocation56_spill] sm:$0xff]  ;;  %v7002_v5 = vld [vmem:[#allocation57_spill] sm:$0xff] }
 0x3c5   :  { %4114 = vmatpush1.bf16.msra.mxu0 %v6992_v21  ;;  %4178 = vmatpush1.bf16.msra.mxu1 %v6993_v7  ;;  %v7003_v21 = vld [vmem:[#allocation58_spill] sm:$0xff]  ;;  %v7004_v7 = vld [vmem:[#allocation59_spill] sm:$0xff] }
 0x3c6   :  { %4116 = vmatprep.subr.bf16.mxu0 %v6994_v50  ;;  %4180 = vmatprep.subr.bf16.mxu1 %v6995_v54  ;;  %v7005_v50 = vld [vmem:[#allocation60_spill] sm:$0xff]  ;;  %v7006_v54 = vld [vmem:[#allocation61_spill] sm:$0xff] }
 0x3c9   :  { %4118 = vmatpush1.bf16.msra.mxu0 %v6996_v22  ;;  %4182 = vmatpush1.bf16.msra.mxu1 %v6997_v10  ;;  %v7007_v22 = vld [vmem:[#allocation62_spill] sm:$0xff]  ;;  %v7008_v10 = vld [vmem:[#allocation63_spill] sm:$0xff] }
 0x3ca   :  { %4120 = vmatprep.subr.bf16.mxu0 %v6998_v49  ;;  %4184 = vmatprep.subr.bf16.mxu1 %v6999_v31  ;;  %v7009_v49 = vld [vmem:[#allocation64_spill] sm:$0xff]  ;;  %v7010_v31 = vld [vmem:[#allocation65_spill] sm:$0xff] }
 0x3cd   :  { %4122 = vmatpush1.bf16.msra.mxu0 %v7000_v17  ;;  %4186 = vmatpush1.bf16.msra.mxu1 %v7001_v42  ;;  %v7011_v17 = vld [vmem:[#allocation66_spill] sm:$0xff]  ;;  %v7012_v42 = vld [vmem:[#allocation67_spill] sm:$0xff] }
 0x3ce   :  { %4124 = vmatprep.subr.bf16.mxu0 %v7002_v5  ;;  %4188 = vmatprep.subr.bf16.mxu1 %v7003_v21  ;;  %v7013_v5 = vld [vmem:[#allocation68_spill] sm:$0xff]  ;;  %v7014_v21 = vld [vmem:[#allocation10_spill] sm:$0xff] }
 0x3d1   :  { %4126 = vmatpush1.bf16.msra.mxu0 %v7004_v7  ;;  %4190 = vmatpush1.bf16.msra.mxu1 %v7005_v50  ;;  %v7015_v7 = vld [vmem:[#allocation11_spill] sm:$0xff] }
 0x3d2   :  { %4128 = vmatprep.subr.bf16.mxu0 %v7006_v54  ;;  %4192 = vmatprep.subr.bf16.mxu1 %v7007_v22 }
 0x3d5   :  { %4130 = vmatpush1.bf16.msra.mxu0 %v7008_v10  ;;  %4194 = vmatpush1.bf16.msra.mxu1 %v7009_v49 }
 0x3d6   :  { %4132 = vmatprep.subr.bf16.mxu0 %v7010_v31  ;;  %4196 = vmatprep.subr.bf16.mxu1 %v7011_v17 }
 0x3d9   :  { %4134 = vmatpush1.bf16.msra.mxu0 %v7012_v42  ;;  %4198 = vmatpush1.bf16.msra.mxu1 %v7013_v5 }
 0x3da   :  { %4200 = vmatprep.subr.bf16.mxu0 %v7014_v21  ;;  %4232 = vmatprep.subr.bf16.mxu1 %v7015_v7 }
 0x44f   :  { %v1493_v50 = vpop.f32.mrb[20].mxu0  ;;  %v1564_v54 = vpop.f32.mrb[20].mxu1 }
 0x450   :  { %v1494_v22 = vadd.f32 %v1493_v50, %v7016_v41  ;;  %v1495_v14 = vpop.f32.mrb[21].mxu0  ;;  %v1566_v10 = vpop.f32.mrb[21].mxu1  ;;  %v1565_v17 = vadd.f32 %v1564_v54, %v6954_v27 }
 0x451   :  { %v1496_v49 = vadd.f32 %v1495_v14, %v6953_v4  ;;  %v1567_v5 = vadd.f32 %v1566_v10, %v6955_v52 }
 0x452   :  { %v1569_v24 = vmul.f32 0.5, %v1494_v22 }
 0x453   :  { %v1573_v31 = vmul.f32 0.5, %v1496_v49  ;;  %v1578_v21 = vmul.f32 0.5, %v1567_v5 }
 0x454   :  { %5112 = vtanh.f32 %v1569_v24 }
 0x455   :  { %5114 = vtanh.f32 %v1573_v31 }
 0x456   :  { %5116 = vtanh.f32 %v1565_v17 }
 0x457   :  { %5118 = vtanh.f32 %v1578_v21  ;;  %v7017_v21 = vld [vmem:[#allocation70_spill] sm:$0xff] }
 0x45e   :  { %v5113_v42 = vpop.eup %5112 }
 0x45f   :  { %v5115_v7 = vpop.eup %5114  ;;  %v1571_v63 = vadd.f32 1.0, %v5113_v42 }
 0x460   :  { %v1575_v60 = vadd.f32 1.0, %v5115_v7  ;;  %v5117_v41 = vpop.eup %5116 }
 0x461   :  { %v1572_v50 = vmul.f32 0.5, %v1571_v63  ;;  %v5119_v24 = vpop.eup %5118 }
 0x462   :  { %v1576_v15 = vmul.f32 0.5, %v1575_v60  ;;  %v1580_v31 = vadd.f32 1.0, %v5119_v24 }
 0x463   :  { %v1583_v56 = vmul.f32 %v5117_v41, %v1572_v50 }
 0x464   :  { %v1582_v14 = vmul.f32 %v1576_v15, %v5994_v45  ;;  %v1581_v7 = vmul.f32 0.5, %v1580_v31 }
 0x466   :  { %v6108_v49 = vadd.f32 %v1583_v56, %v1582_v14 }
 0x468   :  { %5120 = vtanh.f32 %v6108_v49 }
 0x46f   :  { %v1660_v17 = vpop.f32.mrb[6].mxu0  ;;  %v1731_v10 = vpop.f32.mrb[6].mxu1 }
 0x470   :  { %v4997_v5 = vadd.f32 %v1660_v17, %v6894_v32  ;;  %v1662_v54 = vpop.f32.mrb[7].mxu0  ;;  %v1733_v42 = vpop.f32.mrb[7].mxu1  ;;  %v5013_v45 = vadd.f32 %v1731_v10, %v5746_v18 }
 0x471   :  { %v4998_v63 = vadd.f32 %v1662_v54, %v7017_v21  ;;  %v5014_v56 = vadd.f32 %v1733_v42, %v5753_v11 }
 0x472   :  { %v5121_v22 = vpop.eup %5120  ;;  %v1740_v60 = vmul.f32 0.5, %v4997_v5 }
 0x473   :  { %v1744_v41 = vmul.f32 0.5, %v4998_v63  ;;  %v1586_v50 = vmul.f32 %v5121_v22, %v1581_v7  ;;  %v1749_v15 = vmul.f32 0.5, %v5014_v56  ;;  %v7021_v56 = vld [vmem:[#allocation15_spill] sm:$0xff] }
 0x474   :  { %5122 = vtanh.f32 %v1740_v60 }
 0x475   :  { %5124 = vtanh.f32 %v1744_v41  ;;  %1822 = vmatprep.mubr.f32.mxu0 %v1586_v50  ;;  %1893 = vmatprep.mubr.f32.mxu1 %v1586_v50 }
 0x476   :  { %5126 = vtanh.f32 %v5013_v45  ;;  %v7020_v45 = vld [vmem:[#allocation14_spill] sm:$0xff] }
 0x477   :  { %5128 = vtanh.f32 %v1749_v15  ;;  %v7022_v15 = vld [vmem:[#allocation16_spill] sm:$0xff] }
 0x47e   :  { %v5123_v14 = vpop.eup %5122 }
 0x47f   :  { %v5125_v24 = vpop.eup %5124  ;;  %v1742_v17 = vadd.f32 1.0, %v5123_v14  ;;  %v7023_v14 = vld [vmem:[#allocation17_spill] sm:$0xff] }
 0x480   :  { %v1746_v31 = vadd.f32 1.0, %v5125_v24  ;;  %v5127_v21 = vpop.eup %5126  ;;  %v7024_v24 = vld [vmem:[#allocation18_spill] sm:$0xff] }
 0x481   :  { %v1743_v54 = vmul.f32 0.5, %v1742_v17  ;;  %v5129_v10 = vpop.eup %5128  ;;  %v7025_v17 = vld [vmem:[#allocation19_spill] sm:$0xff] }
 0x482   :  { %v1747_v5 = vmul.f32 0.5, %v1746_v31  ;;  %v1751_v60 = vadd.f32 1.0, %v5129_v10  ;;  %v7026_v31 = vld [vmem:[#allocation20_spill] sm:$0xff]  ;;  %v7031_v10 = vld [vmem:[#allocation25_spill] sm:$0xff] }
 0x483   :  { %v1754_v63 = vmul.f32 %v5127_v21, %v1743_v54  ;;  %v7019_v21 = vld [vmem:[#allocation13_spill] sm:$0xff] }
 0x484   :  { %v1753_v7 = vmul.f32 %v1747_v5, %v6002_v1  ;;  %v1752_v41 = vmul.f32 0.5, %v1751_v60  ;;  %v7018_v1 = vld [vmem:[#allocation12_spill] sm:$0xff]  ;;  %v7027_v54 = vld [vmem:[#allocation21_spill] sm:$0xff]  ;;  %v7028_v5 = vld [vmem:[#allocation22_spill] sm:$0xff] }
 0x485   :  { %v7032_v60 = vld [vmem:[#allocation26_spill] sm:$0xff] }
 0x486   :  { %v6116_v22 = vadd.f32 %v1754_v63, %v1753_v7  ;;  %v7029_v63 = vld [vmem:[#allocation23_spill] sm:$0xff]  ;;  %v7030_v7 = vld [vmem:[#allocation24_spill] sm:$0xff] }
 0x488   :  { %5130 = vtanh.f32 %v6116_v22 }
 0x492   :  { %v5131_v42 = vpop.eup %5130 }
 0x493   :  { %v1757_v50 = vmul.f32 %v5131_v42, %v1752_v41  ;;  %v7033_v41 = vld [vmem:[#allocation27_spill] sm:$0xff]  ;;  %v7034_v42 = vld [vmem:[#allocation28_spill] sm:$0xff] }
 0x495   :  { %1823 = vmatmul.mubr.f32.vlgmr.msra.gmra.mrb[22].mxu0 %v1757_v50  ;;  %1894 = vmatmul.mubr.f32.vlgmr.msra.gmra.mrb[22].mxu1 %v1757_v50 }
 0x496   :  { %4202 = vmatpush1.bf16.msra.mxu0 %v5384_v23  ;;  %4234 = vmatpush1.bf16.msra.mxu1 %v5387_v26 }
 0x497   :  { %4204 = vmatprep.subr.bf16.mxu0 %v5391_v30  ;;  %4236 = vmatprep.subr.bf16.mxu1 %v5398_v35 }
 0x498   :  { %1989 = vmatprep.mubr.f32.mxu0 %v6833_v0  ;;  %2060 = vmatprep.mubr.f32.mxu1 %v6833_v0 }
 0x49a   :  { %4206 = vmatpush1.bf16.msra.mxu0 %v5400_v36  ;;  %4238 = vmatpush1.bf16.msra.mxu1 %v5404_v39 }
 0x49b   :  { %4208 = vmatprep.subr.bf16.mxu0 %v5408_v43  ;;  %4240 = vmatprep.subr.bf16.mxu1 %v5415_v48 }
 0x49e   :  { %4210 = vmatpush1.bf16.msra.mxu0 %v5419_v51  ;;  %4242 = vmatpush1.bf16.msra.mxu1 %v5423_v55 }
 0x49f   :  { %4212 = vmatprep.subr.bf16.mxu0 %v5427_v59  ;;  %4244 = vmatprep.subr.bf16.mxu1 %v5431_v62 }
 0x4a2   :  { %4214 = vmatpush1.bf16.msra.mxu0 %v5438_v3  ;;  %4246 = vmatpush1.bf16.msra.mxu1 %v5442_v6 }
 0x4a3   :  { %4216 = vmatprep.subr.bf16.mxu0 %v5446_v9  ;;  %4248 = vmatprep.subr.bf16.mxu1 %v5450_v12 }
 0x4a6   :  { %4218 = vmatpush1.bf16.msra.mxu0 %v5457_v16  ;;  %4250 = vmatpush1.bf16.msra.mxu1 %v5461_v20 }
 0x4a7   :  { %4220 = vmatprep.subr.bf16.mxu0 %v5465_v25  ;;  %4252 = vmatprep.subr.bf16.mxu1 %v5469_v29 }
 0x4aa   :  { %4222 = vmatpush1.bf16.msra.mxu0 %v5476_v34  ;;  %4254 = vmatpush1.bf16.msra.mxu1 %v5480_v40 }
 0x4ab   :  { %4224 = vmatprep.subr.bf16.mxu0 %v5484_v44  ;;  %4256 = vmatprep.subr.bf16.mxu1 %v5488_v47 }
 0x4ae   :  { %4226 = vmatpush1.bf16.msra.mxu0 %v5495_v53  ;;  %4258 = vmatpush1.bf16.msra.mxu1 %v5499_v57 }
 0x4af   :  { %4228 = vmatprep.subr.bf16.mxu0 %v5503_v61  ;;  %4260 = vmatprep.subr.bf16.mxu1 %v5507_v2 }
 0x4b2   :  { %4230 = vmatpush1.bf16.msra.mxu0 %v5514_v8  ;;  %4262 = vmatpush1.bf16.msra.mxu1 %v5518_v13 }
 0x4b3   :  { %4264 = vmatprep.subr.bf16.mxu0 %v5522_v19  ;;  %4328 = vmatprep.subr.bf16.mxu1 %v5526_v28 }
 0x4b5   :  { %1990 = vmatmul.mubr.f32.vlgmr.msra.gmra.mrb[8].mxu0 %v1757_v50  ;;  %2061 = vmatmul.mubr.f32.vlgmr.msra.gmra.mrb[8].mxu1 %v1757_v50  ;;  %v7035_v50 = vld [vmem:[#allocation29_spill] sm:$0xff] }
 0x4b6   :  { %4266 = vmatpush1.bf16.msra.mxu0 %v5530_v33  ;;  %4330 = vmatpush1.bf16.msra.mxu1 %v5534_v37 }
 0x4b7   :  { %4268 = vmatprep.subr.bf16.mxu0 %v5536_v38  ;;  %4332 = vmatprep.subr.bf16.mxu1 %v5540_v46 }
 0x4ba   :  { %4270 = vmatpush1.bf16.msra.mxu0 %v5546_v58  ;;  %4334 = vmatpush1.bf16.msra.mxu1 %v7018_v1 }
 0x4bb   :  { %4272 = vmatprep.subr.bf16.mxu0 %v7019_v21  ;;  %4336 = vmatprep.subr.bf16.mxu1 %v7020_v45 }
 0x4be   :  { %4274 = vmatpush1.bf16.msra.mxu0 %v7021_v56  ;;  %4338 = vmatpush1.bf16.msra.mxu1 %v7022_v15 }
 0x4bf   :  { %4276 = vmatprep.subr.bf16.mxu0 %v7023_v14  ;;  %4340 = vmatprep.subr.bf16.mxu1 %v7024_v24  ;;  %v7077_v24 = vld [vmem:[#allocation71_spill] sm:$0xff] }
 0x4c2   :  { %4278 = vmatpush1.bf16.msra.mxu0 %v7025_v17  ;;  %4342 = vmatpush1.bf16.msra.mxu1 %v7026_v31  ;;  %v7036_v17 = vld [vmem:[#allocation30_spill] sm:$0xff]  ;;  %v7037_v31 = vld [vmem:[#allocation31_spill] sm:$0xff] }
 0x4c3   :  { %4280 = vmatprep.subr.bf16.mxu0 %v7027_v54  ;;  %4344 = vmatprep.subr.bf16.mxu1 %v7028_v5  ;;  %v7038_v54 = vld [vmem:[#allocation32_spill] sm:$0xff]  ;;  %v7039_v5 = vld [vmem:[#allocation33_spill] sm:$0xff] }
 0x4c6   :  { %4282 = vmatpush1.bf16.msra.mxu0 %v7029_v63  ;;  %4346 = vmatpush1.bf16.msra.mxu1 %v7030_v7  ;;  %v7040_v63 = vld [vmem:[#allocation34_spill] sm:$0xff]  ;;  %v7041_v7 = vld [vmem:[#allocation35_spill] sm:$0xff] }
 0x4c7   :  { %4284 = vmatprep.subr.bf16.mxu0 %v7031_v10  ;;  %4348 = vmatprep.subr.bf16.mxu1 %v7032_v60  ;;  %v7042_v10 = vld [vmem:[#allocation36_spill] sm:$0xff]  ;;  %v7043_v60 = vld [vmem:[#allocation37_spill] sm:$0xff] }
 0x4ca   :  { %4286 = vmatpush1.bf16.msra.mxu0 %v7033_v41  ;;  %4350 = vmatpush1.bf16.msra.mxu1 %v7034_v42  ;;  %v7044_v41 = vld [vmem:[#allocation38_spill] sm:$0xff]  ;;  %v7045_v42 = vld [vmem:[#allocation39_spill] sm:$0xff] }
 0x4cb   :  { %4288 = vmatprep.subr.bf16.mxu0 %v7035_v50  ;;  %4352 = vmatprep.subr.bf16.mxu1 %v7036_v17  ;;  %v7046_v50 = vld [vmem:[#allocation40_spill] sm:$0xff]  ;;  %v7047_v17 = vld [vmem:[#allocation41_spill] sm:$0xff] }
 0x4ce   :  { %4290 = vmatpush1.bf16.msra.mxu0 %v7037_v31  ;;  %4354 = vmatpush1.bf16.msra.mxu1 %v7038_v54  ;;  %v7048_v31 = vld [vmem:[#allocation42_spill] sm:$0xff]  ;;  %v7049_v54 = vld [vmem:[#allocation43_spill] sm:$0xff] }
 0x4cf   :  { %4292 = vmatprep.subr.bf16.mxu0 %v7039_v5  ;;  %4356 = vmatprep.subr.bf16.mxu1 %v7040_v63  ;;  %v7050_v5 = vld [vmem:[#allocation44_spill] sm:$0xff]  ;;  %v7051_v63 = vld [vmem:[#allocation45_spill] sm:$0xff] }
 0x4d2   :  { %4294 = vmatpush1.bf16.msra.mxu0 %v7041_v7  ;;  %4358 = vmatpush1.bf16.msra.mxu1 %v7042_v10  ;;  %v7052_v7 = vld [vmem:[#allocation46_spill] sm:$0xff]  ;;  %v7053_v10 = vld [vmem:[#allocation47_spill] sm:$0xff] }
 0x4d3   :  { %4296 = vmatprep.subr.bf16.mxu0 %v7043_v60  ;;  %4360 = vmatprep.subr.bf16.mxu1 %v7044_v41  ;;  %v7054_v60 = vld [vmem:[#allocation48_spill] sm:$0xff]  ;;  %v7055_v41 = vld [vmem:[#allocation49_spill] sm:$0xff] }
 0x4d6   :  { %4298 = vmatpush1.bf16.msra.mxu0 %v7045_v42  ;;  %4362 = vmatpush1.bf16.msra.mxu1 %v7046_v50  ;;  %v7056_v42 = vld [vmem:[#allocation50_spill] sm:$0xff]  ;;  %v7057_v50 = vld [vmem:[#allocation51_spill] sm:$0xff] }
 0x4d7   :  { %4300 = vmatprep.subr.bf16.mxu0 %v7047_v17  ;;  %4364 = vmatprep.subr.bf16.mxu1 %v7048_v31  ;;  %v7058_v17 = vld [vmem:[#allocation52_spill] sm:$0xff]  ;;  %v7059_v31 = vld [vmem:[#allocation53_spill] sm:$0xff] }
 0x4da   :  { %4302 = vmatpush1.bf16.msra.mxu0 %v7049_v54  ;;  %4366 = vmatpush1.bf16.msra.mxu1 %v7050_v5  ;;  %v7060_v54 = vld [vmem:[#allocation54_spill] sm:$0xff]  ;;  %v7061_v5 = vld [vmem:[#allocation55_spill] sm:$0xff] }
 0x4db   :  { %4304 = vmatprep.subr.bf16.mxu0 %v7051_v63  ;;  %4368 = vmatprep.subr.bf16.mxu1 %v7052_v7  ;;  %v7062_v63 = vld [vmem:[#allocation56_spill] sm:$0xff]  ;;  %v7063_v7 = vld [vmem:[#allocation57_spill] sm:$0xff] }
 0x4de   :  { %4306 = vmatpush1.bf16.msra.mxu0 %v7053_v10  ;;  %4370 = vmatpush1.bf16.msra.mxu1 %v7054_v60  ;;  %v7064_v10 = vld [vmem:[#allocation58_spill] sm:$0xff]  ;;  %v7065_v60 = vld [vmem:[#allocation59_spill] sm:$0xff] }
 0x4df   :  { %4308 = vmatprep.subr.bf16.mxu0 %v7055_v41  ;;  %4372 = vmatprep.subr.bf16.mxu1 %v7056_v42  ;;  %v7066_v41 = vld [vmem:[#allocation60_spill] sm:$0xff]  ;;  %v7067_v42 = vld [vmem:[#allocation61_spill] sm:$0xff] }
 0x4e2   :  { %4310 = vmatpush1.bf16.msra.mxu0 %v7057_v50  ;;  %4374 = vmatpush1.bf16.msra.mxu1 %v7058_v17  ;;  %v7068_v50 = vld [vmem:[#allocation62_spill] sm:$0xff]  ;;  %v7069_v17 = vld [vmem:[#allocation63_spill] sm:$0xff] }
 0x4e3   :  { %4312 = vmatprep.subr.bf16.mxu0 %v7059_v31  ;;  %4376 = vmatprep.subr.bf16.mxu1 %v7060_v54  ;;  %v7070_v31 = vld [vmem:[#allocation64_spill] sm:$0xff]  ;;  %v7071_v54 = vld [vmem:[#allocation65_spill] sm:$0xff] }
 0x4e6   :  { %4314 = vmatpush1.bf16.msra.mxu0 %v7061_v5  ;;  %4378 = vmatpush1.bf16.msra.mxu1 %v7062_v63  ;;  %v7072_v5 = vld [vmem:[#allocation66_spill] sm:$0xff]  ;;  %v7073_v63 = vld [vmem:[#allocation67_spill] sm:$0xff] }
 0x4e7   :  { %4316 = vmatprep.subr.bf16.mxu0 %v7063_v7  ;;  %4380 = vmatprep.subr.bf16.mxu1 %v7064_v10  ;;  %v7074_v7 = vld [vmem:[#allocation68_spill] sm:$0xff]  ;;  %v7075_v10 = vld [vmem:[#allocation10_spill] sm:$0xff] }
 0x4ea   :  { %4318 = vmatpush1.bf16.msra.mxu0 %v7065_v60  ;;  %4382 = vmatpush1.bf16.msra.mxu1 %v7066_v41  ;;  %v7076_v60 = vld [vmem:[#allocation11_spill] sm:$0xff] }
 0x4eb   :  { %4320 = vmatprep.subr.bf16.mxu0 %v7067_v42  ;;  %4384 = vmatprep.subr.bf16.mxu1 %v7068_v50 }
 0x4ee   :  { %4322 = vmatpush1.bf16.msra.mxu0 %v7069_v17  ;;  %4386 = vmatpush1.bf16.msra.mxu1 %v7070_v31 }
 0x4ef   :  { %4324 = vmatprep.subr.bf16.mxu0 %v7071_v54  ;;  %4388 = vmatprep.subr.bf16.mxu1 %v7072_v5 }
 0x4f2   :  { %4326 = vmatpush1.bf16.msra.mxu0 %v7073_v63  ;;  %4390 = vmatpush1.bf16.msra.mxu1 %v7074_v7 }
 0x4f3   :  { %4392 = vmatprep.subr.bf16.mxu0 %v7075_v10  ;;  %4424 = vmatprep.subr.bf16.mxu1 %v7076_v60 }
 0x568   :  { %v1824_v41 = vpop.f32.mrb[22].mxu0  ;;  %v1895_v42 = vpop.f32.mrb[22].mxu1 }
 0x569   :  { %v1825_v50 = vadd.f32 %v1824_v41, %v7077_v24  ;;  %v1826_v14 = vpop.f32.mrb[23].mxu0  ;;  %v1897_v17 = vpop.f32.mrb[23].mxu1  ;;  %v1896_v5 = vadd.f32 %v1895_v42, %v6954_v27 }
 0x56a   :  { %v1827_v31 = vadd.f32 %v1826_v14, %v6953_v4  ;;  %v1898_v7 = vadd.f32 %v1897_v17, %v6955_v52 }
 0x56b   :  { %v1900_v15 = vmul.f32 0.5, %v1825_v50 }
 0x56c   :  { %v1904_v54 = vmul.f32 0.5, %v1827_v31  ;;  %v1909_v10 = vmul.f32 0.5, %v1898_v7 }
 0x56d   :  { %5132 = vtanh.f32 %v1900_v15 }
 0x56e   :  { %5134 = vtanh.f32 %v1904_v54 }
 0x56f   :  { %5136 = vtanh.f32 %v1896_v5 }
 0x570   :  { %5138 = vtanh.f32 %v1909_v10  ;;  %v7078_v10 = vld [vmem:[#allocation70_spill] sm:$0xff] }
 0x577   :  { %v5133_v63 = vpop.eup %5132 }
 0x578   :  { %v5135_v60 = vpop.eup %5134  ;;  %v1902_v56 = vadd.f32 1.0, %v5133_v63 }
 0x579   :  { %v1906_v45 = vadd.f32 1.0, %v5135_v60  ;;  %v5137_v24 = vpop.eup %5136 }
 0x57a   :  { %v1903_v41 = vmul.f32 0.5, %v1902_v56  ;;  %v5139_v15 = vpop.eup %5138 }
 0x57b   :  { %v1907_v21 = vmul.f32 0.5, %v1906_v45  ;;  %v1911_v54 = vadd.f32 1.0, %v5139_v15 }
 0x57c   :  { %v1914_v1 = vmul.f32 %v5137_v24, %v1903_v41 }
 0x57d   :  { %v1913_v14 = vmul.f32 %v1907_v21, %v6108_v49  ;;  %v1912_v60 = vmul.f32 0.5, %v1911_v54 }
 0x57f   :  { %v6222_v31 = vadd.f32 %v1914_v1, %v1913_v14 }
 0x581   :  { %5140 = vtanh.f32 %v6222_v31 }
 0x588   :  { %v1991_v5 = vpop.f32.mrb[8].mxu0  ;;  %v2062_v17 = vpop.f32.mrb[8].mxu1 }
 0x589   :  { %v4999_v7 = vadd.f32 %v1991_v5, %v6894_v32  ;;  %v1993_v42 = vpop.f32.mrb[9].mxu0  ;;  %v2064_v63 = vpop.f32.mrb[9].mxu1  ;;  %v5015_v49 = vadd.f32 %v2062_v17, %v5746_v18 }
 0x58a   :  { %v5000_v56 = vadd.f32 %v1993_v42, %v7078_v10  ;;  %v5016_v1 = vadd.f32 %v2064_v63, %v5753_v11 }
 0x58b   :  { %v5141_v50 = vpop.eup %5140  ;;  %v2071_v45 = vmul.f32 0.5, %v4999_v7 }
 0x58c   :  { %v2075_v24 = vmul.f32 0.5, %v5000_v56  ;;  %v1917_v41 = vmul.f32 %v5141_v50, %v1912_v60  ;;  %v2080_v21 = vmul.f32 0.5, %v5016_v1  ;;  %v7082_v1 = vld [vmem:[#allocation15_spill] sm:$0xff] }
 0x58d   :  { %5142 = vtanh.f32 %v2071_v45 }
 0x58e   :  { %5144 = vtanh.f32 %v2075_v24  ;;  %2153 = vmatprep.mubr.f32.mxu0 %v1917_v41  ;;  %2224 = vmatprep.mubr.f32.mxu1 %v1917_v41 }
 0x58f   :  { %5146 = vtanh.f32 %v5015_v49  ;;  %v7081_v49 = vld [vmem:[#allocation14_spill] sm:$0xff] }
 0x590   :  { %5148 = vtanh.f32 %v2080_v21  ;;  %v7083_v21 = vld [vmem:[#allocation16_spill] sm:$0xff] }
 0x597   :  { %v5143_v14 = vpop.eup %5142 }
 0x598   :  { %v5145_v15 = vpop.eup %5144  ;;  %v2073_v5 = vadd.f32 1.0, %v5143_v14  ;;  %v7084_v14 = vld [vmem:[#allocation17_spill] sm:$0xff] }
 0x599   :  { %v2077_v54 = vadd.f32 1.0, %v5145_v15  ;;  %v5147_v10 = vpop.eup %5146  ;;  %v7085_v15 = vld [vmem:[#allocation18_spill] sm:$0xff] }
 0x59a   :  { %v2074_v42 = vmul.f32 0.5, %v2073_v5  ;;  %v5149_v17 = vpop.eup %5148  ;;  %v7086_v5 = vld [vmem:[#allocation19_spill] sm:$0xff] }
 0x59b   :  { %v2078_v7 = vmul.f32 0.5, %v2077_v54  ;;  %v2082_v45 = vadd.f32 1.0, %v5149_v17  ;;  %v7087_v54 = vld [vmem:[#allocation20_spill] sm:$0xff]  ;;  %v7092_v17 = vld [vmem:[#allocation25_spill] sm:$0xff] }
 0x59c   :  { %v2085_v56 = vmul.f32 %v5147_v10, %v2074_v42  ;;  %v7080_v10 = vld [vmem:[#allocation13_spill] sm:$0xff] }
 0x59d   :  { %v2084_v60 = vmul.f32 %v2078_v7, %v6116_v22  ;;  %v2083_v24 = vmul.f32 0.5, %v2082_v45  ;;  %v7079_v22 = vld [vmem:[#allocation12_spill] sm:$0xff]  ;;  %v7088_v42 = vld [vmem:[#allocation21_spill] sm:$0xff]  ;;  %v7089_v7 = vld [vmem:[#allocation22_spill] sm:$0xff] }
 0x59e   :  { %v7093_v45 = vld [vmem:[#allocation26_spill] sm:$0xff] }
 0x59f   :  { %v6230_v50 = vadd.f32 %v2085_v56, %v2084_v60  ;;  %v7090_v56 = vld [vmem:[#allocation23_spill] sm:$0xff]  ;;  %v7091_v60 = vld [vmem:[#allocation24_spill] sm:$0xff] }
 0x5a1   :  { %5150 = vtanh.f32 %v6230_v50 }
 0x5ab   :  { %v5151_v63 = vpop.eup %5150 }
 0x5ac   :  { %v2088_v41 = vmul.f32 %v5151_v63, %v2083_v24  ;;  %v7094_v24 = vld [vmem:[#allocation27_spill] sm:$0xff]  ;;  %v7095_v63 = vld [vmem:[#allocation28_spill] sm:$0xff] }
 0x5ae   :  { %2154 = vmatmul.mubr.f32.vlgmr.msra.gmra.mrb[24].mxu0 %v2088_v41  ;;  %2225 = vmatmul.mubr.f32.vlgmr.msra.gmra.mrb[24].mxu1 %v2088_v41 }
 0x5af   :  { %4394 = vmatpush1.bf16.msra.mxu0 %v5384_v23  ;;  %4426 = vmatpush1.bf16.msra.mxu1 %v5387_v26 }
 0x5b0   :  { %4396 = vmatprep.subr.bf16.mxu0 %v5391_v30  ;;  %4428 = vmatprep.subr.bf16.mxu1 %v5398_v35 }
 0x5b1   :  { %2320 = vmatprep.mubr.f32.mxu0 %v6833_v0  ;;  %2391 = vmatprep.mubr.f32.mxu1 %v6833_v0 }
 0x5b3   :  { %4398 = vmatpush1.bf16.msra.mxu0 %v5400_v36  ;;  %4430 = vmatpush1.bf16.msra.mxu1 %v5404_v39 }
 0x5b4   :  { %4400 = vmatprep.subr.bf16.mxu0 %v5408_v43  ;;  %4432 = vmatprep.subr.bf16.mxu1 %v5415_v48 }
 0x5b7   :  { %4402 = vmatpush1.bf16.msra.mxu0 %v5419_v51  ;;  %4434 = vmatpush1.bf16.msra.mxu1 %v5423_v55 }
 0x5b8   :  { %4404 = vmatprep.subr.bf16.mxu0 %v5427_v59  ;;  %4436 = vmatprep.subr.bf16.mxu1 %v5431_v62 }
 0x5bb   :  { %4406 = vmatpush1.bf16.msra.mxu0 %v5438_v3  ;;  %4438 = vmatpush1.bf16.msra.mxu1 %v5442_v6 }
 0x5bc   :  { %4408 = vmatprep.subr.bf16.mxu0 %v5446_v9  ;;  %4440 = vmatprep.subr.bf16.mxu1 %v5450_v12 }
 0x5bf   :  { %4410 = vmatpush1.bf16.msra.mxu0 %v5457_v16  ;;  %4442 = vmatpush1.bf16.msra.mxu1 %v5461_v20 }
 0x5c0   :  { %4412 = vmatprep.subr.bf16.mxu0 %v5465_v25  ;;  %4444 = vmatprep.subr.bf16.mxu1 %v5469_v29 }
 0x5c3   :  { %4414 = vmatpush1.bf16.msra.mxu0 %v5476_v34  ;;  %4446 = vmatpush1.bf16.msra.mxu1 %v5480_v40 }
 0x5c4   :  { %4416 = vmatprep.subr.bf16.mxu0 %v5484_v44  ;;  %4448 = vmatprep.subr.bf16.mxu1 %v5488_v47 }
 0x5c7   :  { %4418 = vmatpush1.bf16.msra.mxu0 %v5495_v53  ;;  %4450 = vmatpush1.bf16.msra.mxu1 %v5499_v57 }
 0x5c8   :  { %4420 = vmatprep.subr.bf16.mxu0 %v5503_v61  ;;  %4452 = vmatprep.subr.bf16.mxu1 %v5507_v2 }
 0x5cb   :  { %4422 = vmatpush1.bf16.msra.mxu0 %v5514_v8  ;;  %4454 = vmatpush1.bf16.msra.mxu1 %v5518_v13 }
 0x5cc   :  { %4456 = vmatprep.subr.bf16.mxu0 %v5522_v19  ;;  %4520 = vmatprep.subr.bf16.mxu1 %v5526_v28 }
 0x5ce   :  { %2321 = vmatmul.mubr.f32.vlgmr.msra.gmra.mrb[10].mxu0 %v2088_v41  ;;  %2392 = vmatmul.mubr.f32.vlgmr.msra.gmra.mrb[10].mxu1 %v2088_v41  ;;  %v7096_v41 = vld [vmem:[#allocation29_spill] sm:$0xff] }
 0x5cf   :  { %4458 = vmatpush1.bf16.msra.mxu0 %v5530_v33  ;;  %4522 = vmatpush1.bf16.msra.mxu1 %v5534_v37 }
 0x5d0   :  { %4460 = vmatprep.subr.bf16.mxu0 %v5536_v38  ;;  %4524 = vmatprep.subr.bf16.mxu1 %v5540_v46 }
 0x5d3   :  { %4462 = vmatpush1.bf16.msra.mxu0 %v5546_v58  ;;  %4526 = vmatpush1.bf16.msra.mxu1 %v7079_v22 }
 0x5d4   :  { %4464 = vmatprep.subr.bf16.mxu0 %v7080_v10  ;;  %4528 = vmatprep.subr.bf16.mxu1 %v7081_v49 }
 0x5d7   :  { %4466 = vmatpush1.bf16.msra.mxu0 %v7082_v1  ;;  %4530 = vmatpush1.bf16.msra.mxu1 %v7083_v21 }
 0x5d8   :  { %4468 = vmatprep.subr.bf16.mxu0 %v7084_v14  ;;  %4532 = vmatprep.subr.bf16.mxu1 %v7085_v15  ;;  %v7138_v15 = vld [vmem:[#allocation71_spill] sm:$0xff] }
 0x5db   :  { %4470 = vmatpush1.bf16.msra.mxu0 %v7086_v5  ;;  %4534 = vmatpush1.bf16.msra.mxu1 %v7087_v54  ;;  %v7097_v5 = vld [vmem:[#allocation30_spill] sm:$0xff]  ;;  %v7098_v54 = vld [vmem:[#allocation31_spill] sm:$0xff] }
 0x5dc   :  { %4472 = vmatprep.subr.bf16.mxu0 %v7088_v42  ;;  %4536 = vmatprep.subr.bf16.mxu1 %v7089_v7  ;;  %v7099_v42 = vld [vmem:[#allocation32_spill] sm:$0xff]  ;;  %v7100_v7 = vld [vmem:[#allocation33_spill] sm:$0xff] }
 0x5df   :  { %4474 = vmatpush1.bf16.msra.mxu0 %v7090_v56  ;;  %4538 = vmatpush1.bf16.msra.mxu1 %v7091_v60  ;;  %v7101_v56 = vld [vmem:[#allocation34_spill] sm:$0xff]  ;;  %v7102_v60 = vld [vmem:[#allocation35_spill] sm:$0xff] }
 0x5e0   :  { %4476 = vmatprep.subr.bf16.mxu0 %v7092_v17  ;;  %4540 = vmatprep.subr.bf16.mxu1 %v7093_v45  ;;  %v7103_v17 = vld [vmem:[#allocation36_spill] sm:$0xff]  ;;  %v7104_v45 = vld [vmem:[#allocation37_spill] sm:$0xff] }
 0x5e3   :  { %4478 = vmatpush1.bf16.msra.mxu0 %v7094_v24  ;;  %4542 = vmatpush1.bf16.msra.mxu1 %v7095_v63  ;;  %v7105_v24 = vld [vmem:[#allocation38_spill] sm:$0xff]  ;;  %v7106_v63 = vld [vmem:[#allocation39_spill] sm:$0xff] }
 0x5e4   :  { %4480 = vmatprep.subr.bf16.mxu0 %v7096_v41  ;;  %4544 = vmatprep.subr.bf16.mxu1 %v7097_v5  ;;  %v7107_v41 = vld [vmem:[#allocation40_spill] sm:$0xff]  ;;  %v7108_v5 = vld [vmem:[#allocation41_spill] sm:$0xff] }
 0x5e7   :  { %4482 = vmatpush1.bf16.msra.mxu0 %v7098_v54  ;;  %4546 = vmatpush1.bf16.msra.mxu1 %v7099_v42  ;;  %v7109_v54 = vld [vmem:[#allocation42_spill] sm:$0xff]  ;;  %v7110_v42 = vld [vmem:[#allocation43_spill] sm:$0xff] }
 0x5e8   :  { %4484 = vmatprep.subr.bf16.mxu0 %v7100_v7  ;;  %4548 = vmatprep.subr.bf16.mxu1 %v7101_v56  ;;  %v7111_v7 = vld [vmem:[#allocation44_spill] sm:$0xff]  ;;  %v7112_v56 = vld [vmem:[#allocation45_spill] sm:$0xff] }
 0x5eb   :  { %4486 = vmatpush1.bf16.msra.mxu0 %v7102_v60  ;;  %4550 = vmatpush1.bf16.msra.mxu1 %v7103_v17  ;;  %v7113_v60 = vld [vmem:[#allocation46_spill] sm:$0xff]  ;;  %v7114_v17 = vld [vmem:[#allocation47_spill] sm:$0xff] }
 0x5ec   :  { %4488 = vmatprep.subr.bf16.mxu0 %v7104_v45  ;;  %4552 = vmatprep.subr.bf16.mxu1 %v7105_v24  ;;  %v7115_v45 = vld [vmem:[#allocation48_spill] sm:$0xff]  ;;  %v7116_v24 = vld [vmem:[#allocation49_spill] sm:$0xff] }
 0x5ef   :  { %4490 = vmatpush1.bf16.msra.mxu0 %v7106_v63  ;;  %4554 = vmatpush1.bf16.msra.mxu1 %v7107_v41  ;;  %v7117_v63 = vld [vmem:[#allocation50_spill] sm:$0xff]  ;;  %v7118_v41 = vld [vmem:[#allocation51_spill] sm:$0xff] }
 0x5f0   :  { %4492 = vmatprep.subr.bf16.mxu0 %v7108_v5  ;;  %4556 = vmatprep.subr.bf16.mxu1 %v7109_v54  ;;  %v7119_v5 = vld [vmem:[#allocation52_spill] sm:$0xff]  ;;  %v7120_v54 = vld [vmem:[#allocation53_spill] sm:$0xff] }
 0x5f3   :  { %4494 = vmatpush1.bf16.msra.mxu0 %v7110_v42  ;;  %4558 = vmatpush1.bf16.msra.mxu1 %v7111_v7  ;;  %v7121_v42 = vld [vmem:[#allocation54_spill] sm:$0xff]  ;;  %v7122_v7 = vld [vmem:[#allocation55_spill] sm:$0xff] }
 0x5f4   :  { %4496 = vmatprep.subr.bf16.mxu0 %v7112_v56  ;;  %4560 = vmatprep.subr.bf16.mxu1 %v7113_v60  ;;  %v7123_v56 = vld [vmem:[#allocation56_spill] sm:$0xff]  ;;  %v7124_v60 = vld [vmem:[#allocation57_spill] sm:$0xff] }
 0x5f7   :  { %4498 = vmatpush1.bf16.msra.mxu0 %v7114_v17  ;;  %4562 = vmatpush1.bf16.msra.mxu1 %v7115_v45  ;;  %v7125_v17 = vld [vmem:[#allocation58_spill] sm:$0xff]  ;;  %v7126_v45 = vld [vmem:[#allocation59_spill] sm:$0xff] }
 0x5f8   :  { %4500 = vmatprep.subr.bf16.mxu0 %v7116_v24  ;;  %4564 = vmatprep.subr.bf16.mxu1 %v7117_v63  ;;  %v7127_v24 = vld [vmem:[#allocation60_spill] sm:$0xff]  ;;  %v7128_v63 = vld [vmem:[#allocation61_spill] sm:$0xff] }
 0x5fb   :  { %4502 = vmatpush1.bf16.msra.mxu0 %v7118_v41  ;;  %4566 = vmatpush1.bf16.msra.mxu1 %v7119_v5  ;;  %v7129_v41 = vld [vmem:[#allocation62_spill] sm:$0xff]  ;;  %v7130_v5 = vld [vmem:[#allocation63_spill] sm:$0xff] }
 0x5fc   :  { %4504 = vmatprep.subr.bf16.mxu0 %v7120_v54  ;;  %4568 = vmatprep.subr.bf16.mxu1 %v7121_v42  ;;  %v7131_v54 = vld [vmem:[#allocation64_spill] sm:$0xff]  ;;  %v7132_v42 = vld [vmem:[#allocation65_spill] sm:$0xff] }
 0x5ff   :  { %4506 = vmatpush1.bf16.msra.mxu0 %v7122_v7  ;;  %4570 = vmatpush1.bf16.msra.mxu1 %v7123_v56  ;;  %v7133_v7 = vld [vmem:[#allocation66_spill] sm:$0xff]  ;;  %v7134_v56 = vld [vmem:[#allocation67_spill] sm:$0xff] }
 0x600   :  { %4508 = vmatprep.subr.bf16.mxu0 %v7124_v60  ;;  %4572 = vmatprep.subr.bf16.mxu1 %v7125_v17  ;;  %v7135_v60 = vld [vmem:[#allocation68_spill] sm:$0xff]  ;;  %v7136_v17 = vld [vmem:[#allocation10_spill] sm:$0xff] }
 0x603   :  { %4510 = vmatpush1.bf16.msra.mxu0 %v7126_v45  ;;  %4574 = vmatpush1.bf16.msra.mxu1 %v7127_v24  ;;  %v7137_v45 = vld [vmem:[#allocation11_spill] sm:$0xff] }
 0x604   :  { %4512 = vmatprep.subr.bf16.mxu0 %v7128_v63  ;;  %4576 = vmatprep.subr.bf16.mxu1 %v7129_v41 }
 0x607   :  { %4514 = vmatpush1.bf16.msra.mxu0 %v7130_v5  ;;  %4578 = vmatpush1.bf16.msra.mxu1 %v7131_v54 }
 0x608   :  { %4516 = vmatprep.subr.bf16.mxu0 %v7132_v42  ;;  %4580 = vmatprep.subr.bf16.mxu1 %v7133_v7 }
 0x60b   :  { %4518 = vmatpush1.bf16.msra.mxu0 %v7134_v56  ;;  %4582 = vmatpush1.bf16.msra.mxu1 %v7135_v60 }
 0x60c   :  { %4584 = vmatprep.subr.bf16.mxu0 %v7136_v17  ;;  %4616 = vmatprep.subr.bf16.mxu1 %v7137_v45 }
 0x681   :  { %v2155_v24 = vpop.f32.mrb[24].mxu0  ;;  %v2226_v63 = vpop.f32.mrb[24].mxu1 }
 0x682   :  { %v2156_v41 = vadd.f32 %v2155_v24, %v7138_v15  ;;  %v2157_v14 = vpop.f32.mrb[25].mxu0  ;;  %v2228_v5 = vpop.f32.mrb[25].mxu1  ;;  %v2227_v7 = vadd.f32 %v2226_v63, %v6954_v27 }
 0x683   :  { %v2158_v54 = vadd.f32 %v2157_v14, %v6953_v4  ;;  %v2229_v60 = vadd.f32 %v2228_v5, %v6955_v52 }
 0x684   :  { %v2231_v21 = vmul.f32 0.5, %v2156_v41 }
 0x685   :  { %v2235_v42 = vmul.f32 0.5, %v2158_v54  ;;  %v2240_v17 = vmul.f32 0.5, %v2229_v60 }
 0x686   :  { %5152 = vtanh.f32 %v2231_v21 }
 0x687   :  { %5154 = vtanh.f32 %v2235_v42 }
 0x688   :  { %5156 = vtanh.f32 %v2227_v7 }
 0x689   :  { %5158 = vtanh.f32 %v2240_v17  ;;  %v7139_v17 = vld [vmem:[#allocation70_spill] sm:$0xff] }
 0x690   :  { %v5153_v56 = vpop.eup %5152 }
 0x691   :  { %v5155_v45 = vpop.eup %5154  ;;  %v2233_v1 = vadd.f32 1.0, %v5153_v56 }
 0x692   :  { %v2237_v49 = vadd.f32 1.0, %v5155_v45  ;;  %v5157_v15 = vpop.eup %5156 }
 0x693   :  { %v2234_v24 = vmul.f32 0.5, %v2233_v1  ;;  %v5159_v21 = vpop.eup %5158 }
 0x694   :  { %v2238_v10 = vmul.f32 0.5, %v2237_v49  ;;  %v2242_v42 = vadd.f32 1.0, %v5159_v21 }
 0x695   :  { %v2245_v22 = vmul.f32 %v5157_v15, %v2234_v24 }
 0x696   :  { %v2244_v14 = vmul.f32 %v2238_v10, %v6222_v31  ;;  %v2243_v45 = vmul.f32 0.5, %v2242_v42 }
 0x698   :  { %v6336_v54 = vadd.f32 %v2245_v22, %v2244_v14 }
 0x69a   :  { %5160 = vtanh.f32 %v6336_v54 }
 0x6a1   :  { %v2322_v7 = vpop.f32.mrb[10].mxu0  ;;  %v2393_v5 = vpop.f32.mrb[10].mxu1 }
 0x6a2   :  { %v5001_v60 = vadd.f32 %v2322_v7, %v6894_v32  ;;  %v2324_v63 = vpop.f32.mrb[11].mxu0  ;;  %v2395_v56 = vpop.f32.mrb[11].mxu1  ;;  %v5017_v31 = vadd.f32 %v2393_v5, %v5746_v18 }
 0x6a3   :  { %v5002_v1 = vadd.f32 %v2324_v63, %v7139_v17  ;;  %v5018_v22 = vadd.f32 %v2395_v56, %v5753_v11 }
 0x6a4   :  { %v5161_v41 = vpop.eup %5160  ;;  %v2402_v49 = vmul.f32 0.5, %v5001_v60 }
 0x6a5   :  { %v2406_v15 = vmul.f32 0.5, %v5002_v1  ;;  %v2248_v24 = vmul.f32 %v5161_v41, %v2243_v45  ;;  %v2411_v10 = vmul.f32 0.5, %v5018_v22  ;;  %v7143_v22 = vld [vmem:[#allocation15_spill] sm:$0xff] }
 0x6a6   :  { %5162 = vtanh.f32 %v2402_v49 }
 0x6a7   :  { %5164 = vtanh.f32 %v2406_v15  ;;  %2484 = vmatprep.mubr.f32.mxu0 %v2248_v24  ;;  %2555 = vmatprep.mubr.f32.mxu1 %v2248_v24 }
 0x6a8   :  { %5166 = vtanh.f32 %v5017_v31  ;;  %v7142_v31 = vld [vmem:[#allocation14_spill] sm:$0xff] }
 0x6a9   :  { %5168 = vtanh.f32 %v2411_v10  ;;  %v7144_v10 = vld [vmem:[#allocation16_spill] sm:$0xff] }
 0x6b0   :  { %v5163_v14 = vpop.eup %5162 }
 0x6b1   :  { %v5165_v21 = vpop.eup %5164  ;;  %v2404_v7 = vadd.f32 1.0, %v5163_v14  ;;  %v7145_v14 = vld [vmem:[#allocation17_spill] sm:$0xff] }
 0x6b2   :  { %v2408_v42 = vadd.f32 1.0, %v5165_v21  ;;  %v5167_v17 = vpop.eup %5166  ;;  %v7146_v21 = vld [vmem:[#allocation18_spill] sm:$0xff] }
 0x6b3   :  { %v2405_v63 = vmul.f32 0.5, %v2404_v7  ;;  %v5169_v5 = vpop.eup %5168  ;;  %v7147_v7 = vld [vmem:[#allocation19_spill] sm:$0xff] }
 0x6b4   :  { %v2409_v60 = vmul.f32 0.5, %v2408_v42  ;;  %v2413_v49 = vadd.f32 1.0, %v5169_v5  ;;  %v7148_v42 = vld [vmem:[#allocation20_spill] sm:$0xff]  ;;  %v7153_v5 = vld [vmem:[#allocation25_spill] sm:$0xff] }
 0x6b5   :  { %v2416_v1 = vmul.f32 %v5167_v17, %v2405_v63  ;;  %v7141_v17 = vld [vmem:[#allocation13_spill] sm:$0xff] }
 0x6b6   :  { %v2415_v45 = vmul.f32 %v2409_v60, %v6230_v50  ;;  %v2414_v15 = vmul.f32 0.5, %v2413_v49  ;;  %v7140_v50 = vld [vmem:[#allocation12_spill] sm:$0xff]  ;;  %v7149_v63 = vld [vmem:[#allocation21_spill] sm:$0xff]  ;;  %v7150_v60 = vld [vmem:[#allocation22_spill] sm:$0xff] }
 0x6b7   :  { %v7154_v49 = vld [vmem:[#allocation26_spill] sm:$0xff] }
 0x6b8   :  { %v6344_v41 = vadd.f32 %v2416_v1, %v2415_v45  ;;  %v7151_v1 = vld [vmem:[#allocation23_spill] sm:$0xff]  ;;  %v7152_v45 = vld [vmem:[#allocation24_spill] sm:$0xff] }
 0x6ba   :  { %5170 = vtanh.f32 %v6344_v41 }
 0x6c4   :  { %v5171_v56 = vpop.eup %5170 }
 0x6c5   :  { %v2419_v24 = vmul.f32 %v5171_v56, %v2414_v15  ;;  %v7155_v15 = vld [vmem:[#allocation27_spill] sm:$0xff]  ;;  %v7156_v56 = vld [vmem:[#allocation28_spill] sm:$0xff] }
 0x6c7   :  { %2485 = vmatmul.mubr.f32.vlgmr.msra.gmra.mrb[26].mxu0 %v2419_v24  ;;  %2556 = vmatmul.mubr.f32.vlgmr.msra.gmra.mrb[26].mxu1 %v2419_v24 }
 0x6c8   :  { %4586 = vmatpush1.bf16.msra.mxu0 %v5384_v23  ;;  %4618 = vmatpush1.bf16.msra.mxu1 %v5387_v26 }
 0x6c9   :  { %4588 = vmatprep.subr.bf16.mxu0 %v5391_v30  ;;  %4620 = vmatprep.subr.bf16.mxu1 %v5398_v35 }
 0x6ca   :  { %2651 = vmatprep.mubr.f32.mxu0 %v6833_v0  ;;  %2722 = vmatprep.mubr.f32.mxu1 %v6833_v0 }
 0x6cc   :  { %4590 = vmatpush1.bf16.msra.mxu0 %v5400_v36  ;;  %4622 = vmatpush1.bf16.msra.mxu1 %v5404_v39 }
 0x6cd   :  { %4592 = vmatprep.subr.bf16.mxu0 %v5408_v43  ;;  %4624 = vmatprep.subr.bf16.mxu1 %v5415_v48 }
 0x6d0   :  { %4594 = vmatpush1.bf16.msra.mxu0 %v5419_v51  ;;  %4626 = vmatpush1.bf16.msra.mxu1 %v5423_v55 }
 0x6d1   :  { %4596 = vmatprep.subr.bf16.mxu0 %v5427_v59  ;;  %4628 = vmatprep.subr.bf16.mxu1 %v5431_v62 }
 0x6d4   :  { %4598 = vmatpush1.bf16.msra.mxu0 %v5438_v3  ;;  %4630 = vmatpush1.bf16.msra.mxu1 %v5442_v6 }
 0x6d5   :  { %4600 = vmatprep.subr.bf16.mxu0 %v5446_v9  ;;  %4632 = vmatprep.subr.bf16.mxu1 %v5450_v12 }
 0x6d8   :  { %4602 = vmatpush1.bf16.msra.mxu0 %v5457_v16  ;;  %4634 = vmatpush1.bf16.msra.mxu1 %v5461_v20 }
 0x6d9   :  { %4604 = vmatprep.subr.bf16.mxu0 %v5465_v25  ;;  %4636 = vmatprep.subr.bf16.mxu1 %v5469_v29 }
 0x6dc   :  { %4606 = vmatpush1.bf16.msra.mxu0 %v5476_v34  ;;  %4638 = vmatpush1.bf16.msra.mxu1 %v5480_v40 }
 0x6dd   :  { %4608 = vmatprep.subr.bf16.mxu0 %v5484_v44  ;;  %4640 = vmatprep.subr.bf16.mxu1 %v5488_v47 }
 0x6e0   :  { %4610 = vmatpush1.bf16.msra.mxu0 %v5495_v53  ;;  %4642 = vmatpush1.bf16.msra.mxu1 %v5499_v57 }
 0x6e1   :  { %4612 = vmatprep.subr.bf16.mxu0 %v5503_v61  ;;  %4644 = vmatprep.subr.bf16.mxu1 %v5507_v2 }
 0x6e4   :  { %4614 = vmatpush1.bf16.msra.mxu0 %v5514_v8  ;;  %4646 = vmatpush1.bf16.msra.mxu1 %v5518_v13 }
 0x6e5   :  { %4648 = vmatprep.subr.bf16.mxu0 %v5522_v19  ;;  %4712 = vmatprep.subr.bf16.mxu1 %v5526_v28 }
 0x6e7   :  { %2652 = vmatmul.mubr.f32.vlgmr.msra.gmra.mrb[12].mxu0 %v2419_v24  ;;  %2723 = vmatmul.mubr.f32.vlgmr.msra.gmra.mrb[12].mxu1 %v2419_v24  ;;  %v7157_v24 = vld [vmem:[#allocation29_spill] sm:$0xff] }
 0x6e8   :  { %4650 = vmatpush1.bf16.msra.mxu0 %v5530_v33  ;;  %4714 = vmatpush1.bf16.msra.mxu1 %v5534_v37 }
 0x6e9   :  { %4652 = vmatprep.subr.bf16.mxu0 %v5536_v38  ;;  %4716 = vmatprep.subr.bf16.mxu1 %v5540_v46 }
 0x6ec   :  { %4654 = vmatpush1.bf16.msra.mxu0 %v5546_v58  ;;  %4718 = vmatpush1.bf16.msra.mxu1 %v7140_v50 }
 0x6ed   :  { %4656 = vmatprep.subr.bf16.mxu0 %v7141_v17  ;;  %4720 = vmatprep.subr.bf16.mxu1 %v7142_v31 }
 0x6f0   :  { %4658 = vmatpush1.bf16.msra.mxu0 %v7143_v22  ;;  %4722 = vmatpush1.bf16.msra.mxu1 %v7144_v10 }
 0x6f1   :  { %4660 = vmatprep.subr.bf16.mxu0 %v7145_v14  ;;  %4724 = vmatprep.subr.bf16.mxu1 %v7146_v21  ;;  %v7199_v21 = vld [vmem:[#allocation71_spill] sm:$0xff] }
 0x6f4   :  { %4662 = vmatpush1.bf16.msra.mxu0 %v7147_v7  ;;  %4726 = vmatpush1.bf16.msra.mxu1 %v7148_v42  ;;  %v7158_v7 = vld [vmem:[#allocation30_spill] sm:$0xff]  ;;  %v7159_v42 = vld [vmem:[#allocation31_spill] sm:$0xff] }
 0x6f5   :  { %4664 = vmatprep.subr.bf16.mxu0 %v7149_v63  ;;  %4728 = vmatprep.subr.bf16.mxu1 %v7150_v60  ;;  %v7160_v63 = vld [vmem:[#allocation32_spill] sm:$0xff]  ;;  %v7161_v60 = vld [vmem:[#allocation33_spill] sm:$0xff] }
 0x6f8   :  { %4666 = vmatpush1.bf16.msra.mxu0 %v7151_v1  ;;  %4730 = vmatpush1.bf16.msra.mxu1 %v7152_v45  ;;  %v7162_v1 = vld [vmem:[#allocation34_spill] sm:$0xff]  ;;  %v7163_v45 = vld [vmem:[#allocation35_spill] sm:$0xff] }
 0x6f9   :  { %4668 = vmatprep.subr.bf16.mxu0 %v7153_v5  ;;  %4732 = vmatprep.subr.bf16.mxu1 %v7154_v49  ;;  %v7164_v5 = vld [vmem:[#allocation36_spill] sm:$0xff]  ;;  %v7165_v49 = vld [vmem:[#allocation37_spill] sm:$0xff] }
 0x6fc   :  { %4670 = vmatpush1.bf16.msra.mxu0 %v7155_v15  ;;  %4734 = vmatpush1.bf16.msra.mxu1 %v7156_v56  ;;  %v7166_v15 = vld [vmem:[#allocation38_spill] sm:$0xff]  ;;  %v7167_v56 = vld [vmem:[#allocation39_spill] sm:$0xff] }
 0x6fd   :  { %4672 = vmatprep.subr.bf16.mxu0 %v7157_v24  ;;  %4736 = vmatprep.subr.bf16.mxu1 %v7158_v7  ;;  %v7168_v24 = vld [vmem:[#allocation40_spill] sm:$0xff]  ;;  %v7169_v7 = vld [vmem:[#allocation41_spill] sm:$0xff] }
 0x700   :  { %4674 = vmatpush1.bf16.msra.mxu0 %v7159_v42  ;;  %4738 = vmatpush1.bf16.msra.mxu1 %v7160_v63  ;;  %v7170_v42 = vld [vmem:[#allocation42_spill] sm:$0xff]  ;;  %v7171_v63 = vld [vmem:[#allocation43_spill] sm:$0xff] }
 0x701   :  { %4676 = vmatprep.subr.bf16.mxu0 %v7161_v60  ;;  %4740 = vmatprep.subr.bf16.mxu1 %v7162_v1  ;;  %v7172_v60 = vld [vmem:[#allocation44_spill] sm:$0xff]  ;;  %v7173_v1 = vld [vmem:[#allocation45_spill] sm:$0xff] }
 0x704   :  { %4678 = vmatpush1.bf16.msra.mxu0 %v7163_v45  ;;  %4742 = vmatpush1.bf16.msra.mxu1 %v7164_v5  ;;  %v7174_v45 = vld [vmem:[#allocation46_spill] sm:$0xff]  ;;  %v7175_v5 = vld [vmem:[#allocation47_spill] sm:$0xff] }
 0x705   :  { %4680 = vmatprep.subr.bf16.mxu0 %v7165_v49  ;;  %4744 = vmatprep.subr.bf16.mxu1 %v7166_v15  ;;  %v7176_v49 = vld [vmem:[#allocation48_spill] sm:$0xff]  ;;  %v7177_v15 = vld [vmem:[#allocation49_spill] sm:$0xff] }
 0x708   :  { %4682 = vmatpush1.bf16.msra.mxu0 %v7167_v56  ;;  %4746 = vmatpush1.bf16.msra.mxu1 %v7168_v24  ;;  %v7178_v56 = vld [vmem:[#allocation50_spill] sm:$0xff]  ;;  %v7179_v24 = vld [vmem:[#allocation51_spill] sm:$0xff] }
 0x709   :  { %4684 = vmatprep.subr.bf16.mxu0 %v7169_v7  ;;  %4748 = vmatprep.subr.bf16.mxu1 %v7170_v42  ;;  %v7180_v7 = vld [vmem:[#allocation52_spill] sm:$0xff]  ;;  %v7181_v42 = vld [vmem:[#allocation53_spill] sm:$0xff] }
 0x70c   :  { %4686 = vmatpush1.bf16.msra.mxu0 %v7171_v63  ;;  %4750 = vmatpush1.bf16.msra.mxu1 %v7172_v60  ;;  %v7182_v63 = vld [vmem:[#allocation54_spill] sm:$0xff]  ;;  %v7183_v60 = vld [vmem:[#allocation55_spill] sm:$0xff] }
 0x70d   :  { %4688 = vmatprep.subr.bf16.mxu0 %v7173_v1  ;;  %4752 = vmatprep.subr.bf16.mxu1 %v7174_v45  ;;  %v7184_v1 = vld [vmem:[#allocation56_spill] sm:$0xff]  ;;  %v7185_v45 = vld [vmem:[#allocation57_spill] sm:$0xff] }
 0x710   :  { %4690 = vmatpush1.bf16.msra.mxu0 %v7175_v5  ;;  %4754 = vmatpush1.bf16.msra.mxu1 %v7176_v49  ;;  %v7186_v5 = vld [vmem:[#allocation58_spill] sm:$0xff]  ;;  %v7187_v49 = vld [vmem:[#allocation59_spill] sm:$0xff] }
 0x711   :  { %4692 = vmatprep.subr.bf16.mxu0 %v7177_v15  ;;  %4756 = vmatprep.subr.bf16.mxu1 %v7178_v56  ;;  %v7188_v15 = vld [vmem:[#allocation60_spill] sm:$0xff]  ;;  %v7189_v56 = vld [vmem:[#allocation61_spill] sm:$0xff] }
 0x714   :  { %4694 = vmatpush1.bf16.msra.mxu0 %v7179_v24  ;;  %4758 = vmatpush1.bf16.msra.mxu1 %v7180_v7  ;;  %v7190_v24 = vld [vmem:[#allocation62_spill] sm:$0xff]  ;;  %v7191_v7 = vld [vmem:[#allocation63_spill] sm:$0xff] }
 0x715   :  { %4696 = vmatprep.subr.bf16.mxu0 %v7181_v42  ;;  %4760 = vmatprep.subr.bf16.mxu1 %v7182_v63  ;;  %v7192_v42 = vld [vmem:[#allocation64_spill] sm:$0xff]  ;;  %v7193_v63 = vld [vmem:[#allocation65_spill] sm:$0xff] }
 0x718   :  { %4698 = vmatpush1.bf16.msra.mxu0 %v7183_v60  ;;  %4762 = vmatpush1.bf16.msra.mxu1 %v7184_v1  ;;  %v7194_v60 = vld [vmem:[#allocation66_spill] sm:$0xff]  ;;  %v7195_v1 = vld [vmem:[#allocation67_spill] sm:$0xff] }
 0x719   :  { %4700 = vmatprep.subr.bf16.mxu0 %v7185_v45  ;;  %4764 = vmatprep.subr.bf16.mxu1 %v7186_v5  ;;  %v7196_v45 = vld [vmem:[#allocation68_spill] sm:$0xff]  ;;  %v7197_v5 = vld [vmem:[#allocation10_spill] sm:$0xff] }
 0x71c   :  { %4702 = vmatpush1.bf16.msra.mxu0 %v7187_v49  ;;  %4766 = vmatpush1.bf16.msra.mxu1 %v7188_v15  ;;  %v7198_v49 = vld [vmem:[#allocation11_spill] sm:$0xff] }
 0x71d   :  { %4704 = vmatprep.subr.bf16.mxu0 %v7189_v56  ;;  %4768 = vmatprep.subr.bf16.mxu1 %v7190_v24 }
 0x720   :  { %4706 = vmatpush1.bf16.msra.mxu0 %v7191_v7  ;;  %4770 = vmatpush1.bf16.msra.mxu1 %v7192_v42 }
 0x721   :  { %4708 = vmatprep.subr.bf16.mxu0 %v7193_v63  ;;  %4772 = vmatprep.subr.bf16.mxu1 %v7194_v60 }
 0x724   :  { %4710 = vmatpush1.bf16.msra.mxu0 %v7195_v1  ;;  %4774 = vmatpush1.bf16.msra.mxu1 %v7196_v45 }
 0x725   :  { %4776 = vmatprep.subr.bf16.mxu0 %v7197_v5  ;;  %4808 = vmatprep.subr.bf16.mxu1 %v7198_v49 }
 0x79a   :  { %v2486_v15 = vpop.f32.mrb[26].mxu0  ;;  %v2557_v56 = vpop.f32.mrb[26].mxu1 }
 0x79b   :  { %v2487_v24 = vadd.f32 %v2486_v15, %v7199_v21  ;;  %v2488_v14 = vpop.f32.mrb[27].mxu0  ;;  %v2559_v7 = vpop.f32.mrb[27].mxu1  ;;  %v2558_v60 = vadd.f32 %v2557_v56, %v6954_v27 }
 0x79c   :  { %v2489_v42 = vadd.f32 %v2488_v14, %v6953_v4  ;;  %v2560_v45 = vadd.f32 %v2559_v7, %v6955_v52 }
 0x79d   :  { %v2562_v10 = vmul.f32 0.5, %v2487_v24 }
 0x79e   :  { %v2566_v63 = vmul.f32 0.5, %v2489_v42  ;;  %v2571_v5 = vmul.f32 0.5, %v2560_v45 }
 0x79f   :  { %5172 = vtanh.f32 %v2562_v10 }
 0x7a0   :  { %5174 = vtanh.f32 %v2566_v63 }
 0x7a1   :  { %5176 = vtanh.f32 %v2558_v60 }
 0x7a2   :  { %5178 = vtanh.f32 %v2571_v5  ;;  %v7200_v5 = vld [vmem:[#allocation70_spill] sm:$0xff] }
 0x7a9   :  { %v5173_v1 = vpop.eup %5172 }
 0x7aa   :  { %v5175_v49 = vpop.eup %5174  ;;  %v2564_v22 = vadd.f32 1.0, %v5173_v1 }
 0x7ab   :  { %v2568_v31 = vadd.f32 1.0, %v5175_v49  ;;  %v5177_v21 = vpop.eup %5176 }
 0x7ac   :  { %v2565_v15 = vmul.f32 0.5, %v2564_v22  ;;  %v5179_v10 = vpop.eup %5178 }
 0x7ad   :  { %v2569_v17 = vmul.f32 0.5, %v2568_v31  ;;  %v2573_v63 = vadd.f32 1.0, %v5179_v10 }
 0x7ae   :  { %v2576_v50 = vmul.f32 %v5177_v21, %v2565_v15 }
 0x7af   :  { %v2575_v14 = vmul.f32 %v2569_v17, %v6336_v54  ;;  %v2574_v24 = vmul.f32 0.5, %v2573_v63 }
 0x7b1   :  { %v6450_v42 = vadd.f32 %v2576_v50, %v2575_v14 }
 0x7b3   :  { %5180 = vtanh.f32 %v6450_v42 }
 0x7ba   :  { %v2653_v60 = vpop.f32.mrb[12].mxu0  ;;  %v2724_v7 = vpop.f32.mrb[12].mxu1 }
 0x7bb   :  { %v5003_v45 = vadd.f32 %v2653_v60, %v6894_v32  ;;  %v2655_v56 = vpop.f32.mrb[13].mxu0  ;;  %v2726_v1 = vpop.f32.mrb[13].mxu1  ;;  %v5019_v54 = vadd.f32 %v2724_v7, %v5746_v18 }
 0x7bc   :  { %v5004_v22 = vadd.f32 %v2655_v56, %v7200_v5  ;;  %v5020_v50 = vadd.f32 %v2726_v1, %v5753_v11 }
 0x7bd   :  { %v5181_v49 = vpop.eup %5180  ;;  %v2733_v31 = vmul.f32 0.5, %v5003_v45 }
 0x7be   :  { %v2737_v21 = vmul.f32 0.5, %v5004_v22  ;;  %v2579_v15 = vmul.f32 %v5181_v49, %v2574_v24  ;;  %v2742_v17 = vmul.f32 0.5, %v5020_v50  ;;  %v7241_v50 = vld [vmem:[#allocation52_spill] sm:$0xff] }
 0x7bf   :  { %5182 = vtanh.f32 %v2733_v31 }
 0x7c0   :  { %5184 = vtanh.f32 %v2737_v21  ;;  %2815 = vmatprep.mubr.f32.mxu0 %v2579_v15  ;;  %2886 = vmatprep.mubr.f32.mxu1 %v2579_v15 }
 0x7c1   :  { %5186 = vtanh.f32 %v5019_v54  ;;  %v7240_v54 = vld [vmem:[#allocation51_spill] sm:$0xff] }
 0x7c2   :  { %5188 = vtanh.f32 %v2742_v17  ;;  %v7242_v17 = vld [vmem:[#allocation53_spill] sm:$0xff] }
 0x7c9   :  { %v5183_v14 = vpop.eup %5182 }
 0x7ca   :  { %v5185_v10 = vpop.eup %5184  ;;  %v2735_v60 = vadd.f32 1.0, %v5183_v14  ;;  %v7243_v14 = vld [vmem:[#allocation54_spill] sm:$0xff] }
 0x7cb   :  { %v2739_v63 = vadd.f32 1.0, %v5185_v10  ;;  %v5187_v5 = vpop.eup %5186  ;;  %v7244_v10 = vld [vmem:[#allocation55_spill] sm:$0xff] }
 0x7cc   :  { %v2736_v56 = vmul.f32 0.5, %v2735_v60  ;;  %v5189_v7 = vpop.eup %5188  ;;  %v7245_v60 = vld [vmem:[#allocation56_spill] sm:$0xff] }
 0x7cd   :  { %v2740_v45 = vmul.f32 0.5, %v2739_v63  ;;  %v2744_v31 = vadd.f32 1.0, %v5189_v7  ;;  %v7246_v63 = vld [vmem:[#allocation57_spill] sm:$0xff]  ;;  %v7251_v7 = vld [vmem:[#allocation62_spill] sm:$0xff] }
 0x7ce   :  { %v2747_v22 = vmul.f32 %v5187_v5, %v2736_v56  ;;  %v7239_v5 = vld [vmem:[#allocation50_spill] sm:$0xff] }
 0x7cf   :  { %v2746_v24 = vmul.f32 %v2740_v45, %v6344_v41  ;;  %v2745_v21 = vmul.f32 0.5, %v2744_v31  ;;  %v7238_v41 = vld [vmem:[#allocation49_spill] sm:$0xff]  ;;  %v7247_v56 = vld [vmem:[#allocation58_spill] sm:$0xff]  ;;  %v7248_v45 = vld [vmem:[#allocation59_spill] sm:$0xff] }
 0x7d0   :  { %v7252_v31 = vld [vmem:[#allocation63_spill] sm:$0xff] }
 0x7d1   :  { %v6458_v49 = vadd.f32 %v2747_v22, %v2746_v24  ;;  %v7249_v22 = vld [vmem:[#allocation60_spill] sm:$0xff]  ;;  %v7250_v24 = vld [vmem:[#allocation61_spill] sm:$0xff] }
 0x7d3   :  { %5190 = vtanh.f32 %v6458_v49 }
 0x7dd   :  { %v5191_v1 = vpop.eup %5190 }
 0x7de   :  { %v2750_v15 = vmul.f32 %v5191_v1, %v2745_v21  ;;  %v7253_v21 = vld [vmem:[#allocation64_spill] sm:$0xff]  ;;  %v7254_v1 = vld [vmem:[#allocation65_spill] sm:$0xff] }
 0x7e0   :  { %2816 = vmatmul.mubr.f32.vlgmr.msra.gmra.mrb[28].mxu0 %v2750_v15  ;;  %2887 = vmatmul.mubr.f32.vlgmr.msra.gmra.mrb[28].mxu1 %v2750_v15 }
 0x7e1   :  { %4778 = vmatpush1.bf16.msra.mxu0 %v5384_v23  ;;  %4810 = vmatpush1.bf16.msra.mxu1 %v5387_v26  ;;  %v7201_v23 = vld [vmem:[#allocation12_spill] sm:$0xff]  ;;  %v7202_v26 = vld [vmem:[#allocation13_spill] sm:$0xff] }
 0x7e2   :  { %4780 = vmatprep.subr.bf16.mxu0 %v5391_v30  ;;  %4812 = vmatprep.subr.bf16.mxu1 %v5398_v35  ;;  %v7203_v30 = vld [vmem:[#allocation14_spill] sm:$0xff]  ;;  %v7204_v35 = vld [vmem:[#allocation15_spill] sm:$0xff] }
 0x7e3   :  { %2982 = vmatprep.mubr.f32.mxu0 %v6833_v0  ;;  %3053 = vmatprep.mubr.f32.mxu1 %v6833_v0 }
 0x7e5   :  { %4782 = vmatpush1.bf16.msra.mxu0 %v5400_v36  ;;  %4814 = vmatpush1.bf16.msra.mxu1 %v5404_v39  ;;  %v7205_v36 = vld [vmem:[#allocation16_spill] sm:$0xff]  ;;  %v7206_v39 = vld [vmem:[#allocation17_spill] sm:$0xff] }
 0x7e6   :  { %4784 = vmatprep.subr.bf16.mxu0 %v5408_v43  ;;  %4816 = vmatprep.subr.bf16.mxu1 %v5415_v48  ;;  %v7207_v43 = vld [vmem:[#allocation18_spill] sm:$0xff]  ;;  %v7208_v48 = vld [vmem:[#allocation19_spill] sm:$0xff] }
 0x7e9   :  { %4786 = vmatpush1.bf16.msra.mxu0 %v5419_v51  ;;  %4818 = vmatpush1.bf16.msra.mxu1 %v5423_v55  ;;  %v7209_v51 = vld [vmem:[#allocation20_spill] sm:$0xff]  ;;  %v7210_v55 = vld [vmem:[#allocation21_spill] sm:$0xff] }
 0x7ea   :  { %4788 = vmatprep.subr.bf16.mxu0 %v5427_v59  ;;  %4820 = vmatprep.subr.bf16.mxu1 %v5431_v62  ;;  %v7211_v59 = vld [vmem:[#allocation22_spill] sm:$0xff]  ;;  %v7212_v62 = vld [vmem:[#allocation23_spill] sm:$0xff] }
 0x7ed   :  { %4790 = vmatpush1.bf16.msra.mxu0 %v5438_v3  ;;  %4822 = vmatpush1.bf16.msra.mxu1 %v5442_v6  ;;  %v7213_v3 = vld [vmem:[#allocation24_spill] sm:$0xff]  ;;  %v7214_v6 = vld [vmem:[#allocation25_spill] sm:$0xff] }
 0x7ee   :  { %4792 = vmatprep.subr.bf16.mxu0 %v5446_v9  ;;  %4824 = vmatprep.subr.bf16.mxu1 %v5450_v12  ;;  %v7215_v9 = vld [vmem:[#allocation26_spill] sm:$0xff]  ;;  %v7216_v12 = vld [vmem:[#allocation27_spill] sm:$0xff] }
 0x7f1   :  { %4794 = vmatpush1.bf16.msra.mxu0 %v5457_v16  ;;  %4826 = vmatpush1.bf16.msra.mxu1 %v5461_v20  ;;  %v7217_v16 = vld [vmem:[#allocation28_spill] sm:$0xff]  ;;  %v7218_v20 = vld [vmem:[#allocation29_spill] sm:$0xff] }
 0x7f2   :  { %4796 = vmatprep.subr.bf16.mxu0 %v5465_v25  ;;  %4828 = vmatprep.subr.bf16.mxu1 %v5469_v29  ;;  %v7219_v25 = vld [vmem:[#allocation30_spill] sm:$0xff]  ;;  %v7220_v29 = vld [vmem:[#allocation31_spill] sm:$0xff] }
 0x7f5   :  { %4798 = vmatpush1.bf16.msra.mxu0 %v5476_v34  ;;  %4830 = vmatpush1.bf16.msra.mxu1 %v5480_v40  ;;  %v7221_v34 = vld [vmem:[#allocation32_spill] sm:$0xff]  ;;  %v7222_v40 = vld [vmem:[#allocation33_spill] sm:$0xff] }
 0x7f6   :  { %4800 = vmatprep.subr.bf16.mxu0 %v5484_v44  ;;  %4832 = vmatprep.subr.bf16.mxu1 %v5488_v47  ;;  %v7223_v44 = vld [vmem:[#allocation34_spill] sm:$0xff]  ;;  %v7224_v47 = vld [vmem:[#allocation35_spill] sm:$0xff] }
 0x7f9   :  { %4802 = vmatpush1.bf16.msra.mxu0 %v5495_v53  ;;  %4834 = vmatpush1.bf16.msra.mxu1 %v5499_v57  ;;  %v7225_v53 = vld [vmem:[#allocation36_spill] sm:$0xff]  ;;  %v7226_v57 = vld [vmem:[#allocation37_spill] sm:$0xff] }
 0x7fa   :  { %4804 = vmatprep.subr.bf16.mxu0 %v5503_v61  ;;  %4836 = vmatprep.subr.bf16.mxu1 %v5507_v2  ;;  %v7227_v61 = vld [vmem:[#allocation38_spill] sm:$0xff]  ;;  %v7228_v2 = vld [vmem:[#allocation39_spill] sm:$0xff] }
 0x7fd   :  { %4806 = vmatpush1.bf16.msra.mxu0 %v5514_v8  ;;  %4838 = vmatpush1.bf16.msra.mxu1 %v5518_v13  ;;  %v7229_v8 = vld [vmem:[#allocation40_spill] sm:$0xff]  ;;  %v7230_v13 = vld [vmem:[#allocation41_spill] sm:$0xff] }
 0x7fe   :  { %4840 = vmatprep.subr.bf16.mxu0 %v5522_v19  ;;  %4904 = vmatprep.subr.bf16.mxu1 %v5526_v28  ;;  %v7231_v19 = vld [vmem:[#allocation42_spill] sm:$0xff]  ;;  %v7232_v28 = vld [vmem:[#allocation43_spill] sm:$0xff] }
 0x800   :  { %2983 = vmatmul.mubr.f32.vlgmr.msra.gmra.mrb[14].mxu0 %v2750_v15  ;;  %3054 = vmatmul.mubr.f32.vlgmr.msra.gmra.mrb[14].mxu1 %v2750_v15  ;;  %v7255_v15 = vld [vmem:[#allocation66_spill] sm:$0xff] }
 0x801   :  { %4842 = vmatpush1.bf16.msra.mxu0 %v5530_v33  ;;  %4906 = vmatpush1.bf16.msra.mxu1 %v5534_v37  ;;  %v7233_v33 = vld [vmem:[#allocation44_spill] sm:$0xff]  ;;  %v7234_v37 = vld [vmem:[#allocation45_spill] sm:$0xff] }
 0x802   :  { %4844 = vmatprep.subr.bf16.mxu0 %v5536_v38  ;;  %4908 = vmatprep.subr.bf16.mxu1 %v5540_v46  ;;  %v7235_v38 = vld [vmem:[#allocation46_spill] sm:$0xff]  ;;  %v7236_v46 = vld [vmem:[#allocation47_spill] sm:$0xff] }
 0x805   :  { %4846 = vmatpush1.bf16.msra.mxu0 %v5546_v58  ;;  %4910 = vmatpush1.bf16.msra.mxu1 %v7201_v23  ;;  %v7237_v58 = vld [vmem:[#allocation48_spill] sm:$0xff]  ;;  %v7256_v23 = vld [vmem:[#allocation67_spill] sm:$0xff] }
 0x806   :  { %4848 = vmatprep.subr.bf16.mxu0 %v7202_v26  ;;  %4912 = vmatprep.subr.bf16.mxu1 %v7203_v30  ;;  %v7257_v26 = vld [vmem:[#allocation68_spill] sm:$0xff] }
 0x809   :  { %4850 = vmatpush1.bf16.msra.mxu0 %v7204_v35  ;;  %4914 = vmatpush1.bf16.msra.mxu1 %v7205_v36  ;;  %v7258_v36 = vld [vmem:[#allocation71_spill] sm:$0xff] }
 0x80a   :  { %4852 = vmatprep.subr.bf16.mxu0 %v7206_v39  ;;  %4916 = vmatprep.subr.bf16.mxu1 %v7207_v43 }
 0x80d   :  { %4854 = vmatpush1.bf16.msra.mxu0 %v7208_v48  ;;  %4918 = vmatpush1.bf16.msra.mxu1 %v7209_v51 }
 0x80e   :  { %4856 = vmatprep.subr.bf16.mxu0 %v7210_v55  ;;  %4920 = vmatprep.subr.bf16.mxu1 %v7211_v59 }
 0x811   :  { %4858 = vmatpush1.bf16.msra.mxu0 %v7212_v62  ;;  %4922 = vmatpush1.bf16.msra.mxu1 %v7213_v3 }
 0x812   :  { %4860 = vmatprep.subr.bf16.mxu0 %v7214_v6  ;;  %4924 = vmatprep.subr.bf16.mxu1 %v7215_v9 }
 0x815   :  { %4862 = vmatpush1.bf16.msra.mxu0 %v7216_v12  ;;  %4926 = vmatpush1.bf16.msra.mxu1 %v7217_v16 }
 0x816   :  { %4864 = vmatprep.subr.bf16.mxu0 %v7218_v20  ;;  %4928 = vmatprep.subr.bf16.mxu1 %v7219_v25 }
 0x819   :  { %4866 = vmatpush1.bf16.msra.mxu0 %v7220_v29  ;;  %4930 = vmatpush1.bf16.msra.mxu1 %v7221_v34 }
 0x81a   :  { %4868 = vmatprep.subr.bf16.mxu0 %v7222_v40  ;;  %4932 = vmatprep.subr.bf16.mxu1 %v7223_v44 }
 0x81d   :  { %4870 = vmatpush1.bf16.msra.mxu0 %v7224_v47  ;;  %4934 = vmatpush1.bf16.msra.mxu1 %v7225_v53 }
 0x81e   :  { %4872 = vmatprep.subr.bf16.mxu0 %v7226_v57  ;;  %4936 = vmatprep.subr.bf16.mxu1 %v7227_v61 }
 0x821   :  { %4874 = vmatpush1.bf16.msra.mxu0 %v7228_v2  ;;  %4938 = vmatpush1.bf16.msra.mxu1 %v7229_v8 }
 0x822   :  { %4876 = vmatprep.subr.bf16.mxu0 %v7230_v13  ;;  %4940 = vmatprep.subr.bf16.mxu1 %v7231_v19 }
 0x825   :  { %4878 = vmatpush1.bf16.msra.mxu0 %v7232_v28  ;;  %4942 = vmatpush1.bf16.msra.mxu1 %v7233_v33  ;;  %v7259_v33 = vld [vmem:[#allocation70_spill] sm:$0xff] }
 0x826   :  { %4880 = vmatprep.subr.bf16.mxu0 %v7234_v37  ;;  %4944 = vmatprep.subr.bf16.mxu1 %v7235_v38 }
 0x829   :  { %4882 = vmatpush1.bf16.msra.mxu0 %v7236_v46  ;;  %4946 = vmatpush1.bf16.msra.mxu1 %v7237_v58 }
 0x82a   :  { %4884 = vmatprep.subr.bf16.mxu0 %v7238_v41  ;;  %4948 = vmatprep.subr.bf16.mxu1 %v7239_v5 }
 0x82d   :  { %4886 = vmatpush1.bf16.msra.mxu0 %v7240_v54  ;;  %4950 = vmatpush1.bf16.msra.mxu1 %v7241_v50 }
 0x82e   :  { %4888 = vmatprep.subr.bf16.mxu0 %v7242_v17  ;;  %4952 = vmatprep.subr.bf16.mxu1 %v7243_v14 }
 0x831   :  { %4890 = vmatpush1.bf16.msra.mxu0 %v7244_v10  ;;  %4954 = vmatpush1.bf16.msra.mxu1 %v7245_v60 }
 0x832   :  { %4892 = vmatprep.subr.bf16.mxu0 %v7246_v63  ;;  %4956 = vmatprep.subr.bf16.mxu1 %v7247_v56 }
 0x835   :  { %4894 = vmatpush1.bf16.msra.mxu0 %v7248_v45  ;;  %4958 = vmatpush1.bf16.msra.mxu1 %v7249_v22 }
 0x836   :  { %4896 = vmatprep.subr.bf16.mxu0 %v7250_v24  ;;  %4960 = vmatprep.subr.bf16.mxu1 %v7251_v7 }
 0x839   :  { %4898 = vmatpush1.bf16.msra.mxu0 %v7252_v31  ;;  %4962 = vmatpush1.bf16.msra.mxu1 %v7253_v21 }
 0x83a   :  { %4900 = vmatprep.subr.bf16.mxu0 %v7254_v1  ;;  %4964 = vmatprep.subr.bf16.mxu1 %v7255_v15  ;;  %v3243_v1 = vld [vmem:[%s6633_s6 + $0x8] sm:$0xff] }
 0x83d   :  { %4902 = vmatpush1.bf16.msra.mxu0 %v7256_v23  ;;  %4966 = vmatpush1.bf16.msra.mxu1 %v7257_v26  ;;  %v5277_v23 = vmov 0.0|0.0   ;;  %v3245_v26 = vld [vmem:[%s6633_s6 + $0x18] sm:$0xff] }
 0x83e   :  { %4967 = vmatprep.subr.bf16.mxu0 %v5277_v23 }
 0x8b3   :  { %v2817_v30 = vpop.f32.mrb[28].mxu0  ;;  %v2888_v35 = vpop.f32.mrb[28].mxu1 }
 0x8b4   :  { %v2818_v39 = vadd.f32 %v2817_v30, %v7258_v36  ;;  %v2819_v43 = vpop.f32.mrb[29].mxu0  ;;  %v2890_v48 = vpop.f32.mrb[29].mxu1  ;;  %v2889_v62 = vadd.f32 %v2888_v35, %v6954_v27  ;;  %v3246_v35 = vld [vmem:[%s6633_s6 + $0x20] sm:$0xff] }
 0x8b5   :  { %v2820_v51 = vadd.f32 %v2819_v43, %v6953_v4  ;;  %v2891_v3 = vadd.f32 %v2890_v48, %v6955_v52  ;;  %v3248_v48 = vld [vmem:[%s6633_s6 + $0x30] sm:$0xff] }
 0x8b6   :  { %v2893_v55 = vmul.f32 0.5, %v2818_v39  ;;  %v3247_v39 = vld [vmem:[%s6633_s6 + $0x28] sm:$0xff] }
 0x8b7   :  { %v2897_v59 = vmul.f32 0.5, %v2820_v51  ;;  %v2902_v6 = vmul.f32 0.5, %v2891_v3  ;;  %v4974_v43 = vpack.c.bf16 %v3247_v39, %v3246_v35  ;;  %v3249_v51 = vld [vmem:[%s6633_s6 + $0x38] sm:$0xff] }
 0x8b8   :  { %5192 = vtanh.f32 %v2893_v55  ;;  %v4977_v55 = vpack.c.bf16 %v3249_v51, %v3248_v48 }
 0x8b9   :  { %5194 = vtanh.f32 %v2897_v59  ;;  %v3250_v59 = vld [vmem:[%s6633_s6 + $0x40] sm:$0xff] }
 0x8ba   :  { %5196 = vtanh.f32 %v2889_v62  ;;  %v3251_v62 = vld [vmem:[%s6633_s6 + $0x48] sm:$0xff] }
 0x8bb   :  { %5198 = vtanh.f32 %v2902_v6  ;;  %v4980_v3 = vpack.c.bf16 %v3251_v62, %v3250_v59  ;;  %v3252_v6 = vld [vmem:[%s6633_s6 + $0x50] sm:$0xff] }
 0x8c2   :  { %v5193_v9 = vpop.eup %5192 }
 0x8c3   :  { %v5195_v12 = vpop.eup %5194  ;;  %v2895_v16 = vadd.f32 1.0, %v5193_v9  ;;  %v3253_v9 = vld [vmem:[%s6633_s6 + $0x58] sm:$0xff] }
 0x8c4   :  { %v2899_v20 = vadd.f32 1.0, %v5195_v12  ;;  %v5197_v29 = vpop.eup %5196  ;;  %v4983_v12 = vpack.c.bf16 %v3253_v9, %v3252_v6 }
 0x8c5   :  { %v2896_v25 = vmul.f32 0.5, %v2895_v16  ;;  %v5199_v53 = vpop.eup %5198  ;;  %v3254_v16 = vld [vmem:[%s6633_s6 + $0x60] sm:$0xff] }
 0x8c6   :  { %v2900_v34 = vmul.f32 0.5, %v2899_v20  ;;  %v2904_v57 = vadd.f32 1.0, %v5199_v53  ;;  %v3255_v20 = vld [vmem:[%s6633_s6 + $0x68] sm:$0xff] }
 0x8c7   :  { %v2907_v40 = vmul.f32 %v5197_v29, %v2896_v25  ;;  %v4986_v25 = vpack.c.bf16 %v3255_v20, %v3254_v16  ;;  %v3256_v29 = vld [vmem:[%s6633_s6 + $0x70] sm:$0xff] }
 0x8c8   :  { %v2906_v44 = vmul.f32 %v2900_v34, %v6450_v42  ;;  %v2905_v28 = vmul.f32 0.5, %v2904_v57  ;;  %v3257_v34 = vld [vmem:[%s6633_s6 + $0x78] sm:$0xff] }
 0x8ca   :  { %v6562_v47 = vadd.f32 %v2907_v40, %v2906_v44  ;;  %v4989_v40 = vpack.c.bf16 %v3257_v34, %v3256_v29 }
 0x8cc   :  { %5200 = vtanh.f32 %v6562_v47 }
 0x8d3   :  { %v2984_v61 = vpop.f32.mrb[14].mxu0  ;;  %v3055_v2 = vpop.f32.mrb[14].mxu1 }
 0x8d4   :  { %v5005_v8 = vadd.f32 %v2984_v61, %v6894_v32  ;;  %v2986_v13 = vpop.f32.mrb[15].mxu0  ;;  %v3057_v19 = vpop.f32.mrb[15].mxu1  ;;  %v5021_v42 = vadd.f32 %v3055_v2, %v5746_v18 }
 0x8d5   :  { %v5006_v37 = vadd.f32 %v2986_v13, %v7259_v33  ;;  %v5022_v5 = vadd.f32 %v3057_v19, %v5753_v11  ;;  %v3242_v11 = vld [vmem:[%s6633_s6] sm:$0xff] }
 0x8d6   :  { %v5201_v38 = vpop.eup %5200  ;;  %v3064_v46 = vmul.f32 0.5, %v5005_v8  ;;  %v4968_v15 = vpack.c.bf16 %v3243_v1, %v3242_v11 }
 0x8d7   :  { %v3068_v58 = vmul.f32 0.5, %v5006_v37  ;;  %v2910_v41 = vmul.f32 %v5201_v38, %v2905_v28  ;;  %v3073_v54 = vmul.f32 0.5, %v5022_v5 }
 0x8d8   :  { %5202 = vtanh.f32 %v3064_v46 }
 0x8d9   :  { %5204 = vtanh.f32 %v3068_v58  ;;  %3146 = vmatprep.mubr.f32.mxu0 %v2910_v41  ;;  %3217 = vmatprep.mubr.f32.mxu1 %v2910_v41 }
 0x8da   :  { %5206 = vtanh.f32 %v5021_v42 }
 0x8db   :  { %5208 = vtanh.f32 %v3073_v54 }
 0x8e2   :  { %v5203_v32 = vpop.eup %5202 }
 0x8e3   :  { %v5205_v50 = vpop.eup %5204  ;;  %v3066_v17 = vadd.f32 1.0, %v5203_v32 }
 0x8e4   :  { %v3070_v14 = vadd.f32 1.0, %v5205_v50  ;;  %v5207_v60 = vpop.eup %5206 }
 0x8e5   :  { %v3067_v10 = vmul.f32 0.5, %v3066_v17  ;;  %v5209_v18 = vpop.eup %5208 }
 0x8e6   :  { %v3071_v63 = vmul.f32 0.5, %v3070_v14  ;;  %v3075_v24 = vadd.f32 1.0, %v5209_v18 }
 0x8e7   :  { %v3078_v56 = vmul.f32 %v5207_v60, %v3067_v10 }
 0x8e8   :  { %v3077_v45 = vmul.f32 %v3071_v63, %v6458_v49  ;;  %v3076_v7 = vmul.f32 0.5, %v3075_v24  ;;  %v3244_v49 = vld [vmem:[%s6633_s6 + $0x10] sm:$0xff] }
 0x8e9   :  { %v4971_v30 = vpack.c.bf16 %v3245_v26, %v3244_v49 }
 0x8ea   :  { %v3079_v22 = vadd.f32 %v3078_v56, %v3077_v45 }
 0x8ec   :  { %5210 = vtanh.f32 %v3079_v22 }
 0x8f6   :  { %v5211_v31 = vpop.eup %5210 }
 0x8f7   :  { %v3081_v21 = vmul.f32 %v5211_v31, %v3076_v7 }
 0x8f9   :  { %3147 = vmatmul.mubr.f32.vlgmr.msra.gmra.mrb[30].mxu0 %v3081_v21  ;;  %3218 = vmatmul.mubr.f32.vlgmr.msra.gmra.mrb[30].mxu1 %v3081_v21 }
 0x8fa   :  { %4969 = vmatpush3.bf16.msra.mxu0 %v4968_v15  ;;  %3420 = vmatprep.mubr.msk.f32.mxu0 %vm5278_vm1, %v6833_v0 }
 0x8fb   :  { %4970 = vmatprep.subr.bf16.mxu0 %v5277_v23 }
 0x8fe   :  { %4972 = vmatpush3.bf16.msra.mxu0 %v4971_v30 }
 0x8ff   :  { %4973 = vmatprep.subr.bf16.mxu0 %v5277_v23 }
 0x902   :  { %4975 = vmatpush3.bf16.msra.mxu0 %v4974_v43 }
 0x903   :  { %4976 = vmatprep.subr.bf16.mxu0 %v5277_v23 }
 0x906   :  { %4978 = vmatpush3.bf16.msra.mxu0 %v4977_v55 }
 0x907   :  { %4979 = vmatprep.subr.bf16.mxu0 %v5277_v23 }
 0x90a   :  { %4981 = vmatpush3.bf16.msra.mxu0 %v4980_v3 }
 0x90b   :  { %4982 = vmatprep.subr.bf16.mxu0 %v5277_v23 }
 0x90e   :  { %4984 = vmatpush3.bf16.msra.mxu0 %v4983_v12 }
 0x90f   :  { %4985 = vmatprep.subr.bf16.mxu0 %v5277_v23 }
 0x912   :  { %4987 = vmatpush3.bf16.msra.mxu0 %v4986_v25 }
 0x913   :  { %4988 = vmatprep.subr.bf16.mxu0 %v5277_v23 }
 0x916   :  { %4990 = vmatpush3.bf16.msra.mxu0 %v4989_v40 }
 0x9cc   :  { %v3148_v44 = vpop.f32.mrb[30].mxu0  ;;  %v3219_v53 = vpop.f32.mrb[30].mxu1 }
 0x9cd   :  { %v3149_v57 = vadd.f32 %v3148_v44, %v7258_v36  ;;  %v3150_v61 = vpop.f32.mrb[31].mxu0  ;;  %v3221_v2 = vpop.f32.mrb[31].mxu1  ;;  %v3220_v28 = vadd.f32 %v3219_v53, %v6954_v27 }
 0x9ce   :  { %v3151_v8 = vadd.f32 %v3150_v61, %v6953_v4  ;;  %v3222_v33 = vadd.f32 %v3221_v2, %v6955_v52  ;;  %v3370_v52 = vld [vmem:[#allocation3] ss:$0 sm:$0xff] }
 0x9cf   :  { %v3224_v13 = vmul.f32 0.5, %v3149_v57 }
 0x9d0   :  { %v3228_v19 = vmul.f32 0.5, %v3151_v8  ;;  %v3233_v37 = vmul.f32 0.5, %v3222_v33 }
 0x9d1   :  { %5212 = vtanh.f32 %v3224_v13 }
 0x9d2   :  { %5214 = vtanh.f32 %v3228_v19 }
 0x9d3   :  { %5216 = vtanh.f32 %v3220_v28 }
 0x9d4   :  { %5218 = vtanh.f32 %v3233_v37 }
 0x9db   :  { %v5213_v38 = vpop.eup %5212 }
 0x9dc   :  { %v5215_v0 = vpop.eup %5214  ;;  %v3226_v46 = vadd.f32 1.0, %v5213_v38 }
 0x9dd   :  { %v3230_v58 = vadd.f32 1.0, %v5215_v0  ;;  %v5217_v41 = vpop.eup %5216 }
 0x9de   :  { %v3227_v36 = vmul.f32 0.5, %v3226_v46  ;;  %v5219_v32 = vpop.eup %5218 }
 0x9df   :  { %v3231_v42 = vmul.f32 0.5, %v3230_v58  ;;  %v3235_v27 = vadd.f32 1.0, %v5219_v32 }
 0x9e0   :  { %v3238_v5 = vmul.f32 %v5217_v41, %v3227_v36 }
 0x9e1   :  { %v3237_v4 = vmul.f32 %v3231_v42, %v6562_v47  ;;  %v3236_v50 = vmul.f32 0.5, %v3235_v27 }
 0x9e3   :  { %v3239_v54 = vadd.f32 %v3238_v5, %v3237_v4 }
 0x9e5   :  { %5220 = vtanh.f32 %v3239_v54 }
 0x9ef   :  { %v5221_v17 = vpop.eup %5220 }
 0x9f0   :  { %v3241_v14 = vmul.f32 %v5221_v17, %v3236_v50 }
 0x9f2   :  { %3421 = vmatmul.mubr.f32.vlgmr.msra.gmra.mrb[32].mxu0 %v3241_v14 }
 0xac5   :  { %v3331_v10 = vpop.f32.mrb[32].mxu0 }
 0xac6   :  { %v3332_v60 = vadd.f32 %v3370_v52, %v3331_v10  ;;  %v3422_v63 = vpop.f32.mrb[33].mxu0 }
 0xac8   :  { %v3335_v56 = vmul.f32 0.5, %v3332_v60 }
 0xaca   :  { %5222 = vtanh.f32 %v3335_v56 }
 0xad4   :  { %v5223_v45 = vpop.eup %5222 }
 0xad5   :  { %v3337_v22 = vadd.f32 1.0, %v5223_v45 }
 0xad7   :  { %v3338_v18 = vmul.f32 0.5, %v3337_v22 }
 0xad9   :  { %3340 = vst.msk [vmem:[%s6635_s8] sm:$0xff] %vm3339_vm2, %v3338_v18 }
 0xada   :  { %3345 = vsyncpa [#allocation5], 1 }
 0xadb   :  { %3346 = vsyncpa [#allocation7], 1 }

</bundles_post_ra>
